<compile_context>
chip_gen: v5e
topology: v5e:2x2
jax: 0.10.0
libtpu: 0.0.40
codegen_flags: <defaults>
</compile_context>

<pallas_src>
import functools

import jax
import jax.numpy as jnp
from jax.experimental import pallas as pl
from jax.experimental.pallas import tpu as pltpu

EMBED_DIMS = 32
NUM_POINTS = 4
EXTENT = 0.5
PC_RANGE = (-50.0, -50.0, -4.0, 50.0, 50.0, 4.0)
IMG_NORM_W = 480.0   # fixed constants in the reference module's sampling()
IMG_NORM_H = 224.0
ROW_TILE = 256


# ---------------------------------------------------------------------------
# Fused kernel: bilinear grid_sample (separable one-hot matmul, bf16 MXU)
#               + positional-encoding MLP + residual add.
# ---------------------------------------------------------------------------
def _fused_sample_kernel(coord_ref, img_ref, colmap_ref,
                         w1_ref, b1_ref, w2_ref, b2_ref,
                         out_ref, *, H, W):
    f32 = jnp.float32
    c = coord_ref[...]                                  # (T, 8) [ix, iy, nx, ny, nz, pad]

    # --- bilinear corner coordinates / weights (align_corners=False, zero padding) ---
    ix = jnp.clip(c[:, 0:1], -2.0, W + 1.0)             # keep int conversion safe
    iy = jnp.clip(c[:, 1:2], -2.0, H + 1.0)
    x0 = jnp.floor(ix)
    y0 = jnp.floor(iy)
    wx1 = ix - x0
    wx0 = 1.0 - wx1
    wy1 = iy - y0
    wy0 = 1.0 - wy1
    x0i = x0.astype(jnp.int32)
    y0i = y0.astype(jnp.int32)

    hrow = colmap_ref[0:1, :]                           # (1, HW) row index of each pixel
    wcol = colmap_ref[1:2, :]                           # (1, HW) col index of each pixel

    # Separable one-hot build: OOB corner indices never match -> zero (zero padding).
    wy = jnp.where(hrow == y0i, wy0, 0.0) + jnp.where(hrow == y0i + 1, wy1, 0.0)
    wx = jnp.where(wcol == x0i, wx0, 0.0) + jnp.where(wcol == x0i + 1, wx1, 0.0)
    wmat = (wy * wx).astype(jnp.bfloat16)               # (T, HW)

    # grid_sample as a single bf16 MXU matmul: (T, HW) @ (HW, D) -> (T, D) f32
    sampled = jnp.dot(wmat, img_ref[...], preferred_element_type=f32)

    # --- positional encoding MLP on pc-range-normalized points (nx, ny, nz) ---
    w1 = w1_ref[...]                                    # (3, 2D) f32, K=3 -> VPU FMAs
    h1 = (c[:, 2:3] * w1[0:1, :] + c[:, 3:4] * w1[1:2, :]
          + c[:, 4:5] * w1[2:3, :] + b1_ref[...])
    h1 = jnp.maximum(h1, 0.0).astype(jnp.bfloat16)      # (T, 2D)
    pos = jnp.dot(h1, w2_ref[...], preferred_element_type=f32) + b2_ref[...]

    out_ref[...] = sampled + pos


def _fused_sample_call(coords, img_hwd, colmap, params, H, W, tile):
    bn, lpp, _ = coords.shape
    d = img_hwd.shape[-1]
    w1 = params['w1']
    b1 = params['b1']
    w2 = params['w2'].astype(jnp.bfloat16)
    b2 = params['b2']
    kernel = functools.partial(_fused_sample_kernel, H=H, W=W)
    return pl.pallas_call(
        kernel,
        out_shape=jax.ShapeDtypeStruct((bn, lpp, d), jnp.float32),
        grid=(bn, lpp // tile),
        in_specs=[
            pl.BlockSpec((None, tile, 8), lambda i, j: (i, j, 0)),
            pl.BlockSpec((None, H * W, d), lambda i, j: (i, 0, 0)),   # fetched once/camera
            pl.BlockSpec((2, H * W), lambda i, j: (0, 0)),
            pl.BlockSpec(w1.shape, lambda i, j: (0, 0)),
            pl.BlockSpec(b1.shape, lambda i, j: (0, 0)),
            pl.BlockSpec(w2.shape, lambda i, j: (0, 0)),
            pl.BlockSpec(b2.shape, lambda i, j: (0, 0)),
        ],
        out_specs=pl.BlockSpec((None, tile, d), lambda i, j: (i, j, 0)),
        compiler_params=pltpu.CompilerParams(
            dimension_semantics=("parallel", "parallel"),
            vmem_limit_bytes=32 * 1024 * 1024),
    )(coords, img_hwd, colmap, w1, b1, w2, b2)


# ---------------------------------------------------------------------------
# Wrapper: GaussianOrthLayer.forward
# ---------------------------------------------------------------------------
def gaussian_orth_forward(means3D, img_features, direction_vector, cov3D, lidar2img,
                          params, extent=EXTENT, num_points=NUM_POINTS, tile=ROW_TILE):
    b, n = lidar2img.shape[:2]
    bn, h, w, _ = means3D.shape
    l = h * w
    _, d, H, W = img_features.shape
    p_all = 5 * num_points

    means = means3D.reshape(b, n, l, 3)
    dirs = direction_vector.reshape(b, n, l, 3)
    cov = cov3D.reshape(b, n, l, 3, 3)

    # uncertainty scale: sqrt(d^T Sigma d), 5 offsets along d, num_points along orth(d)
    var = jnp.einsum('bnli,bnlij,bnlj->bnl', dirs, cov, dirs)
    sigma = jnp.sqrt(var)                                               # (b,n,l)
    orth = jnp.stack([dirs[..., 1], -dirs[..., 0], jnp.zeros_like(dirs[..., 0])], axis=-1)
    t = jnp.linspace(-1.5, 1.5, 5, dtype=jnp.float32)
    s = jnp.linspace(-extent, extent, num_points, dtype=jnp.float32)

    # pts[b,n,l,i5,ip,:] = mean + t[i5]*sigma*dir + s[ip]*orth  (p = i5*P + ip, as torch)
    pts = (means[:, :, :, None, None, :]
           + (t[:, None, None] * sigma[:, :, :, None, None, None]) * dirs[:, :, :, None, None, :]
           + s[None, :, None] * orth[:, :, :, None, None, :])           # (b,n,l,5,P,3)
    sampling_points = pts.reshape(b, n, l, p_all, 3)

    # lidar2img projection + perspective divide (these are module outputs anyway)
    cam = (jnp.einsum('bnij,bnlpj->bnlpi', lidar2img[:, :, :, :3], sampling_points)
           + lidar2img[:, :, None, None, :, 3])                         # (b,n,l,p,4)
    homo = jnp.maximum(cam[..., 2:3], 1e-6)
    sampling_points_cam = cam[..., 0:2] / homo                          # (b,n,l,p,2)

    # grid_sample pixel coords (align_corners=False) on the (H, W) feature map
    ix = sampling_points_cam[..., 0] / IMG_NORM_W * W - 0.5
    iy = sampling_points_cam[..., 1] / IMG_NORM_H * H - 0.5

    # pc-range normalization for the positional-encoding MLP
    lo = jnp.array(PC_RANGE[:3], jnp.float32)
    hi = jnp.array(PC_RANGE[3:], jnp.float32)
    pts_norm = jnp.clip((sampling_points - lo) / (hi - lo), 0.0, 1.0)   # (b,n,l,p,3)

    # packed per-point kernel input: [ix, iy, nx, ny, nz, 0, 0, 0]
    coords = jnp.concatenate(
        [ix[..., None], iy[..., None], pts_norm,
         jnp.zeros(ix.shape + (3,), jnp.float32)], axis=-1)             # (b,n,l,p,8)
    coords = coords.reshape(bn, l * p_all, 8)

    # pad the per-camera point rows to a multiple of the row tile
    lp = l * p_all
    lpp = ((lp + tile - 1) // tile) * tile
    if lpp != lp:
        pad = jnp.zeros((bn, lpp - lp, 8), jnp.float32).at[..., 0:2].set(-10.0)
        coords = jnp.concatenate([coords, pad], axis=1)

    # NCHW image features -> (bn, H*W, D) bf16 for the bf16 sample matmul
    img_hwd = img_features.transpose(0, 2, 3, 1).reshape(bn, H * W, d).astype(jnp.bfloat16)

    # precomputed (row, col) index of every flattened pixel (avoids in-kernel int div)
    colidx = jnp.arange(H * W, dtype=jnp.int32)
    colmap = jnp.stack([colidx // W, colidx % W], axis=0)               # (2, HW)

    feats = _fused_sample_call(coords, img_hwd, colmap, params, H, W, tile)
    feats = feats[:, :lp, :].reshape(b, n, l, p_all, d)

    sampling_features = feats.reshape(b, n * l, p_all, d)               # .flatten(1, 2)
    sampling_points_out = sampling_points.reshape(b, n * l, p_all, 3)   # .flatten(1, 2)
    return sampling_features, sampling_points_cam, sampling_points_out


# ---------------------------------------------------------------------------
# Deterministic synthetic parameters (PositionalEncodingMap MLP: 3 -> 2D -> D)
# ---------------------------------------------------------------------------
def init_params(key, embed_dims=EMBED_DIMS):
    d = embed_dims
    k1, k2 = jax.random.split(key, 2)

    def lin(k, fin, fout):
        lim = 1.0 / jnp.sqrt(jnp.float32(fin))
        return jax.random.uniform(k, (fin, fout), jnp.float32, -lim, lim)

    return dict(
        w1=lin(k1, 3, 2 * d), b1=jnp.zeros((1, 2 * d), jnp.float32),
        w2=lin(k2, 2 * d, d), b2=jnp.zeros((1, d), jnp.float32),
    )


if __name__ == "__main__":
    key = jax.random.PRNGKey(0)
    k_img, k_mean, k_dir, k_cov, k_param = jax.random.split(key, 5)

    b, n = 1, 2
    bn = b * n
    d = EMBED_DIMS
    h = w = 8                        # per-camera gaussian grid -> l = 64, 1280 points/cam
    H_img, W_img = 8, 16             # image feature map given to grid_sample

    img_features = jax.random.normal(k_img, (bn, d, H_img, W_img), jnp.float32)

    # gaussian means in front of the synthetic pinhole camera
    mx = jax.random.uniform(k_mean, (bn, h, w, 1), jnp.float32, -2.0, 2.0)
    my = jax.random.uniform(jax.random.fold_in(k_mean, 1), (bn, h, w, 1), jnp.float32, -2.0, 2.0)
    mz = jax.random.uniform(jax.random.fold_in(k_mean, 2), (bn, h, w, 1), jnp.float32, 4.0, 8.0)
    means3D = jnp.concatenate([mx, my, mz], axis=-1)

    dvec = jax.random.normal(k_dir, (bn, h, w, 3), jnp.float32)
    direction_vector = dvec / jnp.linalg.norm(dvec, axis=-1, keepdims=True)

    base = jax.random.normal(k_cov, (bn, h, w, 3, 3), jnp.float32) * 0.1
    cov3D = jnp.einsum('...ij,...kj->...ik', base, base) + 0.05 * jnp.eye(3, dtype=jnp.float32)

    # simple pinhole-ish lidar2img (b, n, 4, 4) that lands inside the 480x224 image
    l2i_single = jnp.array([[60.0, 0.0, 240.0, 0.0],
                            [0.0, 60.0, 112.0, 0.0],
                            [0.0, 0.0, 1.0, 0.0],
                            [0.0, 0.0, 0.0, 1.0]], jnp.float32)
    lidar2img = jnp.broadcast_to(l2i_single, (b, n, 4, 4))

    params = init_params(k_param, EMBED_DIMS)

    fwd = jax.jit(functools.partial(gaussian_orth_forward,
                                    extent=EXTENT, num_points=NUM_POINTS, tile=ROW_TILE))
    feats, cam_out, pts_out = fwd(means3D, img_features, direction_vector,
                                  cov3D, lidar2img, params)
    jax.block_until_ready((feats, cam_out, pts_out))

    p_all = 5 * NUM_POINTS
    l = h * w
    assert feats.shape == (b, n * l, p_all, d)
    assert cam_out.shape == (b, n, l, p_all, 2)
    assert pts_out.shape == (b, n * l, p_all, 3)
    assert bool(jnp.isfinite(feats).all())
    assert bool(jnp.isfinite(cam_out).all())
    assert bool(jnp.isfinite(pts_out).all())
    print("KERNEL_OK")
</pallas_src>

<mosaic_0001>
module attributes {stable_mosaic.version = 11 : i64} {
  func.func @_fused_sample_kernel(%arg0: i32, %arg1: i32, %arg2: memref<1x256x8xf32, #tpu.memory_space<vmem>>, %arg3: memref<1x128x32xbf16, #tpu.memory_space<vmem>>, %arg4: memref<2x128xi32, #tpu.memory_space<vmem>>, %arg5: memref<3x64xf32, #tpu.memory_space<vmem>>, %arg6: memref<1x64xf32, #tpu.memory_space<vmem>>, %arg7: memref<64x32xbf16, #tpu.memory_space<vmem>>, %arg8: memref<1x32xf32, #tpu.memory_space<vmem>>, %arg9: memref<1x256x32xf32, #tpu.memory_space<vmem>>) attributes {dimension_semantics = [#tpu.dimension_semantics<parallel>, #tpu.dimension_semantics<parallel>], iteration_bounds = array<i64: 2, 5>, scalar_prefetch = 0 : i64, scratch_operands = 0 : i64, tpu.core_type = #tpu.core_type<tc>, window_params = [{transform_indices = @transform_0, window_bounds = array<i64: 1, 256, 8>}, {transform_indices = @transform_1, window_bounds = array<i64: 1, 128, 32>}, {pipeline_mode = #tpu.pipeline_mode<synchronous>, transform_indices = @transform_2, window_bounds = array<i64: 2, 128>}, {pipeline_mode = #tpu.pipeline_mode<synchronous>, transform_indices = @transform_3, window_bounds = array<i64: 3, 64>}, {pipeline_mode = #tpu.pipeline_mode<synchronous>, transform_indices = @transform_4, window_bounds = array<i64: 1, 64>}, {pipeline_mode = #tpu.pipeline_mode<synchronous>, transform_indices = @transform_5, window_bounds = array<i64: 64, 32>}, {pipeline_mode = #tpu.pipeline_mode<synchronous>, transform_indices = @transform_6, window_bounds = array<i64: 1, 32>}, {transform_indices = @transform_7, window_bounds = array<i64: 1, 256, 32>}]} {
    %c0 = arith.constant 0 : index
    %c0_0 = arith.constant 0 : index
    %c0_1 = arith.constant 0 : index
    %0 = vector.load %arg2[%c0, %c0_0, %c0_1] : memref<1x256x8xf32, #tpu.memory_space<vmem>>, vector<1x256x8xf32>
    %1 = vector.shape_cast %0 : vector<1x256x8xf32> to vector<256x8xf32>
    %2 = vector.extract_strided_slice %1 {offsets = [0, 0], sizes = [256, 1], strides = [1, 1]} : vector<256x8xf32> to vector<256x1xf32>
    %cst = arith.constant -2.000000e+00 : f32
    %cst_2 = arith.constant 1.700000e+01 : f32
    %3 = vector.broadcast %cst : f32 to vector<256x1xf32>
    %4 = arith.maximumf %3, %2 : vector<256x1xf32>
    %5 = vector.broadcast %cst_2 : f32 to vector<256x1xf32>
    %6 = arith.minimumf %5, %4 : vector<256x1xf32>
    %7 = vector.extract_strided_slice %1 {offsets = [0, 1], sizes = [256, 1], strides = [1, 1]} : vector<256x8xf32> to vector<256x1xf32>
    %cst_3 = arith.constant -2.000000e+00 : f32
    %cst_4 = arith.constant 9.000000e+00 : f32
    %8 = vector.broadcast %cst_3 : f32 to vector<256x1xf32>
    %9 = arith.maximumf %8, %7 : vector<256x1xf32>
    %10 = vector.broadcast %cst_4 : f32 to vector<256x1xf32>
    %11 = arith.minimumf %10, %9 : vector<256x1xf32>
    %12 = math.floor %6 : vector<256x1xf32>
    %13 = math.floor %11 : vector<256x1xf32>
    %14 = arith.subf %6, %12 : vector<256x1xf32>
    %cst_5 = arith.constant 1.000000e+00 : f32
    %15 = vector.broadcast %cst_5 : f32 to vector<256x1xf32>
    %16 = arith.subf %15, %14 : vector<256x1xf32>
    %17 = arith.subf %11, %13 : vector<256x1xf32>
    %cst_6 = arith.constant 1.000000e+00 : f32
    %18 = vector.broadcast %cst_6 : f32 to vector<256x1xf32>
    %19 = arith.subf %18, %17 : vector<256x1xf32>
    %20 = arith.fptosi %12 : vector<256x1xf32> to vector<256x1xi32>
    %21 = arith.fptosi %13 : vector<256x1xf32> to vector<256x1xi32>
    %c0_7 = arith.constant 0 : index
    %c0_8 = arith.constant 0 : index
    %22 = vector.load %arg4[%c0_7, %c0_8] : memref<2x128xi32, #tpu.memory_space<vmem>>, vector<1x128xi32>
    %c1 = arith.constant 1 : index
    %c0_9 = arith.constant 0 : index
    %23 = vector.load %arg4[%c1, %c0_9] : memref<2x128xi32, #tpu.memory_space<vmem>>, vector<1x128xi32>
    %24 = vector.broadcast %22 : vector<1x128xi32> to vector<256x128xi32>
    %25 = vector.broadcast %21 : vector<256x1xi32> to vector<256x128xi32>
    %26 = arith.cmpi eq, %24, %25 : vector<256x128xi32>
    %cst_10 = arith.constant 0.000000e+00 : f32
    %27 = vector.shape_cast %19 : vector<256x1xf32> to vector<256x1xf32>
    %28 = vector.broadcast %27 : vector<256x1xf32> to vector<256x128xf32>
    %29 = vector.broadcast %cst_10 : f32 to vector<256x128xf32>
    %30 = arith.select %26, %28, %29 : vector<256x128xi1>, vector<256x128xf32>
    %c1_i32 = arith.constant 1 : i32
    %31 = vector.broadcast %c1_i32 : i32 to vector<256x1xi32>
    %32 = arith.addi %21, %31 : vector<256x1xi32>
    %33 = vector.broadcast %22 : vector<1x128xi32> to vector<256x128xi32>
    %34 = vector.broadcast %32 : vector<256x1xi32> to vector<256x128xi32>
    %35 = arith.cmpi eq, %33, %34 : vector<256x128xi32>
    %cst_11 = arith.constant 0.000000e+00 : f32
    %36 = vector.shape_cast %17 : vector<256x1xf32> to vector<256x1xf32>
    %37 = vector.broadcast %36 : vector<256x1xf32> to vector<256x128xf32>
    %38 = vector.broadcast %cst_11 : f32 to vector<256x128xf32>
    %39 = arith.select %35, %37, %38 : vector<256x128xi1>, vector<256x128xf32>
    %40 = arith.addf %30, %39 : vector<256x128xf32>
    %41 = vector.broadcast %23 : vector<1x128xi32> to vector<256x128xi32>
    %42 = vector.broadcast %20 : vector<256x1xi32> to vector<256x128xi32>
    %43 = arith.cmpi eq, %41, %42 : vector<256x128xi32>
    %cst_12 = arith.constant 0.000000e+00 : f32
    %44 = vector.shape_cast %16 : vector<256x1xf32> to vector<256x1xf32>
    %45 = vector.broadcast %44 : vector<256x1xf32> to vector<256x128xf32>
    %46 = vector.broadcast %cst_12 : f32 to vector<256x128xf32>
    %47 = arith.select %43, %45, %46 : vector<256x128xi1>, vector<256x128xf32>
    %c1_i32_13 = arith.constant 1 : i32
    %48 = vector.broadcast %c1_i32_13 : i32 to vector<256x1xi32>
    %49 = arith.addi %20, %48 : vector<256x1xi32>
    %50 = vector.broadcast %23 : vector<1x128xi32> to vector<256x128xi32>
    %51 = vector.broadcast %49 : vector<256x1xi32> to vector<256x128xi32>
    %52 = arith.cmpi eq, %50, %51 : vector<256x128xi32>
    %cst_14 = arith.constant 0.000000e+00 : f32
    %53 = vector.shape_cast %14 : vector<256x1xf32> to vector<256x1xf32>
    %54 = vector.broadcast %53 : vector<256x1xf32> to vector<256x128xf32>
    %55 = vector.broadcast %cst_14 : f32 to vector<256x128xf32>
    %56 = arith.select %52, %54, %55 : vector<256x128xi1>, vector<256x128xf32>
    %57 = arith.addf %47, %56 : vector<256x128xf32>
    %58 = arith.mulf %40, %57 : vector<256x128xf32>
    %59 = arith.truncf %58 : vector<256x128xf32> to vector<256x128xbf16>
    %c0_15 = arith.constant 0 : index
    %c0_16 = arith.constant 0 : index
    %c0_17 = arith.constant 0 : index
    %60 = vector.load %arg3[%c0_15, %c0_16, %c0_17] : memref<1x128x32xbf16, #tpu.memory_space<vmem>>, vector<1x128x32xbf16>
    %61 = vector.shape_cast %60 : vector<1x128x32xbf16> to vector<128x32xbf16>
    %cst_18 = arith.constant dense<0.000000e+00> : vector<256x32xf32>
    %62 = tpu.matmul %59, %61, %cst_18 {dimension_numbers = #tpu.dot_dimension_numbers<[1], [0], [0], [1], [0, 0, 1, 1], [], []>} : vector<256x128xbf16>, vector<128x32xbf16>, vector<256x32xf32> -> vector<256x32xf32>
    %c0_19 = arith.constant 0 : index
    %c0_20 = arith.constant 0 : index
    %63 = vector.load %arg5[%c0_19, %c0_20] : memref<3x64xf32, #tpu.memory_space<vmem>>, vector<3x64xf32>
    %64 = vector.extract_strided_slice %1 {offsets = [0, 2], sizes = [256, 1], strides = [1, 1]} : vector<256x8xf32> to vector<256x1xf32>
    %65 = vector.extract_strided_slice %63 {offsets = [0, 0], sizes = [1, 64], strides = [1, 1]} : vector<3x64xf32> to vector<1x64xf32>
    %66 = vector.broadcast %64 : vector<256x1xf32> to vector<256x64xf32>
    %67 = vector.broadcast %65 : vector<1x64xf32> to vector<256x64xf32>
    %68 = arith.mulf %66, %67 : vector<256x64xf32>
    %69 = vector.extract_strided_slice %1 {offsets = [0, 3], sizes = [256, 1], strides = [1, 1]} : vector<256x8xf32> to vector<256x1xf32>
    %70 = vector.extract_strided_slice %63 {offsets = [1, 0], sizes = [1, 64], strides = [1, 1]} : vector<3x64xf32> to vector<1x64xf32>
    %71 = vector.broadcast %69 : vector<256x1xf32> to vector<256x64xf32>
    %72 = vector.broadcast %70 : vector<1x64xf32> to vector<256x64xf32>
    %73 = arith.mulf %71, %72 : vector<256x64xf32>
    %74 = arith.addf %68, %73 : vector<256x64xf32>
    %75 = vector.extract_strided_slice %1 {offsets = [0, 4], sizes = [256, 1], strides = [1, 1]} : vector<256x8xf32> to vector<256x1xf32>
    %76 = vector.extract_strided_slice %63 {offsets = [2, 0], sizes = [1, 64], strides = [1, 1]} : vector<3x64xf32> to vector<1x64xf32>
    %77 = vector.broadcast %75 : vector<256x1xf32> to vector<256x64xf32>
    %78 = vector.broadcast %76 : vector<1x64xf32> to vector<256x64xf32>
    %79 = arith.mulf %77, %78 : vector<256x64xf32>
    %80 = arith.addf %74, %79 : vector<256x64xf32>
    %c0_21 = arith.constant 0 : index
    %c0_22 = arith.constant 0 : index
    %81 = vector.load %arg6[%c0_21, %c0_22] : memref<1x64xf32, #tpu.memory_space<vmem>>, vector<1x64xf32>
    %82 = vector.broadcast %81 : vector<1x64xf32> to vector<256x64xf32>
    %83 = arith.addf %80, %82 : vector<256x64xf32>
    %cst_23 = arith.constant 0.000000e+00 : f32
    %84 = vector.broadcast %cst_23 : f32 to vector<256x64xf32>
    %85 = arith.maximumf %83, %84 : vector<256x64xf32>
    %86 = arith.truncf %85 : vector<256x64xf32> to vector<256x64xbf16>
    %c0_24 = arith.constant 0 : index
    %c0_25 = arith.constant 0 : index
    %87 = vector.load %arg7[%c0_24, %c0_25] : memref<64x32xbf16, #tpu.memory_space<vmem>>, vector<64x32xbf16>
    %cst_26 = arith.constant dense<0.000000e+00> : vector<256x32xf32>
    %88 = tpu.matmul %86, %87, %cst_26 {dimension_numbers = #tpu.dot_dimension_numbers<[1], [0], [0], [1], [0, 0, 1, 1], [], []>} : vector<256x64xbf16>, vector<64x32xbf16>, vector<256x32xf32> -> vector<256x32xf32>
    %c0_27 = arith.constant 0 : index
    %c0_28 = arith.constant 0 : index
    %89 = vector.load %arg8[%c0_27, %c0_28] : memref<1x32xf32, #tpu.memory_space<vmem>>, vector<1x32xf32>
    %90 = vector.broadcast %89 : vector<1x32xf32> to vector<256x32xf32>
    %91 = arith.addf %88, %90 : vector<256x32xf32>
    %92 = arith.addf %62, %91 : vector<256x32xf32>
    %c0_29 = arith.constant 0 : index
    %c0_30 = arith.constant 0 : index
    %c0_31 = arith.constant 0 : index
    %93 = vector.load %arg9[%c0_29, %c0_30, %c0_31] : memref<1x256x32xf32, #tpu.memory_space<vmem>>, vector<1x256x32xf32>
    %94 = vector.shape_cast %93 : vector<1x256x32xf32> to vector<256x32xf32>
    %95 = vector.shape_cast %92 : vector<256x32xf32> to vector<1x256x32xf32>
    tpu.vector_store %arg9[%c0_29, %c0_30, %c0_31], %95 {strides = array<i32>} : memref<1x256x32xf32, #tpu.memory_space<vmem>>, vector<1x256x32xf32>,
    return
  }
  func.func @transform_0(%arg0: i32, %arg1: i32) -> (i32, i32, i32) {
    %c0_i32 = arith.constant 0 : i32
    %c0_i32_0 = arith.constant 0 : i32
    return %arg0, %arg1, %c0_i32 : i32, i32, i32
  }
  func.func @transform_1(%arg0: i32, %arg1: i32) -> (i32, i32, i32) {
    %c0_i32 = arith.constant 0 : i32
    %c0_i32_0 = arith.constant 0 : i32
    %c0_i32_1 = arith.constant 0 : i32
    return %arg0, %c0_i32, %c0_i32_0 : i32, i32, i32
  }
  func.func @transform_2(%arg0: i32, %arg1: i32) -> (i32, i32) {
    %c0_i32 = arith.constant 0 : i32
    %c0_i32_0 = arith.constant 0 : i32
    %c0_i32_1 = arith.constant 0 : i32
    return %c0_i32, %c0_i32_0 : i32, i32
  }
  func.func @transform_3(%arg0: i32, %arg1: i32) -> (i32, i32) {
    %c0_i32 = arith.constant 0 : i32
    %c0_i32_0 = arith.constant 0 : i32
    %c0_i32_1 = arith.constant 0 : i32
    return %c0_i32, %c0_i32_0 : i32, i32
  }
  func.func @transform_4(%arg0: i32, %arg1: i32) -> (i32, i32) {
    %c0_i32 = arith.constant 0 : i32
    %c0_i32_0 = arith.constant 0 : i32
    %c0_i32_1 = arith.constant 0 : i32
    return %c0_i32, %c0_i32_0 : i32, i32
  }
  func.func @transform_5(%arg0: i32, %arg1: i32) -> (i32, i32) {
    %c0_i32 = arith.constant 0 : i32
    %c0_i32_0 = arith.constant 0 : i32
    %c0_i32_1 = arith.constant 0 : i32
    return %c0_i32, %c0_i32_0 : i32, i32
  }
  func.func @transform_6(%arg0: i32, %arg1: i32) -> (i32, i32) {
    %c0_i32 = arith.constant 0 : i32
    %c0_i32_0 = arith.constant 0 : i32
    %c0_i32_1 = arith.constant 0 : i32
    return %c0_i32, %c0_i32_0 : i32, i32
  }
  func.func @transform_7(%arg0: i32, %arg1: i32) -> (i32, i32, i32) {
    %c0_i32 = arith.constant 0 : i32
    %c0_i32_0 = arith.constant 0 : i32
    return %arg0, %arg1, %c0_i32 : i32, i32, i32
  }
}

</mosaic_0001>

<bundles_post_ra>
// kernel: gaussian_orth_forward.1
= control target key start
LH: loop header
LB: loop body
LE: loop exit
PB: predicated region body
PF: predicated region fallthrough
CT: control target
= control target key end

     0   :  { %s3758_s24 = smov 0   ;;  %s3760_s25 = smov 0   ;;  %s6861_s0 = inlined_call_operand.vmem [shape: f32[2,1280,8], index: 0, kind: input, shape index: {}]   ;;  %s6862_s1 = inlined_call_operand.vmem [shape: bf16[2,128,32], index: 1, kind: input, shape index: {}]   ;;  %s6863_s2 = inlined_call_operand.vmem [shape: s32[2,128], index: 2, kind: input, shape index: {}]   ;;  %s6864_s3 = inlined_call_operand.vmem [shape: f32[3,64], index: 3, kind: input, shape index: {}]   ;;  %s6865_s4 = inlined_call_operand.vmem [shape: f32[1,64], index: 4, kind: input, shape index: {}]   ;;  %s6866_s5 = inlined_call_operand.vmem [shape: bf16[64,32], index: 5, kind: input, shape index: {}]   ;;  %s6867_s6 = inlined_call_operand.vmem [shape: f32[1,32], index: 6, kind: input, shape index: {}]   ;;  %s6868_s7 = inlined_call_operand.vmem [shape: f32[2,1280,32], index: 7, kind: output, shape index: {}]  }
   0x1   :  { %s3762_s26 = smov 0   ;;  %s3764_s27 = smov 0  }
   0x2   :  { %s3766_s28 = smov 0  }
   0x3 LB: > { %s26_s29 = sadd.s32 1, %s3703_s26  ;;  %s29_s30 = sadd.s32 1, %s3707_s27  ;;  %s3711_s28 = sphi %s3766_s28, %s17_s28   ;;  %s3707_s27 = sphi %s3764_s27, %s7770_s27   ;;  %s3703_s26 = sphi %s3762_s26, %s7769_s26   ;;  %s3699_s25 = sphi %s3760_s25, %s7768_s25   ;;  %s3695_s24 = sphi %s3758_s24, %s7767_s24  }
   0x4   : > { %p27_p0 = scmp.ge.s32.totalorder %s26_s29, 5  ;;  %p3313_p1 = scmp.ge.s32.totalorder %s3711_s28, 1 }
   0x5   : > { %p268_p2 = scmp.lt.s32.totalorder %s3711_s28, 11 }
   0x6   : > { %s7772_s29 = smov (%p27_p0, %s26_s29), 0  ;;  %s7774_s30 = smov (!%p27_p0, %s29_s30), %s3707_s27 }
   0x7   : > { %p269_p3 = pnand %p3313_p1, %p268_p2  ;;  %p31_p4 = scmp.ge.s32.totalorder %s7774_s30, 2 }
   0x9   : > { %s7776_s30 = smov (%p31_p4, %s7774_s30), 0  ;;  %272 = sbr.rel (%p269_p3) target bundleno = 1273 (0x4f9), region = 48 }
   0xe   : > { %s3314_s8 = sshll.u32 %s3695_s24, 5  ;;  %p314_p5 = scmp.lt.s32.totalorder %s3699_s25, 1  ;;  %v3713_v0 = vmov 1  }
   0xf   : > { %3587 = vset.pattern.permute.xlu2 %v3713_v0  ;;  %3586 = vset.pattern.permute.xlu1 %v3713_v0  ;;  %p316_p6 = scmp.lt.s32.totalorder %s3314_s8, 159 }
  0x10   : > { %3585 = vset.pattern.permute.xlu0 %v3713_v0  ;;  %s7778_s25 = smov (!%p314_p5, %s3699_s25), 1 }
  0x11   : > { %s7780_s8 = smov (!%p316_p6, %s3314_s8), 159  ;;  %s3411_s9 = smul.u32 160, %s7778_s25 }
  0x12   : > { %s3386_s15 = sshll.u32 %s7778_s25, 6 }
  0x13   : > { %s3791_s10 = sadd.s32 %s3411_s9, %s7780_s8  ;;  %s5385_s18 = scalar_lea.vmem %s6862_s1, %s3386_s15 }
  0x14   : > { %s3315_s11 = sshll.u32 %s3791_s10, 3 }
  0x15   : > { %s3799_s14 = scalar_lea.vmem %s6861_s0, %s3315_s11  ;;  %s6717_s23 = scalar_lea.vmem %s6868_s7, %s3315_s11 }
  0x16   : > { %v3802_v1 = vld [vmem:[%s3799_s14 + $0x20] sm:$0xff]  ;;  %v3805_v2 = vld [vmem:[%s3799_s14 + $0x10] sm:$0xff]  ;;  %v3814_v7 = vld [vmem:[%s3799_s14 + $0x28] sm:$0xff] }
  0x17   : > { %7100 = vst [vmem:[#allocation2_spill] sm:$0xff] %v3802_v1  ;;  %v3808_v3 = vld [vmem:[%s3799_s14] sm:$0xff]  ;;  %v6879_v4 = vmax.f32 %v3802_v1, -2.0  ;;  %v6882_v5 = vmax.f32 %v3805_v2, -2.0  ;;  %v3817_v8 = vld [vmem:[%s3799_s14 + $0x18] sm:$0xff]  ;;  %v3820_v9 = vld [vmem:[%s3799_s14 + $0x8] sm:$0xff] }
  0x18   : > { %7101 = vst [vmem:[#allocation3_spill] sm:$0xff] %v3805_v2  ;;  %v6883_v6 = vmax.f32 %v3808_v3, -2.0  ;;  %v6877_v10 = vmax.f32 %v3814_v7, -2.0  ;;  %v6880_v11 = vmax.f32 %v3817_v8, -2.0  ;;  %v6881_v12 = vmax.f32 %v3820_v9, -2.0  ;;  %v3844_v22 = vld [vmem:[%s3799_s14 + $0x40] sm:$0xff] }
  0x19   : > { %7102 = vst [vmem:[#allocation4_spill] sm:$0xff] %v3808_v3  ;;  %v439_v13 = vmin.f32 %v6879_v4, 9.0  ;;  %v437_v14 = vmin.f32 %v6882_v5, 9.0  ;;  %v3847_v23 = vld [vmem:[%s3799_s14 + $0x38] sm:$0xff]  ;;  %v3858_v28 = vld [vmem:[%s3799_s14 + $0x30] sm:$0xff]  ;;  %v6871_v33 = vmax.f32 %v3844_v22, -2.0 }
  0x1a   : > { %7103 = vst [vmem:[#allocation5_spill] sm:$0xff] %v3814_v7  ;;  %v435_v15 = vmin.f32 %v6883_v6, 9.0  ;;  %v3833_v16 = vmin.f32 %v6877_v10, 9.0  ;;  %v3837_v20 = vmin.f32 %v6880_v11, 9.0  ;;  %v3841_v21 = vmin.f32 %v6881_v12, 9.0  ;;  %v3898_v43 = vld [vmem:[%s3799_s14 + $0x58] sm:$0xff] }
  0x1b   : > { %7104 = vst [vmem:[#allocation6_spill] sm:$0xff] %v3817_v8  ;;  %v503_v17 = vfloor.f32 %v439_v13  ;;  %v501_v18 = vfloor.f32 %v437_v14  ;;  %v6873_v34 = vmax.f32 %v3847_v23, -2.0  ;;  %v6878_v36 = vmax.f32 %v3858_v28, -2.0  ;;  %v3901_v44 = vld [vmem:[%s3799_s14 + $0x50] sm:$0xff]  ;;  %v3904_v45 = vld [vmem:[%s3799_s14 + $0x48] sm:$0xff]  ;;  %v3946_v60 = vld [vmem:[%s3799_s14 + $0x60] sm:$0xff] }
  0x1c   : > { %7105 = vst [vmem:[#allocation7_spill] sm:$0xff] %v3820_v9  ;;  %v499_v19 = vfloor.f32 %v435_v15  ;;  %v6896_v31 = vfloor.f32 %v3833_v16  ;;  %v6897_v32 = vfloor.f32 %v3837_v20  ;;  %v6898_v35 = vfloor.f32 %v3841_v21  ;;  %v3940_v58 = vld [vmem:[%s3799_s14 + $0x70] sm:$0xff]  ;;  %v3943_v59 = vld [vmem:[%s3799_s14 + $0x68] sm:$0xff] }
  0x1d   : > { %7106 = vst [vmem:[#allocation8_spill] sm:$0xff] %v3844_v22  ;;  %v3849_v24 = vcvt.f32.s32 %v503_v17  ;;  %v3851_v25 = vsub.f32 %v439_v13, %v503_v17  ;;  %v3853_v26 = vcvt.f32.s32 %v501_v18  ;;  %v3855_v27 = vsub.f32 %v437_v14, %v501_v18  ;;  %v4114_v22 = vld [vmem:[%s3799_s14 + $0xc0] sm:$0xff]  ;;  %v4150_v1 = vld [vmem:[%s3799_s14 + $0xe8] sm:$0xff] }
  0x1e   : > { %7107 = vst [vmem:[#allocation9_spill] sm:$0xff] %v3847_v23  ;;  %v3860_v29 = vcvt.f32.s32 %v499_v19  ;;  %v3862_v30 = vsub.f32 %v435_v15, %v499_v19  ;;  %v3875_v37 = vcvt.f32.s32 %v6896_v31  ;;  %v3879_v38 = vcvt.f32.s32 %v6897_v32 }
  0x1f   : > { %7108 = vst [vmem:[#allocation10_spill] sm:$0xff] %v3855_v27  ;;  %739 = vperm.xlu2 %3587, %v3849_v24   ;;  %733 = vperm.xlu1 %3586, %v3853_v26   ;;  %v3883_v39 = vmin.f32 %v6871_v33, 9.0  ;;  %v3887_v40 = vmin.f32 %v6873_v34, 9.0  ;;  %v3891_v41 = vcvt.f32.s32 %v6898_v35  ;;  %v3895_v42 = vmin.f32 %v6878_v36, 9.0  ;;  %v3982_v33 = vld [vmem:[%s3799_s14 + $0x88] sm:$0xff]  ;;  %v3988_v34 = vld [vmem:[%s3799_s14 + $0x78] sm:$0xff] }
  0x20   : > { %7109 = vst [vmem:[#allocation11_spill] sm:$0xff] %v3858_v28  ;;  %727 = vperm.xlu0 %3585, %v3860_v29   ;;  %v6869_v48 = vmax.f32 %v3898_v43, -2.0  ;;  %v6870_v49 = vmax.f32 %v3901_v44, -2.0  ;;  %v6872_v51 = vmax.f32 %v3904_v45, -2.0  ;;  %v6874_v63 = vmax.f32 %v3940_v58, -2.0 }
  0x21   : > { %7110 = vst [vmem:[#allocation12_spill] sm:$0xff] %v3862_v30  ;;  %v6893_v46 = vfloor.f32 %v3883_v39  ;;  %v6888_v47 = vfloor.f32 %v3887_v40  ;;  %v6895_v50 = vfloor.f32 %v3895_v42  ;;  %v6875_v0 = vmax.f32 %v3943_v59, -2.0 }
  0x22   : > { %7111 = vst [vmem:[#allocation13_spill] sm:$0xff] %v3898_v43  ;;  %v3925_v54 = vmin.f32 %v6869_v48, 9.0  ;;  %v3929_v55 = vmin.f32 %v6870_v49, 9.0  ;;  %v3937_v57 = vmin.f32 %v6872_v51, 9.0  ;;  %v6876_v14 = vmax.f32 %v3946_v60, -2.0  ;;  %v3985_v51 = vld [vmem:[%s3799_s14 + $0x80] sm:$0xff] }
  0x23   : > { %7112 = vst [vmem:[#allocation14_spill] sm:$0xff] %v3901_v44  ;;  %v3917_v52 = vcvt.f32.s32 %v6893_v46  ;;  %v3921_v53 = vcvt.f32.s32 %v6888_v47  ;;  %v3933_v56 = vcvt.f32.s32 %v6895_v50  ;;  %v3967_v18 = vmin.f32 %v6874_v63, 9.0  ;;  %v4030_v47 = vld [vmem:[%s3799_s14 + $0x90] sm:$0xff] }
  0x24   : > { %7113 = vst [vmem:[#allocation15_spill] sm:$0xff] %v3904_v45  ;;  %v6886_v61 = vfloor.f32 %v3925_v54  ;;  %v6884_v62 = vfloor.f32 %v3929_v55  ;;  %v6894_v13 = vfloor.f32 %v3937_v57  ;;  %v3971_v19 = vmin.f32 %v6875_v0, 9.0  ;;  %v4108_v44 = vld [vmem:[%s3799_s14 + $0xd0] sm:$0xff] }
  0x25   : > { %7114 = vst [vmem:[#allocation16_spill] sm:$0xff] %v3940_v58  ;;  %v3979_v49 = vmin.f32 %v6876_v14, 9.0  ;;  %v6885_v63 = vfloor.f32 %v3967_v18  ;;  %v6889_v14 = vmax.f32 %v3982_v33, -2.0  ;;  %v6890_v10 = vmax.f32 %v3985_v51, -2.0  ;;  %v4072_v58 = vld [vmem:[%s3799_s14 + $0xa8] sm:$0xff] }
  0x26   : > { %7115 = vst [vmem:[#allocation17_spill] sm:$0xff] %v3943_v59  ;;  %v3959_v15 = vcvt.f32.s32 %v6886_v61  ;;  %v3963_v17 = vcvt.f32.s32 %v6884_v62  ;;  %v3975_v48 = vcvt.f32.s32 %v6894_v13  ;;  %v6887_v0 = vfloor.f32 %v3971_v19  ;;  %v4024_v61 = vld [vmem:[%s3799_s14 + $0xa0] sm:$0xff] }
  0x27   : > { %742 = vperm.xlu2 %3587, %v3875_v37   ;;  %736 = vperm.xlu1 %3586, %v3879_v38   ;;  %7116 = vst [vmem:[#allocation18_spill] sm:$0xff] %v3946_v60  ;;  %v6892_v36 = vfloor.f32 %v3979_v49  ;;  %v6891_v4 = vmax.f32 %v3988_v34, -2.0  ;;  %v4001_v11 = vcvt.f32.s32 %v6885_v63  ;;  %v4009_v5 = vmin.f32 %v6889_v14, 9.0 }
  0x28   : > { %730 = vperm.xlu0 %3585, %v3891_v41   ;;  %7117 = vst [vmem:[#allocation19_spill] sm:$0xff] %v3982_v33  ;;  %v4005_v12 = vcvt.f32.s32 %v6887_v0  ;;  %v4013_v6 = vmin.f32 %v6890_v10, 9.0  ;;  %v4027_v0 = vld [vmem:[%s3799_s14 + $0x98] sm:$0xff]  ;;  %v6906_v13 = vmax.f32 %v4030_v47, -2.0  ;;  %v7137_v8 = vfloor.f32 %v3833_v16 }
  0x29   : > { %7118 = vst [vmem:[#allocation20_spill] sm:$0xff] %v3985_v51  ;;  %v4017_v62 = vcvt.f32.s32 %v6892_v36  ;;  %v4021_v63 = vmin.f32 %v6891_v4, 9.0  ;;  %v6900_v14 = vfloor.f32 %v4009_v5  ;;  %v6904_v4 = vmax.f32 %v4024_v61, -2.0  ;;  %v4066_v51 = vld [vmem:[%s3799_s14 + $0xb8] sm:$0xff] }
  0x2a   : > { %7119 = vst [vmem:[#allocation21_spill] sm:$0xff] %v3988_v34  ;;  %v6902_v10 = vfloor.f32 %v4013_v6  ;;  %v6905_v36 = vmax.f32 %v4027_v0, -2.0  ;;  %v4180_v9 = vsub.f32 %v3833_v16, %v7137_v8 }
  0x2b   : > { %7120 = vst [vmem:[#allocation22_spill] sm:$0xff] %v4024_v61  ;;  %v6907_v46 = vfloor.f32 %v4021_v63  ;;  %v4043_v50 = vcvt.f32.s32 %v6900_v14  ;;  %v4051_v32 = vmin.f32 %v6904_v4, 9.0  ;;  %v4063_v14 = vmin.f32 %v6906_v13, 9.0 }
  0x2c   : > { %7121 = vst [vmem:[#allocation23_spill] sm:$0xff] %v4027_v0  ;;  %v4047_v31 = vcvt.f32.s32 %v6902_v10  ;;  %v4055_v35 = vmin.f32 %v6905_v36, 9.0  ;;  %v4069_v10 = vld [vmem:[%s3799_s14 + $0xb0] sm:$0xff]  ;;  %v6919_v13 = vmax.f32 %v4066_v51, -2.0  ;;  %v6921_v0 = vmax.f32 %v4072_v58, -2.0 }
  0x2d   : > { %7122 = vst [vmem:[#allocation24_spill] sm:$0xff] %v4030_v47  ;;  %v4059_v33 = vcvt.f32.s32 %v6907_v46  ;;  %v6915_v4 = vfloor.f32 %v4051_v32  ;;  %v6920_v46 = vmax.f32 %v4069_v10, -2.0  ;;  %v6922_v61 = vfloor.f32 %v4063_v14 }
  0x2e   : > { %7123 = vst [vmem:[#allocation25_spill] sm:$0xff] %v4066_v51  ;;  %v6917_v36 = vfloor.f32 %v4055_v35  ;;  %v4093_v59 = vmin.f32 %v6919_v13, 9.0 }
  0x2f   : > { %751 = vperm.xlu2 %3587, %v3917_v52   ;;  %748 = vperm.xlu1 %3586, %v3921_v53   ;;  %7124 = vst [vmem:[#allocation26_spill] sm:$0xff] %v4069_v10  ;;  %v4085_v47 = vcvt.f32.s32 %v6915_v4  ;;  %v4097_v43 = vmin.f32 %v6920_v46, 9.0  ;;  %v4101_v60 = vcvt.f32.s32 %v6922_v61  ;;  %v4105_v4 = vmin.f32 %v6921_v0, 9.0 }
  0x30   : > { %745 = vperm.xlu0 %3585, %v3933_v56   ;;  %7125 = vst [vmem:[#allocation27_spill] sm:$0xff] %v4072_v58  ;;  %v4089_v34 = vcvt.f32.s32 %v6917_v36  ;;  %v4111_v36 = vld [vmem:[%s3799_s14 + $0xc8] sm:$0xff]  ;;  %v6930_v13 = vfloor.f32 %v4093_v59  ;;  %v6934_v0 = vmax.f32 %v4108_v44, -2.0  ;;  %v6938_v10 = vmax.f32 %v4114_v22, -2.0 }
  0x31   : > { %7126 = vst [vmem:[#allocation28_spill] sm:$0xff] %v4085_v47  ;;  %v6932_v46 = vfloor.f32 %v4097_v43  ;;  %v6935_v61 = vmax.f32 %v4111_v36, -2.0  ;;  %v6937_v51 = vfloor.f32 %v4105_v4 }
  0x32   : > { %7127 = vst [vmem:[#allocation29_spill] sm:$0xff] %v4108_v44  ;;  %v4127_v58 = vcvt.f32.s32 %v6930_v13  ;;  %v4135_v23 = vmin.f32 %v6934_v0, 9.0  ;;  %v4147_v13 = vmin.f32 %v6938_v10, 9.0  ;;  %v7134_v44 = vfloor.f32 %v3841_v21 }
  0x33   : > { %7128 = vst [vmem:[#allocation30_spill] sm:$0xff] %v4111_v36  ;;  %v4131_v45 = vcvt.f32.s32 %v6932_v46  ;;  %v4139_v7 = vmin.f32 %v6935_v61, 9.0  ;;  %v4143_v28 = vcvt.f32.s32 %v6937_v51  ;;  %v4153_v46 = vld [vmem:[%s3799_s14 + $0xe0] sm:$0xff]  ;;  %v7135_v61 = vfloor.f32 %v3837_v20  ;;  %v4166_v51 = vld [vmem:[%s3799_s14 + $0xd8] sm:$0xff] }
  0x34   : > { %7129 = vst [vmem:[#allocation31_spill] sm:$0xff] %v4114_v22  ;;  %v4158_v0 = vsub.f32 %v3841_v21, %v7134_v44  ;;  %v6945_v10 = vfloor.f32 %v4135_v23  ;;  %v7140_v44 = vmax.f32 %v4150_v1, -2.0  ;;  %v7144_v16 = vmax.f32 %v4166_v51, -2.0 }
  0x35   : > { %7130 = vst [vmem:[#allocation32_spill] sm:$0xff] %v4127_v58  ;;  %v4163_v36 = vsub.f32 %v3837_v20, %v7135_v61  ;;  %v6947_v22 = vfloor.f32 %v4139_v7  ;;  %v7141_v20 = vmax.f32 %v4153_v46, -2.0 }
  0x36   : > { %7131 = vst [vmem:[#allocation33_spill] sm:$0xff] %v4131_v45  ;;  %v4184_v2 = vcvt.f32.s32 %v6945_v10  ;;  %v4192_v3 = vmin.f32 %v7140_v44, 9.0  ;;  %v4204_v10 = vmin.f32 %v7144_v16, 9.0  ;;  %v4215_v44 = vld [vmem:[%s3799_s14 + $0xf0] sm:$0xff] }
  0x37   : > { %760 = vperm.xlu2 %3587, %v3959_v15   ;;  %757 = vperm.xlu1 %3586, %v3963_v17   ;;  %7132 = vst [vmem:[#allocation34_spill] sm:$0xff] %v4150_v1  ;;  %v4188_v21 = vcvt.f32.s32 %v6947_v22  ;;  %v4196_v61 = vmin.f32 %v7141_v20, 9.0  ;;  %v7146_v22 = vfloor.f32 %v3895_v42 }
  0x38   : > { %754 = vperm.xlu0 %3585, %v3975_v48   ;;  %7133 = vst [vmem:[#allocation35_spill] sm:$0xff] %v4153_v46  ;;  %v6958_v46 = vfloor.f32 %v4204_v10 }
  0x39   : > { %7136 = vst [vmem:[#allocation36_spill] sm:$0xff] %v4166_v51  ;;  %v4212_v1 = vsub.f32 %v3895_v42, %v7146_v22  ;;  %v6957_v20 = vfloor.f32 %v4196_v61  ;;  %v6959_v51 = vmax.f32 %v4215_v44, -2.0 }
  0x3a   : > { %7138 = vst [vmem:[#allocation37_spill] sm:$0xff] %v4184_v2 }
  0x3b   : > { %7139 = vst [vmem:[#allocation38_spill] sm:$0xff] %v4188_v21  ;;  %v4231_v42 = vcvt.f32.s32 %v6957_v20 }
  0x3c   : > { %7147 = vst [vmem:[#allocation41_spill] sm:$0xff] %v4212_v1 }
  0x3d   : > { %7148 = vst [vmem:[#allocation42_spill] sm:$0xff] %v4215_v44  ;;  %v628_v44 = vsub.f32 1.0, %v4158_v0 }
  0x3f   : > { %769 = vperm.xlu2 %3587, %v4001_v11   ;;  %766 = vperm.xlu1 %3586, %v4005_v12  }
  0x40   : > { %763 = vperm.xlu0 %3585, %v4017_v62  }
  0x47   : > { %778 = vperm.xlu2 %3587, %v4043_v50   ;;  %775 = vperm.xlu1 %3586, %v4047_v31  }
  0x48   : > { %772 = vperm.xlu0 %3585, %v4059_v33  }
  0x4f   : > { %787 = vperm.xlu2 %3587, %v4085_v47   ;;  %784 = vperm.xlu1 %3586, %v4089_v34   ;;  %v4207_v47 = vld [vmem:[%s3799_s14 + $0xf8] sm:$0xff] }
  0x50   : > { %781 = vperm.xlu0 %3585, %v4101_v60   ;;  %7145 = vst [vmem:[#allocation40_spill] sm:$0xff] %v4207_v47  ;;  %v6956_v16 = vmax.f32 %v4207_v47, -2.0  ;;  %v630_v47 = vsub.f32 1.0, %v4163_v36 }
  0x57   : > { %796 = vperm.xlu2 %3587, %v4127_v58   ;;  %793 = vperm.xlu1 %3586, %v4131_v45   ;;  %v7142_v58 = vfloor.f32 %v4147_v13  ;;  %v7150_v45 = vfloor.f32 %v3937_v57 }
  0x58   : > { %790 = vperm.xlu0 %3585, %v4143_v28  }
  0x59   : > { %v4200_v8 = vcvt.f32.s32 %v7142_v58  ;;  %v6955_v58 = vfloor.f32 %v4192_v3 }
  0x5b   : > { %7143 = vst [vmem:[#allocation39_spill] sm:$0xff] %v4200_v8  ;;  %v4227_v22 = vcvt.f32.s32 %v6955_v58  ;;  %v4248_v58 = vsub.f32 %v3937_v57, %v7150_v45  ;;  %v629_v57 = vsub.f32 1.0, %v3855_v27 }
  0x5d   : > { %7149 = vst [vmem:[#allocation43_spill] sm:$0xff] %v4227_v22 }
  0x5f   : > { %805 = vperm.xlu2 %3587, %v4184_v2   ;;  %802 = vperm.xlu1 %3586, %v4188_v21   ;;  %v4235_v2 = vmin.f32 %v6956_v16, 9.0  ;;  %v4239_v21 = vcvt.f32.s32 %v6958_v46 }
  0x60   : > { %799 = vperm.xlu0 %3585, %v4200_v8   ;;  %v4243_v8 = vmin.f32 %v6959_v51, 9.0  ;;  %v627_v51 = vsub.f32 1.0, %v3862_v30  ;;  %v632_v30 = vsub.f32 1.0, %v4180_v9 }
  0x61   : > { %v6962_v16 = vfloor.f32 %v4235_v2 }
  0x62   : > { %v6964_v20 = vfloor.f32 %v4243_v8 }
  0x63   : > { %v4257_v46 = vcvt.f32.s32 %v6962_v16 }
  0x64   : > { %v4262_v45 = vcvt.f32.s32 %v6964_v20  ;;  %v633_v20 = vsub.f32 1.0, %v4212_v1  ;;  %v636_v1 = vsub.f32 1.0, %v4248_v58 }
  0x67   : > { %814 = vperm.xlu2 %3587, %v4227_v22   ;;  %811 = vperm.xlu1 %3586, %v4231_v42   ;;  %v631_v22 = vsub.f32 1.0, %v3851_v25 }
  0x68   : > { %808 = vperm.xlu0 %3585, %v4239_v21  }
  0x6f   : > { %820 = vperm.xlu1 %3586, %v4257_v46   ;;  %856 = vperm.xlu2 %3587, %v627_v51   ;;  %v7152_v51 = vfloor.f32 %v3883_v39 }
  0x70   : > { %817 = vperm.xlu0 %3585, %v4262_v45  }
  0x71   : > { %v4277_v27 = vsub.f32 %v3883_v39, %v7152_v51  ;;  %v7158_v51 = vfloor.f32 %v3929_v55 }
  0x77   : > { %866 = vperm.xlu1 %3586, %v629_v57   ;;  %871 = vperm.xlu2 %3587, %v630_v47   ;;  %v7153_v57 = vfloor.f32 %v3887_v40 }
  0x78   : > { %861 = vperm.xlu0 %3585, %v628_v44  }
  0x79   : > { %v4269_v16 = vpop.permute.xlu2 %739  ;;  %v4282_v47 = vsub.f32 %v3887_v40, %v7153_v57  ;;  %v4302_v57 = vsub.f32 %v3929_v55, %v7158_v51 }
  0x7a   : > { %7151 = vst [vmem:[#allocation44_spill] sm:$0xff] %v4269_v16  ;;  %v635_v16 = vsub.f32 1.0, %v4277_v27 }
  0x7f   : > { %881 = vperm.xlu1 %3586, %v632_v30   ;;  %886 = vperm.xlu2 %3587, %v633_v20   ;;  %v634_v30 = vsub.f32 1.0, %v4282_v47  ;;  %v7155_v20 = vfloor.f32 %v3925_v54 }
  0x80   : > { %876 = vperm.xlu0 %3585, %v631_v22   ;;  %v7156_v22 = vfloor.f32 %v3979_v49 }
  0x81   : > { %v4284_v44 = vpop.permute.xlu2 %742  ;;  %v4292_v39 = vsub.f32 %v3925_v54, %v7155_v20  ;;  %v637_v54 = vsub.f32 1.0, %v4302_v57  ;;  %v7160_v20 = vfloor.f32 %v3967_v18 }
  0x82   : > { %7154 = vst [vmem:[#allocation45_spill] sm:$0xff] %v4284_v44  ;;  %v4297_v40 = vsub.f32 %v3979_v49, %v7156_v22  ;;  %v7162_v22 = vfloor.f32 %v3971_v19 }
  0x83   : > { %v4312_v49 = vsub.f32 %v3967_v18, %v7160_v20 }
  0x84   : > { %7157 = vst [vmem:[#allocation46_spill] sm:$0xff] %v4297_v40  ;;  %v4322_v51 = vsub.f32 %v3971_v19, %v7162_v22  ;;  %v7167_v19 = vfloor.f32 %v4063_v14  ;;  %v7168_v22 = vfloor.f32 %v4013_v6 }
  0x85   : > { %v641_v18 = vsub.f32 1.0, %v4312_v49 }
  0x87   : > { %896 = vperm.xlu1 %3586, %v635_v16   ;;  %901 = vperm.xlu2 %3587, %v636_v1   ;;  %v638_v1 = vsub.f32 1.0, %v4292_v39  ;;  %v639_v16 = vsub.f32 1.0, %v4297_v40  ;;  %v640_v40 = vsub.f32 1.0, %v4322_v51 }
  0x88   : > { %891 = vperm.xlu0 %3585, %v634_v30   ;;  %v7161_v30 = vfloor.f32 %v4021_v63 }
  0x89   : > { %v4304_v44 = vpop.permute.xlu2 %751 }
  0x8a   : > { %7159 = vst [vmem:[#allocation47_spill] sm:$0xff] %v4304_v44  ;;  %v4317_v55 = vsub.f32 %v4021_v63, %v7161_v30  ;;  %v7166_v63 = vfloor.f32 %v4009_v5  ;;  %v4341_v30 = vsub.f32 %v4063_v14, %v7167_v19  ;;  %v7172_v14 = vfloor.f32 %v4051_v32 }
  0x8c   : > { %v642_v20 = vsub.f32 1.0, %v4317_v55 }
  0x8f   : > { %911 = vperm.xlu1 %3586, %v638_v1   ;;  %916 = vperm.xlu2 %3587, %v639_v16  }
  0x90   : > { %906 = vperm.xlu0 %3585, %v637_v54   ;;  %v4336_v54 = vsub.f32 %v4009_v5, %v7166_v63  ;;  %v645_v63 = vsub.f32 1.0, %v4341_v30 }
  0x91   : > { %v4324_v44 = vpop.permute.xlu2 %760  ;;  %v4326_v1 = vpop.permute.xlu1 %733 }
  0x92   : > { %7163 = vst [vmem:[#allocation48_spill] sm:$0xff] %v4324_v44  ;;  %v4328_v16 = vpop.permute.xlu0 %727  ;;  %v4346_v44 = vsub.f32 %v4013_v6, %v7168_v22  ;;  %v644_v5 = vsub.f32 1.0, %v4336_v54  ;;  %v7173_v6 = vfloor.f32 %v4105_v4  ;;  %v7174_v22 = vfloor.f32 %v4055_v35 }
  0x93   : > { %7164 = vst [vmem:[#allocation49_spill] sm:$0xff] %v4326_v1 }
  0x94   : > { %7165 = vst [vmem:[#allocation50_spill] sm:$0xff] %v4328_v16  ;;  %v643_v16 = vsub.f32 1.0, %v4346_v44  ;;  %v4365_v19 = vsub.f32 %v4105_v4, %v7173_v6  ;;  %v7178_v4 = vfloor.f32 %v4093_v59 }
  0x97   : > { %926 = vperm.xlu1 %3586, %v641_v18   ;;  %931 = vperm.xlu2 %3587, %v642_v20  }
  0x98   : > { %921 = vperm.xlu0 %3585, %v640_v40   ;;  %v4360_v40 = vsub.f32 %v4051_v32, %v7172_v14  ;;  %v648_v14 = vsub.f32 1.0, %v4365_v19 }
  0x99   : > { %v4348_v1 = vpop.permute.xlu2 %769  ;;  %v4350_v18 = vpop.permute.xlu1 %736 }
  0x9a   : > { %7169 = vst [vmem:[#allocation51_spill] sm:$0xff] %v4348_v1  ;;  %v4352_v20 = vpop.permute.xlu0 %730  ;;  %v4370_v1 = vsub.f32 %v4055_v35, %v7174_v22  ;;  %v647_v32 = vsub.f32 1.0, %v4360_v40  ;;  %v7179_v35 = vfloor.f32 %v4147_v13  ;;  %v7180_v22 = vfloor.f32 %v4097_v43 }
  0x9b   : > { %7170 = vst [vmem:[#allocation52_spill] sm:$0xff] %v4350_v18 }
  0x9c   : > { %7171 = vst [vmem:[#allocation53_spill] sm:$0xff] %v4352_v20  ;;  %v646_v20 = vsub.f32 1.0, %v4370_v1  ;;  %v4389_v6 = vsub.f32 %v4147_v13, %v7179_v35  ;;  %v7184_v13 = vfloor.f32 %v4135_v23 }
  0x9f   : > { %941 = vperm.xlu1 %3586, %v644_v5   ;;  %946 = vperm.xlu2 %3587, %v645_v63  }
  0xa0   : > { %936 = vperm.xlu0 %3585, %v643_v16   ;;  %v4384_v16 = vsub.f32 %v4093_v59, %v7178_v4  ;;  %v651_v4 = vsub.f32 1.0, %v4389_v6 }
  0xa1   : > { %v4372_v18 = vpop.permute.xlu2 %778  ;;  %v4374_v5 = vpop.permute.xlu1 %748 }
  0xa2   : > { %7175 = vst [vmem:[#allocation54_spill] sm:$0xff] %v4372_v18  ;;  %v4376_v63 = vpop.permute.xlu0 %745  ;;  %v4394_v18 = vsub.f32 %v4097_v43, %v7180_v22  ;;  %v650_v59 = vsub.f32 1.0, %v4384_v16  ;;  %v7185_v43 = vfloor.f32 %v4204_v10  ;;  %v7186_v22 = vfloor.f32 %v4139_v7 }
  0xa3   : > { %7176 = vst [vmem:[#allocation55_spill] sm:$0xff] %v4374_v5 }
  0xa4   : > { %7177 = vst [vmem:[#allocation56_spill] sm:$0xff] %v4376_v63  ;;  %v649_v5 = vsub.f32 1.0, %v4394_v18  ;;  %v4413_v35 = vsub.f32 %v4204_v10, %v7185_v43  ;;  %v7190_v10 = vfloor.f32 %v4192_v3 }
  0xa7   : > { %956 = vperm.xlu1 %3586, %v647_v32   ;;  %961 = vperm.xlu2 %3587, %v648_v14  }
  0xa8   : > { %951 = vperm.xlu0 %3585, %v646_v20   ;;  %v4408_v20 = vsub.f32 %v4135_v23, %v7184_v13  ;;  %v654_v13 = vsub.f32 1.0, %v4413_v35 }
  0xa9   : > { %v4396_v63 = vpop.permute.xlu2 %787  ;;  %v4398_v32 = vpop.permute.xlu1 %757 }
  0xaa   : > { %7181 = vst [vmem:[#allocation57_spill] sm:$0xff] %v4396_v63  ;;  %v4400_v14 = vpop.permute.xlu0 %754  ;;  %v4418_v63 = vsub.f32 %v4139_v7, %v7186_v22  ;;  %v653_v23 = vsub.f32 1.0, %v4408_v20  ;;  %v7191_v7 = vfloor.f32 %v4243_v8  ;;  %v7192_v22 = vfloor.f32 %v4196_v61 }
  0xab   : > { %7182 = vst [vmem:[#allocation58_spill] sm:$0xff] %v4398_v32 }
  0xac   : > { %7183 = vst [vmem:[#allocation59_spill] sm:$0xff] %v4400_v14  ;;  %v652_v32 = vsub.f32 1.0, %v4418_v63  ;;  %v4437_v43 = vsub.f32 %v4243_v8, %v7191_v7  ;;  %v7196_v8 = vfloor.f32 %v4235_v2 }
  0xaf   : > { %971 = vperm.xlu1 %3586, %v650_v59   ;;  %976 = vperm.xlu2 %3587, %v651_v4  }
  0xb0   : > { %966 = vperm.xlu0 %3585, %v649_v5   ;;  %v4432_v5 = vsub.f32 %v4192_v3, %v7190_v10  ;;  %v657_v10 = vsub.f32 1.0, %v4437_v43 }
  0xb1   : > { %v4420_v14 = vpop.permute.xlu2 %796  ;;  %v4422_v59 = vpop.permute.xlu1 %766 }
  0xb2   : > { %7187 = vst [vmem:[#allocation60_spill] sm:$0xff] %v4420_v14  ;;  %v4424_v4 = vpop.permute.xlu0 %763  ;;  %v656_v3 = vsub.f32 1.0, %v4432_v5 }
  0xb3   : > { %7188 = vst [vmem:[#allocation61_spill] sm:$0xff] %v4422_v59 }
  0xb4   : > { %7189 = vst [vmem:[#allocation62_spill] sm:$0xff] %v4424_v4  ;;  %v4442_v4 = vsub.f32 %v4196_v61, %v7192_v22  ;;  %v4456_v61 = vsub.f32 %v4235_v2, %v7196_v8  ;;  %v1049_v8 = vadd.s32 1, %v3879_v38 }
  0xb6   : > { %v655_v14 = vsub.f32 1.0, %v4442_v4 }
  0xb7   : > { %986 = vperm.xlu1 %3586, %v653_v23   ;;  %991 = vperm.xlu2 %3587, %v654_v13  }
  0xb8   : > { %981 = vperm.xlu0 %3585, %v652_v32  }
  0xb9   : > { %v4444_v59 = vpop.permute.xlu2 %805  ;;  %v4446_v23 = vpop.permute.xlu1 %775 }
  0xba   : > { %7193 = vst [vmem:[#allocation63_spill] sm:$0xff] %v4444_v59  ;;  %v4448_v13 = vpop.permute.xlu0 %772  ;;  %v1046_v59 = vadd.s32 1, %v3860_v29 }
  0xbb   : > { %7194 = vst [vmem:[#allocation64_spill] sm:$0xff] %v4446_v23  ;;  %v658_v23 = vsub.f32 1.0, %v4456_v61 }
  0xbc   : > { %7195 = vst [vmem:[#allocation65_spill] sm:$0xff] %v4448_v13  ;;  %v1047_v13 = vadd.s32 1, %v3891_v41 }
  0xbf   : > { %1001 = vperm.xlu1 %3586, %v656_v3   ;;  %1006 = vperm.xlu2 %3587, %v657_v10   ;;  %v1050_v10 = vadd.s32 1, %v3849_v24 }
  0xc0   : > { %996 = vperm.xlu0 %3585, %v655_v14  }
  0xc1   : > { %v4458_v32 = vpop.permute.xlu2 %814  ;;  %v4460_v7 = vpop.permute.xlu1 %784 }
  0xc2   : > { %7197 = vst [vmem:[#allocation66_spill] sm:$0xff] %v4458_v32  ;;  %v4462_v22 = vpop.permute.xlu0 %781  ;;  %v1048_v32 = vadd.s32 1, %v3853_v26 }
  0xc3   : > { %7198 = vst [vmem:[#allocation67_spill] sm:$0xff] %v4460_v7 }
  0xc4   : > { %7199 = vst [vmem:[#allocation68_spill] sm:$0xff] %v4462_v22 }
  0xc7   : > { %1079 = vperm.xlu1 %3586, %v1046_v59   ;;  %1082 = vperm.xlu2 %3587, %v1047_v13   ;;  %v1053_v13 = vadd.s32 1, %v3921_v53 }
  0xc8   : > { %1011 = vperm.xlu0 %3585, %v658_v23   ;;  %v1052_v23 = vadd.s32 1, %v3933_v56 }
  0xc9   : > { %v4467_v14 = vpop.permute.xlu1 %793  ;;  %v4469_v3 = vpop.permute.xlu2 %856 }
  0xca   : > { %7200 = vst [vmem:[#allocation69_spill] sm:$0xff] %v4467_v14  ;;  %v4471_v2 = vpop.permute.xlu0 %790 }
  0xcb   : > { %7201 = vst [vmem:[#allocation70_spill] sm:$0xff] %v4469_v3 }
  0xcc   : > { %7202 = vst [vmem:[#allocation71_spill] sm:$0xff] %v4471_v2  ;;  %v1051_v2 = vadd.s32 1, %v3875_v37 }
  0xcf   : > { %1088 = vperm.xlu1 %3586, %v1049_v8   ;;  %1091 = vperm.xlu2 %3587, %v1050_v10   ;;  %v1056_v10 = vadd.s32 1, %v3963_v17  ;;  %v1054_v8 = vadd.s32 1, %v3917_v52 }
  0xd0   : > { %1085 = vperm.xlu0 %3585, %v1048_v32   ;;  %v1055_v32 = vadd.s32 1, %v3975_v48 }
  0xd1   : > { %v4476_v29 = vpop.permute.xlu1 %802  ;;  %v4478_v41 = vpop.permute.xlu2 %871 }
  0xd2   : > { %7203 = vst [vmem:[#allocation72_spill] sm:$0xff] %v4476_v29  ;;  %v4480_v59 = vpop.permute.xlu0 %799  ;;  %v7343_v29 = vld [vmem:[#allocation22_spill] sm:$0xff] }
  0xd3   : > { %7204 = vst [vmem:[#allocation73_spill] sm:$0xff] %v4478_v41 }
  0xd4   : > { %7205 = vst [vmem:[#allocation74_spill] sm:$0xff] %v4480_v59 }
  0xd7   : > { %1097 = vperm.xlu1 %3586, %v1052_v23   ;;  %1100 = vperm.xlu2 %3587, %v1053_v13   ;;  %v1059_v23 = vadd.s32 1, %v4005_v12  ;;  %v1057_v13 = vadd.s32 1, %v3959_v15 }
  0xd8   : > { %1094 = vperm.xlu0 %3585, %v1051_v2   ;;  %v1058_v2 = vadd.s32 1, %v4017_v62 }
  0xd9   : > { %v4485_v24 = vpop.permute.xlu1 %811  ;;  %v4487_v26 = vpop.permute.xlu2 %886 }
  0xda   : > { %7206 = vst [vmem:[#allocation75_spill] sm:$0xff] %v4485_v24  ;;  %v4489_v38 = vpop.permute.xlu0 %808  ;;  %v7341_v24 = vld [vmem:[#allocation27_spill] sm:$0xff] }
  0xdb   : > { %7207 = vst [vmem:[#allocation76_spill] sm:$0xff] %v4487_v26  ;;  %v7342_v59 = vmax.f32 %v7341_v24, -2.0 }
  0xdc   : > { %7208 = vst [vmem:[#allocation77_spill] sm:$0xff] %v4489_v38 }
  0xdf   : > { %1106 = vperm.xlu1 %3586, %v1055_v32   ;;  %1109 = vperm.xlu2 %3587, %v1056_v10   ;;  %v1061_v32 = vadd.s32 1, %v4059_v33  ;;  %v1062_v10 = vadd.s32 1, %v4047_v31 }
  0xe0   : > { %1103 = vperm.xlu0 %3585, %v1054_v8   ;;  %v1060_v8 = vadd.s32 1, %v4001_v11 }
  0xe1   : > { %v4494_v53 = vpop.permute.xlu1 %820  ;;  %v4496_v37 = vpop.permute.xlu2 %901 }
  0xe2   : > { %7209 = vst [vmem:[#allocation78_spill] sm:$0xff] %v4494_v53  ;;  %v4498_v56 = vpop.permute.xlu0 %817 }
  0xe3   : > { %7210 = vst [vmem:[#allocation79_spill] sm:$0xff] %v4496_v37 }
  0xe4   : > { %7211 = vst [vmem:[#allocation80_spill] sm:$0xff] %v4498_v56 }
  0xe7   : > { %1115 = vperm.xlu1 %3586, %v1058_v2   ;;  %1118 = vperm.xlu2 %3587, %v1059_v23   ;;  %v1064_v2 = vadd.s32 1, %v4101_v60  ;;  %v1065_v23 = vadd.s32 1, %v4089_v34 }
  0xe8   : > { %1112 = vperm.xlu0 %3585, %v1057_v13   ;;  %v1063_v13 = vadd.s32 1, %v4043_v50 }
  0xe9   : > { %v4503_v48 = vpop.permute.xlu1 %866  ;;  %v4505_v52 = vpop.permute.xlu2 %916 }
  0xea   : > { %7212 = vst [vmem:[#allocation81_spill] sm:$0xff] %v4503_v48  ;;  %v4507_v17 = vpop.permute.xlu0 %861  ;;  %v4899_v48 = vmin.f32 %v7342_v59, 17.0 }
  0xeb   : > { %7213 = vst [vmem:[#allocation82_spill] sm:$0xff] %v4505_v52  ;;  %v7222_v52 = vld [vmem:[#allocation28_spill] sm:$0xff] }
  0xec   : > { %7214 = vst [vmem:[#allocation83_spill] sm:$0xff] %v4507_v17  ;;  %v7028_v24 = vfloor.f32 %v4899_v48 }
  0xee   : > { %v4927_v22 = vcvt.f32.s32 %v7028_v24 }
  0xef   : > { %1124 = vperm.xlu1 %3586, %v1061_v32   ;;  %1127 = vperm.xlu2 %3587, %v1062_v10   ;;  %v1067_v32 = vadd.s32 1, %v4143_v28  ;;  %v7221_v10 = vld [vmem:[#allocation33_spill] sm:$0xff] }
  0xf0   : > { %1121 = vperm.xlu0 %3585, %v1060_v8   ;;  %v1068_v8 = vadd.s32 1, %v7221_v10  ;;  %v1074_v10 = vadd.s32 1, %v4231_v42 }
  0xf1   : > { %v4512_v12 = vpop.permute.xlu1 %881  ;;  %v4514_v62 = vpop.permute.xlu2 %931 }
  0xf2   : > { %7215 = vst [vmem:[#allocation84_spill] sm:$0xff] %v4512_v12  ;;  %v4516_v15 = vpop.permute.xlu0 %876  ;;  %v7319_v12 = vld [vmem:[#allocation19_spill] sm:$0xff] }
  0xf3   : > { %7216 = vst [vmem:[#allocation85_spill] sm:$0xff] %v4514_v62  ;;  %v7320_v56 = vmax.f32 %v7319_v12, -2.0 }
  0xf4   : > { %7217 = vst [vmem:[#allocation86_spill] sm:$0xff] %v4516_v15  ;;  %v1066_v15 = vadd.s32 1, %v7222_v52 }
  0xf5   : > { %v420_v37 = vmin.f32 %v7320_v56, 17.0 }
  0xf7   : > { %1133 = vperm.xlu1 %3586, %v1064_v2   ;;  %1136 = vperm.xlu2 %3587, %v1065_v23   ;;  %v7226_v2 = vld [vmem:[#allocation39_spill] sm:$0xff] }
  0xf8   : > { %1130 = vperm.xlu0 %3585, %v1063_v13   ;;  %v1070_v23 = vadd.s32 1, %v7226_v2  ;;  %v7227_v13 = vld [vmem:[#allocation38_spill] sm:$0xff] }
  0xf9   : > { %v4521_v31 = vpop.permute.xlu1 %896  ;;  %v4523_v11 = vpop.permute.xlu2 %946 }
  0xfa   : > { %7218 = vst [vmem:[#allocation87_spill] sm:$0xff] %v4521_v31  ;;  %v4525_v33 = vpop.permute.xlu0 %891 }
  0xfb   : > { %7219 = vst [vmem:[#allocation88_spill] sm:$0xff] %v4523_v11  ;;  %v1071_v11 = vadd.s32 1, %v7227_v13  ;;  %v7236_v13 = vld [vmem:[#allocation43_spill] sm:$0xff] }
  0xfc   : > { %7220 = vst [vmem:[#allocation89_spill] sm:$0xff] %v4525_v33  ;;  %v7228_v33 = vld [vmem:[#allocation32_spill] sm:$0xff] }
  0xfd   : > { %v1069_v31 = vadd.s32 1, %v7228_v33 }
  0xff   : > { %1142 = vperm.xlu1 %3586, %v1067_v32   ;;  %1145 = vperm.xlu2 %3587, %v1068_v8   ;;  %v1073_v32 = vadd.s32 1, %v4239_v21  ;;  %v7232_v8 = vld [vmem:[#allocation37_spill] sm:$0xff] }
 0x100   : > { %1139 = vperm.xlu0 %3585, %v1066_v15  }
 0x101   : > { %v4530_v34 = vpop.permute.xlu1 %911  ;;  %v4532_v50 = vpop.permute.xlu2 %961 }
 0x102   : > { %7223 = vst [vmem:[#allocation33_spill] sm:$0xff] %v4530_v34  ;;  %v4534_v60 = vpop.permute.xlu0 %906  ;;  %v1072_v34 = vadd.s32 1, %v7232_v8 }
 0x103   : > { %7224 = vst [vmem:[#allocation28_spill] sm:$0xff] %v4532_v50 }
 0x104   : > { %7225 = vst [vmem:[#allocation90_spill] sm:$0xff] %v4534_v60 }
 0x107   : > { %1151 = vperm.xlu1 %3586, %v1070_v23   ;;  %1154 = vperm.xlu2 %3587, %v1071_v11   ;;  %v1076_v11 = vadd.s32 1, %v4262_v45  ;;  %v1077_v23 = vadd.s32 1, %v4257_v46 }
 0x108   : > { %1148 = vperm.xlu0 %3585, %v1069_v31  }
 0x109   : > { %v4539_v28 = vpop.permute.xlu1 %926  ;;  %v4541_v52 = vpop.permute.xlu2 %976 }
 0x10a   : > { %7229 = vst [vmem:[#allocation39_spill] sm:$0xff] %v4539_v28  ;;  %v4543_v15 = vpop.permute.xlu0 %921 }
 0x10b   : > { %7230 = vst [vmem:[#allocation38_spill] sm:$0xff] %v4541_v52 }
 0x10c   : > { %7231 = vst [vmem:[#allocation32_spill] sm:$0xff] %v4543_v15  ;;  %v1075_v15 = vadd.s32 1, %v7236_v13 }
 0x10f   : > { %1160 = vperm.xlu1 %3586, %v1073_v32   ;;  %1163 = vperm.xlu2 %3587, %v1074_v10   ;;  %v7240_v32 = vld [vmem:[#allocation10_spill] sm:$0xff]  ;;  %v7241_v10 = vld [vmem:[#allocation12_spill] sm:$0xff] }
 0x110   : > { %1157 = vperm.xlu0 %3585, %v1072_v34  }
 0x111   : > { %v4548_v2 = vpop.permute.xlu1 %941  ;;  %v4550_v33 = vpop.permute.xlu2 %991 }
 0x112   : > { %7233 = vst [vmem:[#allocation37_spill] sm:$0xff] %v4548_v2  ;;  %v4552_v31 = vpop.permute.xlu0 %936  ;;  %v7309_v2 = vld [vmem:[#allocation16_spill] sm:$0xff] }
 0x113   : > { %7234 = vst [vmem:[#allocation91_spill] sm:$0xff] %v4550_v33  ;;  %v7307_v33 = vld [vmem:[#allocation21_spill] sm:$0xff]  ;;  %v7310_v52 = vmax.f32 %v7309_v2, -2.0 }
 0x114   : > { %7235 = vst [vmem:[#allocation92_spill] sm:$0xff] %v4552_v31  ;;  %v7308_v31 = vmax.f32 %v7307_v33, -2.0 }
 0x115   : > { %v417_v28 = vmin.f32 %v7310_v52, 17.0 }
 0x117   : > { %1169 = vperm.xlu1 %3586, %v1076_v11   ;;  %1172 = vperm.xlu2 %3587, %v1077_v23   ;;  %v7248_v23 = vld [vmem:[#allocation41_spill] sm:$0xff] }
 0x118   : > { %1166 = vperm.xlu0 %3585, %v1075_v15  }
 0x119   : > { %v4557_v21 = vpop.permute.xlu1 %956  ;;  %v4559_v42 = vpop.permute.xlu2 %1006 }
 0x11a   : > { %7237 = vst [vmem:[#allocation43_spill] sm:$0xff] %v4557_v21  ;;  %v4561_v34 = vpop.permute.xlu0 %951 }
 0x11b   : > { %7238 = vst [vmem:[#allocation93_spill] sm:$0xff] %v4559_v42 }
 0x11c   : > { %7239 = vst [vmem:[#allocation94_spill] sm:$0xff] %v4561_v34 }
 0x11f   : > { %1213 = vperm.xlu1 %3586, %v4158_v0   ;;  %1218 = vperm.xlu2 %3587, %v7240_v32  }
 0x120   : > { %1208 = vperm.xlu0 %3585, %v7241_v10  }
 0x121   : > { %v4566_v45 = vpop.permute.xlu1 %971  ;;  %v4568_v46 = vpop.permute.xlu2 %1082 }
 0x122   : > { %7242 = vst [vmem:[#allocation10_spill] sm:$0xff] %v4566_v45  ;;  %v4570_v8 = vpop.permute.xlu0 %966 }
 0x123   : > { %7243 = vst [vmem:[#allocation12_spill] sm:$0xff] %v4568_v46 }
 0x124   : > { %7244 = vst [vmem:[#allocation95_spill] sm:$0xff] %v4570_v8 }
 0x127   : > { %1228 = vperm.xlu1 %3586, %v3851_v25   ;;  %1233 = vperm.xlu2 %3587, %v4180_v9  }
 0x128   : > { %1223 = vperm.xlu0 %3585, %v4163_v36  }
 0x129   : > { %v4575_v15 = vpop.permute.xlu1 %986  ;;  %v4577_v11 = vpop.permute.xlu2 %1091 }
 0x12a   : > { %7245 = vst [vmem:[#allocation96_spill] sm:$0xff] %v4575_v15  ;;  %v4579_v0 = vpop.permute.xlu0 %981 }
 0x12b   : > { %7246 = vst [vmem:[#allocation97_spill] sm:$0xff] %v4577_v11 }
 0x12c   : > { %7247 = vst [vmem:[#allocation98_spill] sm:$0xff] %v4579_v0 }
 0x12f   : > { %1243 = vperm.xlu1 %3586, %v4282_v47   ;;  %1248 = vperm.xlu2 %3587, %v4277_v27   ;;  %v7255_v27 = vld [vmem:[#allocation46_spill] sm:$0xff] }
 0x130   : > { %1238 = vperm.xlu0 %3585, %v7248_v23  }
 0x131   : > { %v4584_v13 = vpop.permute.xlu1 %1001  ;;  %v4586_v32 = vpop.permute.xlu2 %1100 }
 0x132   : > { %7249 = vst [vmem:[#allocation41_spill] sm:$0xff] %v4584_v13  ;;  %v4588_v25 = vpop.permute.xlu0 %996  ;;  %v7282_v13 = vld [vmem:[#allocation5_spill] sm:$0xff] }
 0x133   : > { %7250 = vst [vmem:[#allocation99_spill] sm:$0xff] %v4586_v32 }
 0x134   : > { %7251 = vst [vmem:[#allocation100_spill] sm:$0xff] %v4588_v25 }
 0x137   : > { %1258 = vperm.xlu1 %3586, %v4302_v57   ;;  %1263 = vperm.xlu2 %3587, %v4292_v39  }
 0x138   : > { %1253 = vperm.xlu0 %3585, %v4248_v58  }
 0x139   : > { %v4593_v9 = vpop.permute.xlu1 %1079  ;;  %v4595_v36 = vpop.permute.xlu2 %1109 }
 0x13a   : > { %7252 = vst [vmem:[#allocation101_spill] sm:$0xff] %v4593_v9  ;;  %v4597_v47 = vpop.permute.xlu0 %1011 }
 0x13b   : > { %7253 = vst [vmem:[#allocation102_spill] sm:$0xff] %v4595_v36 }
 0x13c   : > { %7254 = vst [vmem:[#allocation103_spill] sm:$0xff] %v4597_v47 }
 0x13f   : > { %1273 = vperm.xlu1 %3586, %v4322_v51   ;;  %1278 = vperm.xlu2 %3587, %v4312_v49   ;;  %v7262_v49 = vld [vmem:[#allocation4_spill] sm:$0xff] }
 0x140   : > { %1268 = vperm.xlu0 %3585, %v7255_v27   ;;  %v7263_v27 = vmax.f32 %v7262_v49, -2.0  ;;  %v7270_v49 = vld [vmem:[#allocation7_spill] sm:$0xff] }
 0x141   : > { %v4602_v10 = vpop.permute.xlu1 %1088  ;;  %v4604_v23 = vpop.permute.xlu2 %1118 }
 0x142   : > { %7256 = vst [vmem:[#allocation46_spill] sm:$0xff] %v4602_v10  ;;  %v4606_v57 = vpop.permute.xlu0 %1085  ;;  %v403_v36 = vmin.f32 %v7263_v27, 17.0  ;;  %v7271_v27 = vmax.f32 %v7270_v49, -2.0 }
 0x143   : > { %7257 = vst [vmem:[#allocation104_spill] sm:$0xff] %v4604_v23 }
 0x144   : > { %7258 = vst [vmem:[#allocation105_spill] sm:$0xff] %v4606_v57  ;;  %v467_v32 = vfloor.f32 %v403_v36  ;;  %v4636_v47 = vmin.f32 %v7271_v27, 17.0 }
 0x147   : > { %1288 = vperm.xlu1 %3586, %v4346_v44   ;;  %1293 = vperm.xlu2 %3587, %v4336_v54   ;;  %v4622_v44 = vsub.f32 %v403_v36, %v467_v32  ;;  %v468_v36 = vfloor.f32 %v4636_v47 }
 0x148   : > { %1283 = vperm.xlu0 %3585, %v4317_v55  }
 0x149   : > { %v4611_v58 = vpop.permute.xlu1 %1097  ;;  %v4613_v39 = vpop.permute.xlu2 %1127  ;;  %7264 = vst [vmem:[#allocation4_spill] sm:$0xff] %v4622_v44  ;;  %v4652_v49 = vsub.f32 %v4636_v47, %v468_v36  ;;  %v7283_v47 = vmax.f32 %v7282_v13, -2.0  ;;  %v4784_v50 = vcvt.f32.s32 %v468_v36 }
 0x14a   : > { %7259 = vst [vmem:[#allocation106_spill] sm:$0xff] %v4611_v58  ;;  %v4615_v51 = vpop.permute.xlu0 %1094 }
 0x14b   : > { %7260 = vst [vmem:[#allocation107_spill] sm:$0xff] %v4613_v39  ;;  %v7268_v39 = vld [vmem:[#allocation3_spill] sm:$0xff]  ;;  %v4673_v11 = vmin.f32 %v7283_v47, 17.0 }
 0x14c   : > { %7261 = vst [vmem:[#allocation108_spill] sm:$0xff] %v4615_v51  ;;  %v7269_v58 = vmax.f32 %v7268_v39, -2.0 }
 0x14d   : > { %7274 = vst [vmem:[#allocation3_spill] sm:$0xff] %v4652_v49 }
 0x14e   : > { %v4632_v51 = vmin.f32 %v7269_v58, 17.0 }
 0x14f   : > { %1303 = vperm.xlu1 %3586, %v4370_v1   ;;  %1308 = vperm.xlu2 %3587, %v4360_v40   ;;  %v7272_v1 = vld [vmem:[#allocation6_spill] sm:$0xff] }
 0x150   : > { %1298 = vperm.xlu0 %3585, %v4341_v30   ;;  %v7273_v40 = vmax.f32 %v7272_v1, -2.0  ;;  %v469_v30 = vfloor.f32 %v4632_v51 }
 0x151   : > { %v4624_v54 = vpop.permute.xlu1 %1106  ;;  %v4626_v55 = vpop.permute.xlu2 %1136 }
 0x152   : > { %7265 = vst [vmem:[#allocation109_spill] sm:$0xff] %v4624_v54  ;;  %v4628_v23 = vpop.permute.xlu0 %1103  ;;  %v4640_v25 = vmin.f32 %v7273_v40, 17.0  ;;  %v4649_v58 = vsub.f32 %v4632_v51, %v469_v30 }
 0x153   : > { %7266 = vst [vmem:[#allocation110_spill] sm:$0xff] %v4626_v55 }
 0x154   : > { %7267 = vst [vmem:[#allocation111_spill] sm:$0xff] %v4628_v23  ;;  %v470_v39 = vfloor.f32 %v4640_v25 }
 0x156   : > { %v4659_v40 = vsub.f32 %v4640_v25, %v470_v39 }
 0x157   : > { %1318 = vperm.xlu1 %3586, %v4394_v18   ;;  %1323 = vperm.xlu2 %3587, %v4384_v16   ;;  %v7278_v16 = vld [vmem:[#allocation2_spill] sm:$0xff] }
 0x158   : > { %1313 = vperm.xlu0 %3585, %v4365_v19   ;;  %v7279_v55 = vmax.f32 %v7278_v16, -2.0  ;;  %v7280_v19 = vld [vmem:[#allocation11_spill] sm:$0xff] }
 0x159   : > { %v4654_v27 = vpop.permute.xlu1 %1115  ;;  %v4656_v1 = vpop.permute.xlu2 %1145  ;;  %v7281_v23 = vmax.f32 %v7280_v19, -2.0  ;;  %v7287_v19 = vld [vmem:[#allocation9_spill] sm:$0xff] }
 0x15a   : > { %7275 = vst [vmem:[#allocation7_spill] sm:$0xff] %v4654_v27  ;;  %v4661_v18 = vpop.permute.xlu0 %1112  ;;  %v4665_v54 = vmin.f32 %v7279_v55, 17.0  ;;  %v7288_v47 = vmax.f32 %v7287_v19, -2.0 }
 0x15b   : > { %7276 = vst [vmem:[#allocation6_spill] sm:$0xff] %v4656_v1  ;;  %v4669_v51 = vmin.f32 %v7281_v23, 17.0  ;;  %v7003_v23 = vfloor.f32 %v4673_v11 }
 0x15c   : > { %7277 = vst [vmem:[#allocation112_spill] sm:$0xff] %v4661_v18  ;;  %v6997_v27 = vfloor.f32 %v4665_v54 }
 0x15d   : > { %v6999_v1 = vfloor.f32 %v4669_v51 }
 0x15e   : > { %v4682_v25 = vsub.f32 %v4665_v54, %v6997_v27  ;;  %v4704_v27 = vmin.f32 %v7288_v47, 17.0 }
 0x15f   : > { %1333 = vperm.xlu1 %3586, %v4418_v63   ;;  %1338 = vperm.xlu2 %3587, %v4408_v20   ;;  %v4689_v13 = vsub.f32 %v4669_v51, %v6999_v1  ;;  %v4698_v63 = vsub.f32 %v4673_v11, %v7003_v23  ;;  %v7291_v1 = vld [vmem:[#allocation8_spill] sm:$0xff] }
 0x160   : > { %1328 = vperm.xlu0 %3585, %v4389_v6   ;;  %v7289_v6 = vld [vmem:[#allocation15_spill] sm:$0xff]  ;;  %v7292_v15 = vmax.f32 %v7291_v1, -2.0 }
 0x161   : > { %v4691_v55 = vpop.permute.xlu1 %1124  ;;  %v4693_v16 = vpop.permute.xlu2 %1154  ;;  %v7290_v18 = vmax.f32 %v7289_v6, -2.0  ;;  %v7296_v6 = vld [vmem:[#allocation14_spill] sm:$0xff] }
 0x162   : > { %7284 = vst [vmem:[#allocation2_spill] sm:$0xff] %v4691_v55  ;;  %v4700_v20 = vpop.permute.xlu0 %1121  ;;  %v4712_v55 = vmin.f32 %v7292_v15, 17.0 }
 0x163   : > { %7285 = vst [vmem:[#allocation11_spill] sm:$0xff] %v4693_v16  ;;  %v4708_v0 = vmin.f32 %v7290_v18, 17.0  ;;  %v7002_v16 = vfloor.f32 %v4704_v27 }
 0x164   : > { %7286 = vst [vmem:[#allocation5_spill] sm:$0xff] %v4700_v20  ;;  %v7007_v18 = vfloor.f32 %v4712_v55 }
 0x165   : > { %v7004_v8 = vfloor.f32 %v4708_v0  ;;  %v4721_v19 = vsub.f32 %v4704_v27, %v7002_v16  ;;  %v7297_v16 = vmax.f32 %v7296_v6, -2.0 }
 0x167   : > { %1348 = vperm.xlu1 %3586, %v4442_v4   ;;  %1353 = vperm.xlu2 %3587, %v4432_v5   ;;  %v4728_v15 = vsub.f32 %v4708_v0, %v7004_v8  ;;  %v4737_v4 = vsub.f32 %v4712_v55, %v7007_v18  ;;  %v4743_v23 = vmin.f32 %v7297_v16, 17.0  ;;  %v7300_v8 = vld [vmem:[#allocation13_spill] sm:$0xff] }
 0x168   : > { %1343 = vperm.xlu0 %3585, %v4413_v35   ;;  %v7298_v35 = vld [vmem:[#allocation18_spill] sm:$0xff]  ;;  %v7301_v42 = vmax.f32 %v7300_v8, -2.0 }
 0x169   : > { %v4730_v1 = vpop.permute.xlu1 %1133  ;;  %v4732_v47 = vpop.permute.xlu2 %1163  ;;  %v7299_v20 = vmax.f32 %v7298_v35, -2.0  ;;  %v477_v34 = vfloor.f32 %v4743_v23 }
 0x16a   : > { %7293 = vst [vmem:[#allocation9_spill] sm:$0xff] %v4730_v1  ;;  %v4739_v5 = vpop.permute.xlu0 %1130  ;;  %v4751_v1 = vmin.f32 %v7301_v42, 17.0 }
 0x16b   : > { %7294 = vst [vmem:[#allocation15_spill] sm:$0xff] %v4732_v47  ;;  %v4747_v45 = vmin.f32 %v7299_v20, 17.0  ;;  %v4753_v47 = vcvt.f32.s32 %v467_v32  ;;  %v4759_v16 = vsub.f32 %v4743_v23, %v477_v34  ;;  %v7305_v23 = vld [vmem:[#allocation17_spill] sm:$0xff] }
 0x16c   : > { %7295 = vst [vmem:[#allocation8_spill] sm:$0xff] %v4739_v5  ;;  %v3714_v5 = vmov 0   ;;  %v478_v20 = vfloor.f32 %v4751_v1  ;;  %v7306_v35 = vmax.f32 %v7305_v23, -2.0 }
 0x16d   : > { %v479_v18 = vfloor.f32 %v4747_v45 }
 0x16e   : > { %v416_v21 = vmin.f32 %v7306_v35, 17.0 }
 0x16f   : > { %1363 = vperm.xlu1 %3586, %v4456_v61   ;;  %3588 = vset.pattern.permute.xlu2 %v3714_v5  ;;  %v4765_v42 = vsub.f32 %v4747_v45, %v479_v18  ;;  %v4772_v61 = vsub.f32 %v4751_v1, %v478_v20  ;;  %v4782_v45 = vcvt.f32.s32 %v469_v30 }
 0x170   : > { %1358 = vperm.xlu0 %3585, %v4437_v43   ;;  %1432 = vperm.xlu2 %3588, %v4753_v47   ;;  %v418_v43 = vmin.f32 %v7308_v31, 17.0 }
 0x171   : > { %v4767_v8 = vpop.permute.xlu1 %1142  ;;  %v4769_v32 = vpop.permute.xlu2 %1172 }
 0x172   : > { %7302 = vst [vmem:[#allocation14_spill] sm:$0xff] %v4767_v8  ;;  %v4774_v6 = vpop.permute.xlu0 %1139  ;;  %v4786_v8 = vcvt.f32.s32 %v470_v39  ;;  %v482_v1 = vfloor.f32 %v418_v43 }
 0x173   : > { %7303 = vst [vmem:[#allocation18_spill] sm:$0xff] %v4769_v32  ;;  %v480_v32 = vfloor.f32 %v416_v21 }
 0x174   : > { %7304 = vst [vmem:[#allocation13_spill] sm:$0xff] %v4774_v6  ;;  %v481_v6 = vfloor.f32 %v417_v28  ;;  %v4791_v33 = vsub.f32 %v418_v43, %v482_v1  ;;  %v7318_v43 = vfloor.f32 %v4665_v54 }
 0x175   : > { %v4788_v60 = vsub.f32 %v416_v21, %v480_v32  ;;  %v7314_v21 = vld [vmem:[#allocation20_spill] sm:$0xff] }
 0x176   : > { %v4799_v31 = vsub.f32 %v417_v28, %v481_v6  ;;  %v7315_v36 = vmax.f32 %v7314_v21, -2.0  ;;  %v4809_v62 = vcvt.f32.s32 %v7318_v43  ;;  %v7322_v28 = vfloor.f32 %v4673_v11 }
 0x177   : > { %3590 = vset.pattern.permute.xlu1 %v3714_v5  ;;  %v7329_v43 = vfloor.f32 %v4712_v55 }
 0x178   : > { %3589 = vset.pattern.permute.xlu0 %v3714_v5  ;;  %1438 = vperm.xlu1 %3590, %v4782_v45   ;;  %v419_v39 = vmin.f32 %v7315_v36, 17.0  ;;  %v7316_v5 = vld [vmem:[#allocation24_spill] sm:$0xff] }
 0x179   : > { %1435 = vperm.xlu0 %3589, %v4784_v50   ;;  %1441 = vperm.xlu2 %3588, %v4786_v8   ;;  %v4795_v52 = vpop.permute.xlu1 %1151  ;;  %v4797_v2 = vpop.permute.xlu2 %1218  ;;  %v7317_v23 = vmax.f32 %v7316_v5, -2.0  ;;  %v484_v5 = vfloor.f32 %v420_v37 }
 0x17a   : > { %7311 = vst [vmem:[#allocation17_spill] sm:$0xff] %v4795_v52  ;;  %v4801_v30 = vpop.permute.xlu0 %1148  ;;  %v7321_v52 = vfloor.f32 %v4669_v51  ;;  %v483_v21 = vfloor.f32 %v419_v39 }
 0x17b   : > { %7312 = vst [vmem:[#allocation21_spill] sm:$0xff] %v4797_v2  ;;  %v421_v35 = vmin.f32 %v7317_v23, 17.0  ;;  %v4832_v11 = vsub.f32 %v420_v37, %v484_v5  ;;  %v7328_v23 = vfloor.f32 %v4708_v0  ;;  %v4859_v0 = vcvt.f32.s32 %v479_v18 }
 0x17c   : > { %7313 = vst [vmem:[#allocation16_spill] sm:$0xff] %v4801_v30  ;;  %v4815_v53 = vcvt.f32.s32 %v7321_v52  ;;  %v4819_v30 = vcvt.f32.s32 %v7322_v28  ;;  %v4821_v26 = vsub.f32 %v419_v39, %v483_v21  ;;  %v7327_v52 = vfloor.f32 %v4704_v27 }
 0x17d   : > { %v485_v36 = vfloor.f32 %v421_v35  ;;  %v4846_v28 = vcvt.f32.s32 %v7329_v43  ;;  %v4876_v18 = vcvt.f32.s32 %v481_v6  ;;  %v4895_v38 = vcvt.f32.s32 %v484_v5 }
 0x17e   : > { %7323 = vst [vmem:[#allocation20_spill] sm:$0xff] %v4821_v26  ;;  %v4838_v39 = vcvt.f32.s32 %v7327_v52  ;;  %v4857_v52 = vcvt.f32.s32 %v477_v34  ;;  %v4874_v34 = vcvt.f32.s32 %v482_v1 }
 0x17f   : > { %v4824_v54 = vsub.f32 %v421_v35, %v485_v36  ;;  %v4842_v35 = vcvt.f32.s32 %v7328_v23  ;;  %v4861_v23 = vcvt.f32.s32 %v478_v20  ;;  %v4893_v6 = vcvt.f32.s32 %v485_v36 }
 0x180   : > { %1444 = vperm.xlu1 %3590, %v4809_v62  }
 0x181   : > { %1450 = vperm.xlu0 %3589, %v4815_v53   ;;  %1447 = vperm.xlu2 %3588, %v4819_v30   ;;  %v4828_v56 = vpop.permute.xlu1 %1160  ;;  %v4830_v12 = vpop.permute.xlu2 %1233 }
 0x182   : > { %7324 = vst [vmem:[#allocation24_spill] sm:$0xff] %v4828_v56  ;;  %v4834_v51 = vpop.permute.xlu0 %1157 }
 0x183   : > { %7325 = vst [vmem:[#allocation19_spill] sm:$0xff] %v4830_v12 }
 0x184   : > { %7326 = vst [vmem:[#allocation113_spill] sm:$0xff] %v4834_v51 }
 0x188   : > { %1453 = vperm.xlu1 %3590, %v4838_v39  }
 0x189   : > { %1459 = vperm.xlu0 %3589, %v4842_v35   ;;  %1456 = vperm.xlu2 %3588, %v4846_v28   ;;  %v4851_v37 = vpop.permute.xlu1 %1169  ;;  %v4853_v56 = vpop.permute.xlu2 %1248 }
 0x18a   : > { %7330 = vst [vmem:[#allocation114_spill] sm:$0xff] %v4851_v37  ;;  %v4855_v27 = vpop.permute.xlu0 %1166 }
 0x18b   : > { %7331 = vst [vmem:[#allocation115_spill] sm:$0xff] %v4853_v56  ;;  %v4872_v56 = vcvt.f32.s32 %v480_v32  ;;  %v7339_v32 = vld [vmem:[#allocation23_spill] sm:$0xff] }
 0x18c   : > { %7332 = vst [vmem:[#allocation116_spill] sm:$0xff] %v4855_v27  ;;  %v7340_v12 = vmax.f32 %v7339_v32, -2.0 }
 0x18e   : > { %v4891_v1 = vmin.f32 %v7340_v12, 17.0 }
 0x190   : > { %1462 = vperm.xlu1 %3590, %v4857_v52  }
 0x191   : > { %1468 = vperm.xlu0 %3589, %v4859_v0   ;;  %1465 = vperm.xlu2 %3588, %v4861_v23   ;;  %v4866_v55 = vpop.permute.xlu1 %1213  ;;  %v4868_v43 = vpop.permute.xlu2 %1263 }
 0x192   : > { %7333 = vst [vmem:[#allocation117_spill] sm:$0xff] %v4866_v55  ;;  %v4870_v37 = vpop.permute.xlu0 %1208 }
 0x193   : > { %7334 = vst [vmem:[#allocation118_spill] sm:$0xff] %v4868_v43  ;;  %v4887_v43 = vcvt.f32.s32 %v483_v21  ;;  %v7027_v21 = vfloor.f32 %v4891_v1 }
 0x194   : > { %7335 = vst [vmem:[#allocation119_spill] sm:$0xff] %v4870_v37 }
 0x198   : > { %1471 = vperm.xlu1 %3590, %v4872_v56  }
 0x199   : > { %1477 = vperm.xlu0 %3589, %v4874_v34   ;;  %1474 = vperm.xlu2 %3588, %v4876_v18   ;;  %v4881_v20 = vpop.permute.xlu1 %1228  ;;  %v4883_v27 = vpop.permute.xlu2 %1278 }
 0x19a   : > { %7336 = vst [vmem:[#allocation120_spill] sm:$0xff] %v4881_v20  ;;  %v4885_v51 = vpop.permute.xlu0 %1223  ;;  %v7344_v20 = vmax.f32 %v7343_v29, -2.0  ;;  %v4919_v29 = vcvt.f32.s32 %v7027_v21 }
 0x19b   : > { %7337 = vst [vmem:[#allocation121_spill] sm:$0xff] %v4883_v27 }
 0x19c   : > { %7338 = vst [vmem:[#allocation122_spill] sm:$0xff] %v4885_v51  ;;  %v4903_v14 = vmin.f32 %v7344_v20, 17.0  ;;  %v7348_v20 = vld [vmem:[#allocation26_spill] sm:$0xff] }
 0x19d   : > { %v7349_v32 = vmax.f32 %v7348_v20, -2.0  ;;  %7350 = vst [vmem:[#allocation26_spill] sm:$0xff] %v4927_v22 }
 0x19e   : > { %v7029_v59 = vfloor.f32 %v4903_v14 }
 0x19f   : > { %v4923_v27 = vmin.f32 %v7349_v32, 17.0 }
 0x1a0   : > { %1480 = vperm.xlu1 %3590, %v4887_v43  }
 0x1a1   : > { %1486 = vperm.xlu0 %3589, %v4893_v6   ;;  %1483 = vperm.xlu2 %3588, %v4895_v38   ;;  %v4909_v36 = vpop.permute.xlu1 %1243  ;;  %v4911_v5 = vpop.permute.xlu2 %1293  ;;  %v7030_v20 = vfloor.f32 %v4923_v27 }
 0x1a2   : > { %7345 = vst [vmem:[#allocation23_spill] sm:$0xff] %v4909_v36  ;;  %v4915_v12 = vpop.permute.xlu0 %1238  ;;  %v7351_v36 = vld [vmem:[#allocation31_spill] sm:$0xff] }
 0x1a3   : > { %7346 = vst [vmem:[#allocation27_spill] sm:$0xff] %v4911_v5  ;;  %v4931_v5 = vcvt.f32.s32 %v7029_v59  ;;  %v7352_v7 = vmax.f32 %v7351_v36, -2.0 }
 0x1a4   : > { %7347 = vst [vmem:[#allocation22_spill] sm:$0xff] %v4915_v12  ;;  %v7353_v12 = vld [vmem:[#allocation25_spill] sm:$0xff] }
 0x1a5   : > { %v4935_v2 = vmin.f32 %v7352_v7, 17.0  ;;  %v7354_v41 = vmax.f32 %v7353_v12, -2.0  ;;  %v7359_v12 = vld [vmem:[#allocation30_spill] sm:$0xff] }
 0x1a6   : > { %v7360_v57 = vmax.f32 %v7359_v12, -2.0 }
 0x1a7   : > { %v4939_v21 = vmin.f32 %v7354_v41, 17.0  ;;  %v7031_v36 = vfloor.f32 %v4935_v2  ;;  %v4955_v41 = vcvt.f32.s32 %v7030_v20 }
 0x1a8   : > { %1489 = vperm.xlu1 %3590, %v4919_v29   ;;  %v4959_v51 = vmin.f32 %v7360_v57, 17.0 }
 0x1a9   : > { %1495 = vperm.xlu0 %3589, %v4927_v22   ;;  %1492 = vperm.xlu2 %3588, %v4931_v5   ;;  %v4945_v32 = vpop.permute.xlu1 %1258  ;;  %v4947_v24 = vpop.permute.xlu2 %1308  ;;  %v7032_v7 = vfloor.f32 %v4939_v21  ;;  %7358 = vst [vmem:[#allocation124_spill] sm:$0xff] %v4955_v41  ;;  %v4963_v10 = vcvt.f32.s32 %v7031_v36 }
 0x1aa   : > { %7355 = vst [vmem:[#allocation31_spill] sm:$0xff] %v4945_v32  ;;  %v4951_v59 = vpop.permute.xlu0 %1253  ;;  %v7036_v57 = vfloor.f32 %v4959_v51 }
 0x1ab   : > { %7356 = vst [vmem:[#allocation25_spill] sm:$0xff] %v4947_v24  ;;  %v4967_v32 = vcvt.f32.s32 %v7032_v7  ;;  %v7363_v24 = vld [vmem:[#allocation36_spill] sm:$0xff] }
 0x1ac   : > { %7357 = vst [vmem:[#allocation123_spill] sm:$0xff] %v4951_v59  ;;  %v7364_v17 = vmax.f32 %v7363_v24, -2.0  ;;  %v7365_v59 = vld [vmem:[#allocation29_spill] sm:$0xff] }
 0x1ad   : > { %7361 = vst [vmem:[#allocation30_spill] sm:$0xff] %v4963_v10  ;;  %v7366_v37 = vmax.f32 %v7365_v59, -2.0  ;;  %v7371_v59 = vld [vmem:[#allocation35_spill] sm:$0xff] }
 0x1ae   : > { %7362 = vst [vmem:[#allocation125_spill] sm:$0xff] %v4967_v32  ;;  %v4971_v3 = vmin.f32 %v7364_v17, 17.0  ;;  %v7372_v55 = vmax.f32 %v7371_v59, -2.0 }
 0x1af   : > { %v4975_v20 = vmin.f32 %v7366_v37, 17.0  ;;  %v4991_v37 = vcvt.f32.s32 %v7036_v57 }
 0x1b0   : > { %1498 = vperm.xlu1 %3590, %v4955_v41   ;;  %v7037_v24 = vfloor.f32 %v4971_v3  ;;  %v4995_v9 = vmin.f32 %v7372_v55, 17.0 }
 0x1b1   : > { %1504 = vperm.xlu0 %3589, %v4963_v10   ;;  %1501 = vperm.xlu2 %3588, %v4967_v32   ;;  %v4981_v12 = vpop.permute.xlu1 %1273  ;;  %v4983_v36 = vpop.permute.xlu2 %1323  ;;  %v7038_v17 = vfloor.f32 %v4975_v20  ;;  %7370 = vst [vmem:[#allocation127_spill] sm:$0xff] %v4991_v37 }
 0x1b2   : > { %7367 = vst [vmem:[#allocation36_spill] sm:$0xff] %v4981_v12  ;;  %v4987_v7 = vpop.permute.xlu0 %1268  ;;  %v4999_v46 = vcvt.f32.s32 %v7037_v24  ;;  %v7042_v55 = vfloor.f32 %v4995_v9 }
 0x1b3   : > { %7368 = vst [vmem:[#allocation29_spill] sm:$0xff] %v4983_v36  ;;  %v5003_v12 = vcvt.f32.s32 %v7038_v17  ;;  %v7374_v36 = vld [vmem:[#allocation42_spill] sm:$0xff] }
 0x1b4   : > { %7369 = vst [vmem:[#allocation126_spill] sm:$0xff] %v4987_v7  ;;  %v7375_v10 = vmax.f32 %v7374_v36, -2.0  ;;  %v7376_v7 = vld [vmem:[#allocation34_spill] sm:$0xff] }
 0x1b5   : > { %7373 = vst [vmem:[#allocation35_spill] sm:$0xff] %v4999_v46  ;;  %v7377_v32 = vmax.f32 %v7376_v7, -2.0  ;;  %v7382_v7 = vld [vmem:[#allocation40_spill] sm:$0xff] }
 0x1b6   : > { %v5007_v41 = vmin.f32 %v7375_v10, 17.0 }
 0x1b7   : > { %v5011_v57 = vmin.f32 %v7377_v32, 17.0  ;;  %v5027_v32 = vcvt.f32.s32 %v7042_v55 }
 0x1b8   : > { %1507 = vperm.xlu1 %3590, %v4991_v37   ;;  %v7043_v36 = vfloor.f32 %v5007_v41  ;;  %v7383_v37 = vmax.f32 %v7382_v7, -2.0 }
 0x1b9   : > { %1513 = vperm.xlu0 %3589, %v4999_v46   ;;  %1510 = vperm.xlu2 %3588, %v5003_v12   ;;  %v5017_v59 = vpop.permute.xlu1 %1288  ;;  %v5019_v24 = vpop.permute.xlu2 %1338  ;;  %v7044_v10 = vfloor.f32 %v5011_v57  ;;  %7381 = vst [vmem:[#allocation129_spill] sm:$0xff] %v5027_v32 }
 0x1ba   : > { %7378 = vst [vmem:[#allocation42_spill] sm:$0xff] %v5017_v59  ;;  %v5023_v17 = vpop.permute.xlu0 %1283  ;;  %v5031_v22 = vmin.f32 %v7383_v37, 17.0  ;;  %v5035_v46 = vcvt.f32.s32 %v7043_v36 }
 0x1bb   : > { %7379 = vst [vmem:[#allocation34_spill] sm:$0xff] %v5019_v24  ;;  %v5039_v24 = vcvt.f32.s32 %v7044_v10  ;;  %v564_v10 = vsub.f32 1.0, %v4652_v49 }
 0x1bc   : > { %7380 = vst [vmem:[#allocation128_spill] sm:$0xff] %v5023_v17  ;;  %v7047_v59 = vfloor.f32 %v5031_v22  ;;  %v563_v17 = vsub.f32 1.0, %v4622_v44 }
 0x1bd   : > { %7384 = vst [vmem:[#allocation40_spill] sm:$0xff] %v5035_v46 }
 0x1be   : > { %v5053_v36 = vcvt.f32.s32 %v7047_v59  ;;  %v566_v59 = vsub.f32 1.0, %v4659_v40 }
 0x1c0   : > { %1516 = vperm.xlu1 %3590, %v5027_v32  }
 0x1c1   : > { %1522 = vperm.xlu0 %3589, %v5035_v46   ;;  %1519 = vperm.xlu2 %3588, %v5039_v24   ;;  %v5045_v55 = vpop.permute.xlu1 %1303  ;;  %v5047_v37 = vpop.permute.xlu2 %1353 }
 0x1c2   : > { %7385 = vst [vmem:[#allocation130_spill] sm:$0xff] %v5045_v55  ;;  %v5049_v7 = vpop.permute.xlu0 %1298 }
 0x1c3   : > { %7386 = vst [vmem:[#allocation131_spill] sm:$0xff] %v5047_v37  ;;  %v565_v37 = vsub.f32 1.0, %v4649_v58 }
 0x1c4   : > { %7387 = vst [vmem:[#allocation132_spill] sm:$0xff] %v5049_v7  ;;  %v567_v7 = vsub.f32 1.0, %v4682_v25 }
 0x1c8   : > { %1525 = vperm.xlu1 %3590, %v5053_v36  }
 0x1c9   : > { %1566 = vperm.xlu0 %3589, %v564_v10   ;;  %1561 = vperm.xlu2 %3588, %v563_v17   ;;  %v5058_v46 = vpop.permute.xlu1 %1318  ;;  %v568_v10 = vsub.f32 1.0, %v4698_v63 }
 0x1ca   : > { %7388 = vst [vmem:[#allocation133_spill] sm:$0xff] %v5058_v46  ;;  %v5060_v32 = vpop.permute.xlu0 %1313  ;;  %v5062_v55 = vpop.permute.xlu2 %1432  ;;  %v569_v46 = vsub.f32 1.0, %v4689_v13 }
 0x1cb   : > { %7389 = vst [vmem:[#allocation134_spill] sm:$0xff] %v5060_v32  ;;  %v570_v32 = vsub.f32 1.0, %v4721_v19 }
 0x1cc   : > { %7390 = vst [vmem:[#allocation135_spill] sm:$0xff] %v5062_v55 }
 0x1d0   : > { %1571 = vperm.xlu1 %3590, %v565_v37  }
 0x1d1   : > { %1581 = vperm.xlu0 %3589, %v567_v7   ;;  %1576 = vperm.xlu2 %3588, %v566_v59   ;;  %v5067_v49 = vpop.permute.xlu1 %1333  ;;  %v571_v7 = vsub.f32 1.0, %v4737_v4 }
 0x1d2   : > { %7391 = vst [vmem:[#allocation136_spill] sm:$0xff] %v5067_v49  ;;  %v5069_v44 = vpop.permute.xlu0 %1328  ;;  %v572_v49 = vsub.f32 1.0, %v4728_v15 }
 0x1d3   : > { %7392 = vst [vmem:[#allocation137_spill] sm:$0xff] %v5069_v44  ;;  %v5071_v17 = vpop.permute.xlu2 %1441  ;;  %v573_v44 = vsub.f32 1.0, %v4759_v16 }
 0x1d4   : > { %7393 = vst [vmem:[#allocation138_spill] sm:$0xff] %v5071_v17 }
 0x1d8   : > { %1586 = vperm.xlu1 %3590, %v568_v10  }
 0x1d9   : > { %1596 = vperm.xlu0 %3589, %v570_v32   ;;  %1591 = vperm.xlu2 %3588, %v569_v46   ;;  %v5076_v55 = vpop.permute.xlu1 %1348  ;;  %v574_v32 = vsub.f32 1.0, %v4772_v61 }
 0x1da   : > { %7394 = vst [vmem:[#allocation139_spill] sm:$0xff] %v5076_v55  ;;  %v5078_v37 = vpop.permute.xlu0 %1343  ;;  %v576_v55 = vsub.f32 1.0, %v4788_v60 }
 0x1db   : > { %7395 = vst [vmem:[#allocation140_spill] sm:$0xff] %v5078_v37  ;;  %v5080_v59 = vpop.permute.xlu2 %1447  ;;  %v575_v37 = vsub.f32 1.0, %v4765_v42 }
 0x1dc   : > { %7396 = vst [vmem:[#allocation141_spill] sm:$0xff] %v5080_v59 }
 0x1e0   : > { %1601 = vperm.xlu1 %3590, %v571_v7  }
 0x1e1   : > { %1611 = vperm.xlu0 %3589, %v573_v44   ;;  %1606 = vperm.xlu2 %3588, %v572_v49   ;;  %v5085_v17 = vpop.permute.xlu1 %1363  ;;  %v577_v49 = vsub.f32 1.0, %v4799_v31 }
 0x1e2   : > { %7397 = vst [vmem:[#allocation142_spill] sm:$0xff] %v5085_v17  ;;  %v5087_v10 = vpop.permute.xlu0 %1358  ;;  %v578_v17 = vsub.f32 1.0, %v4791_v33 }
 0x1e3   : > { %7398 = vst [vmem:[#allocation143_spill] sm:$0xff] %v5087_v10  ;;  %v5089_v46 = vpop.permute.xlu2 %1456  ;;  %v579_v10 = vsub.f32 1.0, %v4821_v26  ;;  %v581_v26 = vsub.f32 1.0, %v4824_v54 }
 0x1e4   : > { %7399 = vst [vmem:[#allocation144_spill] sm:$0xff] %v5089_v46  ;;  %v7403_v46 = vfloor.f32 %v4891_v1 }
 0x1e8   : > { %1616 = vperm.xlu1 %3590, %v574_v32  }
 0x1e9   : > { %1626 = vperm.xlu0 %3589, %v576_v55   ;;  %1621 = vperm.xlu2 %3588, %v575_v37   ;;  %v5106_v55 = vsub.f32 %v4891_v1, %v7403_v46  ;;  %v7408_v1 = vfloor.f32 %v4923_v27 }
 0x1ea   : > { %v5094_v59 = vpop.permute.xlu1 %1438 }
 0x1eb   : > { %7400 = vst [vmem:[#allocation145_spill] sm:$0xff] %v5094_v59  ;;  %v5096_v7 = vpop.permute.xlu0 %1435  ;;  %v5098_v44 = vpop.permute.xlu2 %1465  ;;  %v5125_v46 = vsub.f32 %v4923_v27, %v7408_v1  ;;  %v7413_v27 = vfloor.f32 %v4939_v21 }
 0x1ec   : > { %7401 = vst [vmem:[#allocation146_spill] sm:$0xff] %v5096_v7  ;;  %v582_v7 = vsub.f32 1.0, %v5106_v55 }
 0x1ed   : > { %7402 = vst [vmem:[#allocation147_spill] sm:$0xff] %v5098_v44  ;;  %v580_v44 = vsub.f32 1.0, %v4832_v11 }
 0x1f0   : > { %1631 = vperm.xlu1 %3590, %v577_v49   ;;  %v7409_v49 = vfloor.f32 %v4899_v48 }
 0x1f1   : > { %1641 = vperm.xlu0 %3589, %v579_v10   ;;  %1636 = vperm.xlu2 %3588, %v578_v17   ;;  %v7407_v17 = vfloor.f32 %v4903_v14 }
 0x1f2   : > { %v5108_v37 = vpop.permute.xlu1 %1444 }
 0x1f3   : > { %7404 = vst [vmem:[#allocation148_spill] sm:$0xff] %v5108_v37  ;;  %v5110_v32 = vpop.permute.xlu0 %1450  ;;  %v5112_v59 = vpop.permute.xlu2 %1474  ;;  %v5120_v10 = vsub.f32 %v4903_v14, %v7407_v17  ;;  %v5144_v17 = vsub.f32 %v4939_v21, %v7413_v27 }
 0x1f4   : > { %7405 = vst [vmem:[#allocation149_spill] sm:$0xff] %v5110_v32  ;;  %v5130_v32 = vsub.f32 %v4899_v48, %v7409_v49  ;;  %v7414_v48 = vfloor.f32 %v4959_v51  ;;  %v7415_v49 = vfloor.f32 %v4935_v2 }
 0x1f5   : > { %7406 = vst [vmem:[#allocation150_spill] sm:$0xff] %v5112_v59  ;;  %v583_v14 = vsub.f32 1.0, %v5120_v10  ;;  %v586_v21 = vsub.f32 1.0, %v5144_v17 }
 0x1f6   : > { %v5149_v1 = vsub.f32 %v4959_v51, %v7414_v48  ;;  %v7419_v51 = vfloor.f32 %v4975_v20 }
 0x1f8   : > { %1646 = vperm.xlu1 %3590, %v580_v44   ;;  %v5168_v27 = vsub.f32 %v4975_v20, %v7419_v51 }
 0x1f9   : > { %1656 = vperm.xlu0 %3589, %v582_v7   ;;  %1651 = vperm.xlu2 %3588, %v581_v26   ;;  %v585_v26 = vsub.f32 1.0, %v5125_v46  ;;  %v584_v7 = vsub.f32 1.0, %v5130_v32 }
 0x1fa   : > { %v5132_v59 = vpop.permute.xlu1 %1453  ;;  %v589_v20 = vsub.f32 1.0, %v5168_v27 }
 0x1fb   : > { %7410 = vst [vmem:[#allocation151_spill] sm:$0xff] %v5132_v59  ;;  %v5134_v44 = vpop.permute.xlu0 %1459  ;;  %v5136_v37 = vpop.permute.xlu2 %1483 }
 0x1fc   : > { %7411 = vst [vmem:[#allocation152_spill] sm:$0xff] %v5134_v44  ;;  %v5154_v44 = vsub.f32 %v4935_v2, %v7415_v49  ;;  %v7420_v2 = vfloor.f32 %v4995_v9  ;;  %v7421_v49 = vfloor.f32 %v4971_v3 }
 0x1fd   : > { %7412 = vst [vmem:[#allocation153_spill] sm:$0xff] %v5136_v37 }
 0x1fe   : > { %v5173_v48 = vsub.f32 %v4995_v9, %v7420_v2  ;;  %v7425_v9 = vfloor.f32 %v5011_v57 }
 0x200   : > { %1661 = vperm.xlu1 %3590, %v583_v14   ;;  %v5192_v51 = vsub.f32 %v5011_v57, %v7425_v9 }
 0x201   : > { %1671 = vperm.xlu0 %3589, %v585_v26   ;;  %1666 = vperm.xlu2 %3588, %v584_v7   ;;  %v588_v26 = vsub.f32 1.0, %v5149_v1  ;;  %v587_v7 = vsub.f32 1.0, %v5154_v44 }
 0x202   : > { %v5156_v59 = vpop.permute.xlu1 %1462  ;;  %v592_v57 = vsub.f32 1.0, %v5192_v51 }
 0x203   : > { %7416 = vst [vmem:[#allocation154_spill] sm:$0xff] %v5156_v59  ;;  %v5158_v14 = vpop.permute.xlu0 %1468  ;;  %v5160_v37 = vpop.permute.xlu2 %1492 }
 0x204   : > { %7417 = vst [vmem:[#allocation155_spill] sm:$0xff] %v5158_v14  ;;  %v5178_v14 = vsub.f32 %v4971_v3, %v7421_v49  ;;  %v7426_v3 = vfloor.f32 %v5031_v22  ;;  %v7427_v49 = vfloor.f32 %v5007_v41 }
 0x205   : > { %7418 = vst [vmem:[#allocation156_spill] sm:$0xff] %v5160_v37 }
 0x206   : > { %v5197_v2 = vsub.f32 %v5031_v22, %v7426_v3  ;;  %v1751_v3 = vadd.s32 1, %v4753_v47 }
 0x208   : > { %1676 = vperm.xlu1 %3590, %v586_v21  }
 0x209   : > { %1686 = vperm.xlu0 %3589, %v588_v26   ;;  %1681 = vperm.xlu2 %3588, %v587_v7   ;;  %v591_v26 = vsub.f32 1.0, %v5173_v48  ;;  %v590_v7 = vsub.f32 1.0, %v5178_v14 }
 0x20a   : > { %v5180_v59 = vpop.permute.xlu1 %1471 }
 0x20b   : > { %7422 = vst [vmem:[#allocation157_spill] sm:$0xff] %v5180_v59  ;;  %v5182_v21 = vpop.permute.xlu0 %1477  ;;  %v5184_v37 = vpop.permute.xlu2 %1501  ;;  %v5202_v59 = vsub.f32 %v5007_v41, %v7427_v49  ;;  %v1753_v49 = vadd.s32 1, %v4782_v45 }
 0x20c   : > { %7423 = vst [vmem:[#allocation158_spill] sm:$0xff] %v5182_v21 }
 0x20d   : > { %7424 = vst [vmem:[#allocation159_spill] sm:$0xff] %v5184_v37 }
 0x210   : > { %1691 = vperm.xlu1 %3590, %v589_v20  }
 0x211   : > { %1701 = vperm.xlu0 %3589, %v591_v26   ;;  %1696 = vperm.xlu2 %3588, %v590_v7   ;;  %v594_v26 = vsub.f32 1.0, %v5197_v2  ;;  %v593_v7 = vsub.f32 1.0, %v5202_v59 }
 0x212   : > { %v5204_v37 = vpop.permute.xlu1 %1480 }
 0x213   : > { %v5206_v20 = vpop.permute.xlu0 %1486  ;;  %v5208_v21 = vpop.permute.xlu2 %1510 }
 0x214   : > { %7428 = vst [vmem:[#allocation160_spill] sm:$0xff] %v5206_v20 }
 0x215   : > { %7429 = vst [vmem:[#allocation161_spill] sm:$0xff] %v5208_v21  ;;  %v1752_v21 = vadd.s32 1, %v4784_v50 }
 0x218   : > { %1706 = vperm.xlu1 %3590, %v592_v57  }
 0x219   : > { %1716 = vperm.xlu0 %3589, %v594_v26   ;;  %1711 = vperm.xlu2 %3588, %v593_v7   ;;  %v1754_v7 = vadd.s32 1, %v4786_v8 }
 0x21a   : > { %v5213_v22 = vpop.permute.xlu1 %1489 }
 0x21b   : > { %v5215_v9 = vpop.permute.xlu0 %1495  ;;  %v5217_v41 = vpop.permute.xlu2 %1519 }
 0x21c   : > { %7430 = vst [vmem:[#allocation162_spill] sm:$0xff] %v5215_v9  ;;  %v1755_v9 = vadd.s32 1, %v4809_v62 }
 0x21d   : > { %7431 = vst [vmem:[#allocation163_spill] sm:$0xff] %v5217_v41  ;;  %v1756_v41 = vadd.s32 1, %v4819_v30 }
 0x220   : > { %1784 = vperm.xlu1 %3590, %v1751_v3   ;;  %v1758_v3 = vadd.s32 1, %v4838_v39 }
 0x221   : > { %1790 = vperm.xlu0 %3589, %v1753_v49   ;;  %1787 = vperm.xlu2 %3588, %v1752_v21   ;;  %v1757_v21 = vadd.s32 1, %v4815_v53  ;;  %v1759_v49 = vadd.s32 1, %v4846_v28 }
 0x222   : > { %v5222_v20 = vpop.permute.xlu1 %1498 }
 0x223   : > { %7432 = vst [vmem:[#allocation164_spill] sm:$0xff] %v5222_v20  ;;  %v5224_v57 = vpop.permute.xlu0 %1504  ;;  %v5226_v26 = vpop.permute.xlu2 %1561 }
 0x224   : > { %7433 = vst [vmem:[#allocation165_spill] sm:$0xff] %v5224_v57 }
 0x228   : > { %1793 = vperm.xlu1 %3590, %v1754_v7   ;;  %v1762_v7 = vadd.s32 1, %v4861_v23 }
 0x229   : > { %1799 = vperm.xlu0 %3589, %v1756_v41   ;;  %1796 = vperm.xlu2 %3588, %v1755_v9   ;;  %v1760_v9 = vadd.s32 1, %v4842_v35  ;;  %v1761_v41 = vadd.s32 1, %v4857_v52 }
 0x22a   : > { %v5231_v47 = vpop.permute.xlu1 %1507 }
 0x22b   : > { %7434 = vst [vmem:[#allocation166_spill] sm:$0xff] %v5231_v47  ;;  %v5233_v50 = vpop.permute.xlu0 %1513  ;;  %v5235_v45 = vpop.permute.xlu2 %1576  ;;  %v7539_v47 = vld [vmem:[#allocation67_spill] sm:$0xff] }
 0x22c   : > { %7435 = vst [vmem:[#allocation167_spill] sm:$0xff] %v5233_v50  ;;  %v7538_v50 = vld [vmem:[#allocation63_spill] sm:$0xff] }
 0x230   : > { %1802 = vperm.xlu1 %3590, %v1757_v21   ;;  %v1763_v21 = vadd.s32 1, %v4859_v0 }
 0x231   : > { %1808 = vperm.xlu0 %3589, %v1759_v49   ;;  %1805 = vperm.xlu2 %3588, %v1758_v3   ;;  %v1764_v3 = vadd.s32 1, %v4872_v56  ;;  %v1765_v49 = vadd.s32 1, %v4876_v18 }
 0x232   : > { %v5240_v62 = vpop.permute.xlu1 %1516 }
 0x233   : > { %7436 = vst [vmem:[#allocation168_spill] sm:$0xff] %v5240_v62  ;;  %v5242_v8 = vpop.permute.xlu0 %1522  ;;  %v5244_v30 = vpop.permute.xlu2 %1591 }
 0x234   : > { %7437 = vst [vmem:[#allocation169_spill] sm:$0xff] %v5242_v8 }
 0x238   : > { %1811 = vperm.xlu1 %3590, %v1760_v9   ;;  %v1766_v9 = vadd.s32 1, %v4874_v34 }
 0x239   : > { %1817 = vperm.xlu0 %3589, %v1762_v7   ;;  %1814 = vperm.xlu2 %3588, %v1761_v41   ;;  %v1767_v41 = vadd.s32 1, %v4887_v43  ;;  %v1768_v7 = vadd.s32 1, %v4895_v38 }
 0x23a   : > { %v5249_v53 = vpop.permute.xlu1 %1525 }
 0x23b   : > { %7438 = vst [vmem:[#allocation170_spill] sm:$0xff] %v5249_v53  ;;  %v5251_v39 = vpop.permute.xlu0 %1566  ;;  %v5253_v28 = vpop.permute.xlu2 %1606  ;;  %v7446_v53 = vld [vmem:[#allocation124_spill] sm:$0xff] }
 0x23c   : > { %7439 = vst [vmem:[#allocation171_spill] sm:$0xff] %v5253_v28  ;;  %v1773_v8 = vadd.s32 1, %v7446_v53  ;;  %v3644_v28 = vld [vmem:[%s3799_s14 + $0x68] sm:$0xff] }
 0x240   : > { %1820 = vperm.xlu1 %3590, %v1763_v21   ;;  %v1769_v21 = vadd.s32 1, %v4893_v6 }
 0x241   : > { %1826 = vperm.xlu0 %3589, %v1765_v49   ;;  %1823 = vperm.xlu2 %3588, %v1764_v3   ;;  %v1771_v3 = vadd.s32 1, %v4931_v5  ;;  %v1770_v49 = vadd.s32 1, %v4919_v29 }
 0x242   : > { %v5258_v35 = vpop.permute.xlu1 %1571 }
 0x243   : > { %v5260_v52 = vpop.permute.xlu0 %1581  ;;  %v5262_v23 = vpop.permute.xlu2 %1621 }
 0x244   : > { %7440 = vst [vmem:[#allocation172_spill] sm:$0xff] %v5262_v23 }
 0x248   : > { %1829 = vperm.xlu1 %3590, %v1766_v9   ;;  %v7444_v9 = vld [vmem:[#allocation26_spill] sm:$0xff] }
 0x249   : > { %1835 = vperm.xlu0 %3589, %v1768_v7   ;;  %1832 = vperm.xlu2 %3588, %v1767_v41   ;;  %v1772_v41 = vadd.s32 1, %v7444_v9  ;;  %v7445_v7 = vld [vmem:[#allocation125_spill] sm:$0xff] }
 0x24a   : > { %v5267_v56 = vpop.permute.xlu1 %1586  ;;  %v1774_v23 = vadd.s32 1, %v7445_v7  ;;  %v1780_v7 = vadd.s32 1, %v5039_v24 }
 0x24b   : > { %v5269_v0 = vpop.permute.xlu0 %1596  ;;  %v5271_v18 = vpop.permute.xlu2 %1636 }
 0x250   : > { %1838 = vperm.xlu1 %3590, %v1769_v21   ;;  %v7450_v21 = vld [vmem:[#allocation30_spill] sm:$0xff] }
 0x251   : > { %1844 = vperm.xlu0 %3589, %v1771_v3   ;;  %1841 = vperm.xlu2 %3588, %v1770_v49   ;;  %v1775_v3 = vadd.s32 1, %v7450_v21  ;;  %v1777_v49 = vadd.s32 1, %v5003_v12  ;;  %v7457_v21 = vld [vmem:[#allocation40_spill] sm:$0xff] }
 0x252   : > { %v5276_v43 = vpop.permute.xlu1 %1601 }
 0x253   : > { %7441 = vst [vmem:[#allocation173_spill] sm:$0xff] %v5276_v43  ;;  %v5278_v38 = vpop.permute.xlu0 %1611  ;;  %v5280_v34 = vpop.permute.xlu2 %1651 }
 0x254   : > { %7442 = vst [vmem:[#allocation174_spill] sm:$0xff] %v5278_v38  ;;  %v7451_v38 = vld [vmem:[#allocation127_spill] sm:$0xff] }
 0x255   : > { %7443 = vst [vmem:[#allocation175_spill] sm:$0xff] %v5280_v34  ;;  %v1776_v62 = vadd.s32 1, %v7451_v38  ;;  %v7549_v34 = vld [vmem:[#allocation77_spill] sm:$0xff] }
 0x258   : > { %1847 = vperm.xlu1 %3590, %v1772_v41  }
 0x259   : > { %1853 = vperm.xlu0 %3589, %v1774_v23   ;;  %1850 = vperm.xlu2 %3588, %v1773_v8   ;;  %v7453_v23 = vld [vmem:[#allocation35_spill] sm:$0xff] }
 0x25a   : > { %v5285_v6 = vpop.permute.xlu1 %1616  ;;  %v1778_v41 = vadd.s32 1, %v7453_v23 }
 0x25b   : > { %7447 = vst [vmem:[#allocation26_spill] sm:$0xff] %v5285_v6  ;;  %v5287_v5 = vpop.permute.xlu0 %1626  ;;  %v5289_v29 = vpop.permute.xlu2 %1666 }
 0x25c   : > { %7448 = vst [vmem:[#allocation125_spill] sm:$0xff] %v5287_v5  ;;  %v7454_v5 = vld [vmem:[#allocation129_spill] sm:$0xff] }
 0x25d   : > { %7449 = vst [vmem:[#allocation124_spill] sm:$0xff] %v5289_v29  ;;  %v1779_v6 = vadd.s32 1, %v7454_v5  ;;  %v7458_v29 = vld [vmem:[#allocation4_spill] sm:$0xff] }
 0x260   : > { %1856 = vperm.xlu1 %3590, %v1775_v3   ;;  %v1781_v3 = vadd.s32 1, %v7457_v21 }
 0x261   : > { %1862 = vperm.xlu0 %3589, %v1777_v49   ;;  %1859 = vperm.xlu2 %3588, %v1776_v62   ;;  %v1782_v49 = vadd.s32 1, %v5053_v36 }
 0x262   : > { %v5294_v9 = vpop.permute.xlu1 %1631 }
 0x263   : > { %v5296_v53 = vpop.permute.xlu0 %1641  ;;  %v5298_v8 = vpop.permute.xlu2 %1681 }
 0x264   : > { %7452 = vst [vmem:[#allocation30_spill] sm:$0xff] %v5298_v8 }
 0x268   : > { %1865 = vperm.xlu1 %3590, %v1778_v41  }
 0x269   : > { %1871 = vperm.xlu0 %3589, %v1780_v7   ;;  %1868 = vperm.xlu2 %3588, %v1779_v6   ;;  %v7462_v6 = vld [vmem:[#allocation3_spill] sm:$0xff] }
 0x26a   : > { %v5303_v12 = vpop.permute.xlu1 %1646 }
 0x26b   : > { %v5305_v38 = vpop.permute.xlu0 %1656  ;;  %v5307_v62 = vpop.permute.xlu2 %1696 }
 0x26c   : > { %7455 = vst [vmem:[#allocation127_spill] sm:$0xff] %v5305_v38 }
 0x26d   : > { %7456 = vst [vmem:[#allocation35_spill] sm:$0xff] %v5307_v62  ;;  %v7502_v62 = vld [vmem:[#allocation135_spill] sm:$0xff] }
 0x270   : > { %1874 = vperm.xlu1 %3590, %v1781_v3  }
 0x271   : > { %1913 = vperm.xlu0 %3589, %v7458_v29   ;;  %1877 = vperm.xlu2 %3588, %v1782_v49  }
 0x272   : > { %v5312_v24 = vpop.permute.xlu1 %1661 }
 0x273   : > { %7459 = vst [vmem:[#allocation129_spill] sm:$0xff] %v5312_v24  ;;  %v5314_v5 = vpop.permute.xlu0 %1671  ;;  %v5316_v23 = vpop.permute.xlu2 %1711 }
 0x274   : > { %7460 = vst [vmem:[#allocation40_spill] sm:$0xff] %v5314_v5  ;;  %v7545_v5 = vld [vmem:[#allocation72_spill] sm:$0xff] }
 0x275   : > { %7461 = vst [vmem:[#allocation4_spill] sm:$0xff] %v5316_v23  ;;  %v5442_v23 = vld [vmem:[%s3799_s14 + $0x30] sm:$0xff] }
 0x276   : > { %7485 = vst [vmem:[#allocation195_spill] sm:$0xff] %v5442_v23 }
 0x278   : > { %1918 = vperm.xlu1 %3590, %v7462_v6  }
 0x279   : > { %1928 = vperm.xlu0 %3589, %v4659_v40   ;;  %1923 = vperm.xlu2 %3588, %v4649_v58  }
 0x27a   : > { %v5321_v41 = vpop.permute.xlu1 %1676 }
 0x27b   : > { %7463 = vst [vmem:[#allocation3_spill] sm:$0xff] %v5321_v41  ;;  %v5323_v7 = vpop.permute.xlu0 %1686  ;;  %v5325_v36 = vpop.permute.xlu2 %1787  ;;  %v7550_v41 = vld [vmem:[#allocation76_spill] sm:$0xff] }
 0x27c   : > { %7464 = vst [vmem:[#allocation176_spill] sm:$0xff] %v5323_v7 }
 0x280   : > { %1933 = vperm.xlu1 %3590, %v4682_v25  }
 0x281   : > { %1943 = vperm.xlu0 %3589, %v4689_v13   ;;  %1938 = vperm.xlu2 %3588, %v4698_v63  }
 0x282   : > { %v5330_v29 = vpop.permute.xlu1 %1691 }
 0x283   : > { %7465 = vst [vmem:[#allocation177_spill] sm:$0xff] %v5330_v29  ;;  %v5332_v21 = vpop.permute.xlu0 %1701  ;;  %v5334_v3 = vpop.permute.xlu2 %1796  ;;  %v3642_v29 = vld [vmem:[%s3799_s14 + $0x78] sm:$0xff] }
 0x284   : > { %7466 = vst [vmem:[#allocation178_spill] sm:$0xff] %v5332_v21  ;;  %v5464_v21 = vld [vmem:[%s3799_s14 + $0x28] sm:$0xff] }
 0x285   : > { %7491 = vst [vmem:[#allocation201_spill] sm:$0xff] %v5464_v21 }
 0x288   : > { %1948 = vperm.xlu1 %3590, %v4721_v19  }
 0x289   : > { %1958 = vperm.xlu0 %3589, %v4728_v15   ;;  %1953 = vperm.xlu2 %3588, %v4737_v4  }
 0x28a   : > { %v5339_v58 = vpop.permute.xlu1 %1706 }
 0x28b   : > { %7467 = vst [vmem:[#allocation179_spill] sm:$0xff] %v5339_v58  ;;  %v5341_v40 = vpop.permute.xlu0 %1716  ;;  %v5343_v25 = vpop.permute.xlu2 %1805 }
 0x28c   : > { %7468 = vst [vmem:[#allocation180_spill] sm:$0xff] %v5341_v40  ;;  %v5438_v40 = vld [vmem:[%s3799_s14 + $0x10] sm:$0xff] }
 0x28d   : > { %7484 = vst [vmem:[#allocation194_spill] sm:$0xff] %v5438_v40 }
 0x290   : > { %1963 = vperm.xlu1 %3590, %v4759_v16  }
 0x291   : > { %1973 = vperm.xlu0 %3589, %v4765_v42   ;;  %1968 = vperm.xlu2 %3588, %v4772_v61   ;;  %v7471_v42 = vld [vmem:[#allocation20_spill] sm:$0xff] }
 0x292   : > { %v5348_v13 = vpop.permute.xlu1 %1784 }
 0x293   : > { %v5350_v63 = vpop.permute.xlu0 %1790  ;;  %v5352_v19 = vpop.permute.xlu2 %1814 }
 0x294   : > { %7469 = vst [vmem:[#allocation181_spill] sm:$0xff] %v5352_v19  ;;  %v5460_v19 = vld [vmem:[%s3799_s14 + $0x48] sm:$0xff] }
 0x295   : > { %7490 = vst [vmem:[#allocation200_spill] sm:$0xff] %v5460_v19 }
 0x298   : > { %1978 = vperm.xlu1 %3590, %v4788_v60  }
 0x299   : > { %1988 = vperm.xlu0 %3589, %v4791_v33   ;;  %1983 = vperm.xlu2 %3588, %v4799_v31  }
 0x29a   : > { %v5357_v15 = vpop.permute.xlu1 %1793 }
 0x29b   : > { %v5359_v4 = vpop.permute.xlu0 %1799  ;;  %v5361_v16 = vpop.permute.xlu2 %1823 }
 0x29c   : > { %7470 = vst [vmem:[#allocation182_spill] sm:$0xff] %v5361_v16  ;;  %v3387_v16 = vld [vmem:[%s5385_s18] sm:$0xff] }
 0x2a0   : > { %1993 = vperm.xlu1 %3590, %v7471_v42  }
 0x2a1   : > { %2003 = vperm.xlu0 %3589, %v4824_v54   ;;  %1998 = vperm.xlu2 %3588, %v4832_v11   ;;  %v3394_v11 = vld [vmem:[%s5385_s18 + $0x38] sm:$0xff] }
 0x2a2   : > { %v5366_v61 = vpop.permute.xlu1 %1802  ;;  %3085 = vmatpush.bf16.msra.mxu1 %v3394_v11  ;;  %3403 = vmatpush.bf16.msra.mxu2 %v3394_v11  ;;  %v3391_v11 = vld [vmem:[%s5385_s18 + $0x20] sm:$0xff] }
 0x2a3   : > { %v5368_v60 = vpop.permute.xlu0 %1808  ;;  %v5370_v33 = vpop.permute.xlu2 %1832 }
 0x2a4   : > { %7472 = vst [vmem:[#allocation20_spill] sm:$0xff] %v5368_v60 }
 0x2a8   : > { %2008 = vperm.xlu1 %3590, %v5106_v55  }
 0x2a9   : > { %2018 = vperm.xlu0 %3589, %v5130_v32   ;;  %2013 = vperm.xlu2 %3588, %v5120_v10   ;;  %v3393_v10 = vld [vmem:[%s5385_s18 + $0x30] sm:$0xff] }
 0x2aa   : > { %v5375_v31 = vpop.permute.xlu1 %1811  ;;  %3086 = vmatpush.bf16.msra.mxu1 %v3393_v10  ;;  %3404 = vmatpush.bf16.msra.mxu2 %v3393_v10 }
 0x2ab   : > { %7473 = vst [vmem:[#allocation183_spill] sm:$0xff] %v5375_v31  ;;  %v5377_v49 = vpop.permute.xlu0 %1817  ;;  %v5379_v6 = vpop.permute.xlu2 %1841  ;;  %v5608_v31 = vld [vmem:[%s3799_s14 + $0xa8] sm:$0xff] }
 0x2ac   : > { %7474 = vst [vmem:[#allocation184_spill] sm:$0xff] %v5377_v49  ;;  %v5446_v49 = vld [vmem:[%s3799_s14 + $0x18] sm:$0xff] }
 0x2ad   : > { %7486 = vst [vmem:[#allocation196_spill] sm:$0xff] %v5446_v49 }
 0x2b0   : > { %2023 = vperm.xlu1 %3590, %v5125_v46  }
 0x2b1   : > { %2033 = vperm.xlu0 %3589, %v5154_v44   ;;  %2028 = vperm.xlu2 %3588, %v5144_v17   ;;  %v3392_v44 = vld [vmem:[%s5385_s18 + $0x28] sm:$0xff] }
 0x2b2   : > { %v5390_v54 = vpop.permute.xlu1 %1820  ;;  %3087 = vmatpush.bf16.msra.mxu1 %v3392_v44  ;;  %3405 = vmatpush.bf16.msra.mxu2 %v3392_v44  ;;  %v3389_v44 = vld [vmem:[%s5385_s18 + $0x10] sm:$0xff] }
 0x2b3   : > { %7475 = vst [vmem:[#allocation185_spill] sm:$0xff] %v5390_v54  ;;  %v5393_v55 = vpop.permute.xlu0 %1826  ;;  %v5395_v32 = vpop.permute.xlu2 %1850 }
 0x2b4   : > { %7476 = vst [vmem:[#allocation186_spill] sm:$0xff] %v5395_v32  ;;  %v7546_v32 = vld [vmem:[#allocation81_spill] sm:$0xff] }
 0x2b6   : > { %3088 = vmatpush.bf16.msra.mxu1 %v3391_v11  ;;  %3406 = vmatpush.bf16.msra.mxu2 %v3391_v11 }
 0x2b8   : > { %2038 = vperm.xlu1 %3590, %v5149_v1  }
 0x2b9   : > { %2048 = vperm.xlu0 %3589, %v5178_v14   ;;  %2043 = vperm.xlu2 %3588, %v5168_v27   ;;  %v3390_v14 = vld [vmem:[%s5385_s18 + $0x18] sm:$0xff] }
 0x2ba   : > { %v5401_v46 = vpop.permute.xlu1 %1829  ;;  %3089 = vmatpush.bf16.msra.mxu1 %v3390_v14  ;;  %3407 = vmatpush.bf16.msra.mxu2 %v3390_v14  ;;  %v3388_v14 = vld [vmem:[%s5385_s18 + $0x8] sm:$0xff] }
 0x2bb   : > { %v5404_v17 = vpop.permute.xlu0 %1835  ;;  %v5406_v42 = vpop.permute.xlu2 %1859 }
 0x2bc   : > { %7477 = vst [vmem:[#allocation187_spill] sm:$0xff] %v5406_v42  ;;  %v5515_v42 = vld [vmem:[%s3799_s14 + $0x50] sm:$0xff] }
 0x2be   : > { %3090 = vmatpush.bf16.msra.mxu1 %v3389_v44  ;;  %3408 = vmatpush.bf16.msra.mxu2 %v3389_v44 }
 0x2c0   : > { %2053 = vperm.xlu1 %3590, %v5173_v48   ;;  %v5422_v48 = vld [vmem:[%s3799_s14 + $0x8] sm:$0xff] }
 0x2c1   : > { %2063 = vperm.xlu0 %3589, %v5202_v59   ;;  %2058 = vperm.xlu2 %3588, %v5192_v51   ;;  %v3715_v59 = vmov 2   ;;  %7481 = vst [vmem:[#allocation191_spill] sm:$0xff] %v5422_v48  ;;  %v5426_v51 = vld [vmem:[%s3799_s14] sm:$0xff] }
 0x2c2   : > { %v5412_v1 = vpop.permute.xlu1 %1838  ;;  %3091 = vmatpush.bf16.msra.mxu1 %v3388_v14  ;;  %3409 = vmatpush.bf16.msra.mxu2 %v3388_v14 }
 0x2c3   : > { %7478 = vst [vmem:[#allocation188_spill] sm:$0xff] %v5412_v1  ;;  %v5415_v27 = vpop.permute.xlu0 %1844  ;;  %v5417_v10 = vpop.permute.xlu2 %1868  ;;  %v7557_v1 = vld [vmem:[#allocation87_spill] sm:$0xff] }
 0x2c4   : > { %7479 = vst [vmem:[#allocation189_spill] sm:$0xff] %v5415_v27  ;;  %v5474_v27 = vld [vmem:[%s3799_s14 + $0x38] sm:$0xff] }
 0x2c5   : > { %7480 = vst [vmem:[#allocation190_spill] sm:$0xff] %v5417_v10 }
 0x2c6   : > { %3092 = vmatpush.bf16.msra.mxu1 %v3387_v16  ;;  %3410 = vmatpush.bf16.msra.mxu2 %v3387_v16  ;;  %7494 = vst [vmem:[#allocation204_spill] sm:$0xff] %v5474_v27  ;;  %v5478_v16 = vld [vmem:[%s3799_s14 + $0x60] sm:$0xff] }
 0x2c7   : > { %7495 = vst [vmem:[#allocation205_spill] sm:$0xff] %v5478_v16 }
 0x2c8   : > { %2068 = vperm.xlu1 %3590, %v5197_v2  }
 0x2c9   : > { %3592 = vset.pattern.permute.xlu0 %v3715_v59  ;;  %3591 = vset.pattern.permute.xlu2 %v3715_v59 }
 0x2ca   : > { %2207 = vperm.xlu0 %3592, %v5422_v48   ;;  %2202 = vperm.xlu2 %3591, %v5426_v51   ;;  %v5429_v11 = vpop.permute.xlu1 %1847  ;;  %v7544_v48 = vld [vmem:[#allocation71_spill] sm:$0xff] }
 0x2cb   : > { %7482 = vst [vmem:[#allocation192_spill] sm:$0xff] %v5429_v11  ;;  %v5432_v54 = vpop.permute.xlu0 %1853  ;;  %v5434_v2 = vpop.permute.xlu2 %1877 }
 0x2cc   : > { %7483 = vst [vmem:[#allocation193_spill] sm:$0xff] %v5434_v2  ;;  %v5456_v2 = vld [vmem:[%s3799_s14 + $0x20] sm:$0xff] }
 0x2cd   : > { %7489 = vst [vmem:[#allocation199_spill] sm:$0xff] %v5456_v2 }
 0x2d0   : > { %3593 = vset.pattern.permute.xlu1 %v3715_v59 }
 0x2d1   : > { %2212 = vperm.xlu1 %3593, %v5438_v40  }
 0x2d2   : > { %2232 = vperm.xlu0 %3592, %v5442_v23   ;;  %2217 = vperm.xlu2 %3591, %v5446_v49   ;;  %v5449_v44 = vpop.permute.xlu1 %1856  ;;  %v7501_v23 = vld [vmem:[#allocation101_spill] sm:$0xff] }
 0x2d3   : > { %7487 = vst [vmem:[#allocation197_spill] sm:$0xff] %v5449_v44  ;;  %v5451_v14 = vpop.permute.xlu0 %1862  ;;  %v5453_v59 = vpop.permute.xlu2 %1923  ;;  %v7503_v49 = vld [vmem:[#allocation53_spill] sm:$0xff] }
 0x2d4   : > { %7488 = vst [vmem:[#allocation198_spill] sm:$0xff] %v5451_v14  ;;  %v5537_v14 = vld [vmem:[%s3799_s14 + $0x90] sm:$0xff] }
 0x2d5   : > { %7512 = vst [vmem:[#allocation135_spill] sm:$0xff] %v5537_v14 }
 0x2d9   : > { %2222 = vperm.xlu1 %3593, %v5456_v2   ;;  %v5482_v2 = vld [vmem:[%s3799_s14 + $0x40] sm:$0xff] }
 0x2da   : > { %2247 = vperm.xlu0 %3592, %v5460_v19   ;;  %2227 = vperm.xlu2 %3591, %v5464_v21   ;;  %v5467_v10 = vpop.permute.xlu1 %1865  ;;  %7496 = vst [vmem:[#allocation206_spill] sm:$0xff] %v5482_v2 }
 0x2db   : > { %7492 = vst [vmem:[#allocation202_spill] sm:$0xff] %v5467_v10  ;;  %v5469_v24 = vpop.permute.xlu0 %1871  ;;  %v5471_v58 = vpop.permute.xlu2 %1938  ;;  %v7504_v10 = vld [vmem:[#allocation117_spill] sm:$0xff] }
 0x2dc   : > { %7493 = vst [vmem:[#allocation203_spill] sm:$0xff] %v5469_v24  ;;  %v5492_v24 = vld [vmem:[%s6863_s2 + $0x1] ss:$0 sm:$0xff] }
 0x2dd   : > { %vm1879_vm0 = vcmp.eq.s32.totalorder %v5492_v24, %v5348_v13  ;;  %vm1527_vm4 = vcmp.eq.s32.totalorder %v5492_v24, %v7502_v62  ;;  %v7505_v13 = vld [vmem:[#allocation119_spill] sm:$0xff]  ;;  %v5522_v62 = vld [vmem:[%s3799_s14 + $0x58] sm:$0xff]  ;;  %vm1880_vm7 = vcmp.eq.s32.totalorder %v5492_v24, %v5325_v36  ;;  %vm1893_vm8 = vcmp.eq.s32.totalorder %v5492_v24, %v5393_v55  ;;  %v7517_v55 = vld [vmem:[#allocation44_spill] sm:$0xff] }
 0x2de   : > { %vm1882_vm9 = vcmp.eq.s32.totalorder %v5492_v24, %v5357_v15  ;;  %v7520_v15 = vld [vmem:[#allocation56_spill] sm:$0xff]  ;;  %7537 = vst [vmem:[#allocation119_spill] sm:$0xff] %v5608_v31 }
 0x2e1   : > { %2237 = vperm.xlu1 %3593, %v5474_v27   ;;  %v7499_v27 = vld [vmem:[#allocation50_spill] sm:$0xff] }
 0x2e2   : > { %2262 = vperm.xlu0 %3592, %v5478_v16   ;;  %2242 = vperm.xlu2 %3591, %v5482_v2   ;;  %v5485_v19 = vpop.permute.xlu1 %1874  ;;  %v5497_v16 = vld [vmem:[%s6863_s2] ss:$0 sm:$0xff]  ;;  %7506 = vst [vmem:[#allocation50_spill] sm:$0xff] %v5515_v42 }
 0x2e3   : > { %7497 = vst [vmem:[#allocation207_spill] sm:$0xff] %v5485_v19  ;;  %v1914_v21 = vpop.permute.xlu0 %1913  ;;  %v5487_v11 = vpop.permute.xlu2 %1953  ;;  %vm822_vm1 = vcmp.eq.s32.totalorder %v5497_v16, %v7499_v27  ;;  %v7500_v19 = vld [vmem:[#allocation12_spill] sm:$0xff]  ;;  %vm1174_vm3 = vcmp.eq.s32.totalorder %v5497_v16, %v7501_v23  ;;  %vm823_vm5 = vcmp.eq.s32.totalorder %v5497_v16, %v7503_v49  ;;  %vm826_vm13 = vcmp.eq.s32.totalorder %v5497_v16, %v7517_v55  ;;  %v7560_v55 = vld [vmem:[#allocation90_spill] sm:$0xff] }
 0x2e4   : > { %7498 = vst [vmem:[#allocation208_spill] sm:$0xff] %v5487_v11  ;;  %v2071_v2 = vsel %vm1879_vm0, %v1914_v21, 0.0  ;;  %vm1175_vm2 = vcmp.eq.s32.totalorder %v5497_v16, %v7500_v19  ;;  %v1366_v40 = vsel %vm1174_vm3, %v7505_v13, 0.0  ;;  %v1719_v21 = vsel %vm1527_vm4, %v5226_v26, 0.0  ;;  %v7507_v19 = vld [vmem:[#allocation146_spill] sm:$0xff]  ;;  %v7510_v13 = vld [vmem:[#allocation83_spill] sm:$0xff] }
 0x2e5   : > { %v1367_v7 = vsel %vm1175_vm2, %v7504_v10, 0.0  ;;  %vm1528_vm6 = vcmp.eq.s32.totalorder %v5492_v24, %v7507_v19  ;;  %v2103_v23 = vadd.f32 %v2071_v2, %v1719_v21  ;;  %7508 = vst [vmem:[#allocation12_spill] sm:$0xff] %v5522_v62  ;;  %v7509_v26 = vld [vmem:[#allocation70_spill] sm:$0xff]  ;;  %v1015_v2 = vsel %vm823_vm5, %v7510_v13, 0.0  ;;  %v5541_v27 = vld [vmem:[%s3799_s14 + $0x70] sm:$0xff] }
 0x2e6   : > { %v1014_v10 = vsel %vm822_vm1, %v7509_v26, 0.0  ;;  %7513 = vst [vmem:[#allocation53_spill] sm:$0xff] %v5541_v27  ;;  %vm828_vm0 = vcmp.eq.s32.totalorder %v5497_v16, %v7520_v15  ;;  %v7522_v26 = vld [vmem:[#allocation138_spill] sm:$0xff]  ;;  %vm1881_vm3 = vcmp.eq.s32.totalorder %v5492_v24, %v5350_v63  ;;  %v7528_v63 = vld [vmem:[#allocation64_spill] sm:$0xff] }
 0x2e7   : > { %v1398_v11 = vadd.f32 %v1366_v40, %v1014_v10  ;;  %v7515_v40 = vld [vmem:[#allocation49_spill] sm:$0xff]  ;;  %vm1530_vm2 = vcmp.eq.s32.totalorder %v5492_v24, %v7522_v26  ;;  %v7523_v10 = vld [vmem:[#allocation51_spill] sm:$0xff]  ;;  %v7524_v13 = vld [vmem:[#allocation58_spill] sm:$0xff]  ;;  %v5646_v20 = vsel %vm828_vm0, %v7550_v41, 0.0 }
 0x2e8   : > { %vm824_vm11 = vcmp.eq.s32.totalorder %v5497_v16, %v7515_v40  ;;  %vm832_vm5 = vcmp.eq.s32.totalorder %v5497_v16, %v7524_v13  ;;  %v7530_v26 = vld [vmem:[#allocation145_spill] sm:$0xff]  ;;  %v7551_v40 = vld [vmem:[#allocation78_spill] sm:$0xff] }
 0x2e9   : > { %2252 = vperm.xlu1 %3593, %v5515_v42   ;;  %v2135_v43 = vmul.f32 %v2103_v23, %v1398_v11  ;;  %v7518_v23 = vld [vmem:[#allocation47_spill] sm:$0xff]  ;;  %vm1529_vm4 = vcmp.eq.s32.totalorder %v5492_v24, %v7530_v26  ;;  %v7536_v26 = vld [vmem:[#allocation21_spill] sm:$0xff]  ;;  %v7567_v13 = vld [vmem:[#allocation38_spill] sm:$0xff] }
 0x2ea   : > { %2277 = vperm.xlu0 %3592, %v3642_v29   ;;  %2257 = vperm.xlu2 %3591, %v5522_v62   ;;  %v1919_v49 = vpop.permute.xlu1 %1918  ;;  %v1720_v29 = vsel %vm1528_vm6, %v5251_v39, 0.0  ;;  %v1399_v62 = vadd.f32 %v1367_v7, %v1015_v2  ;;  %vm830_vm14 = vcmp.eq.s32.totalorder %v5497_v16, %v7518_v23  ;;  %v7525_v2 = vld [vmem:[#allocation59_spill] sm:$0xff]  ;;  %v7555_v41 = vld [vmem:[#allocation85_spill] sm:$0xff]  ;;  %v5696_v23 = vsel %vm832_vm5, %v7560_v55, 0.0 }
 0x2eb   : > { %v2072_v21 = vsel %vm1880_vm7, %v1919_v49, 0.0  ;;  %v1929_v19 = vpop.permute.xlu0 %1928  ;;  %v5533_v42 = vpop.permute.xlu2 %1968  ;;  %v7521_v49 = vld [vmem:[#allocation46_spill] sm:$0xff]  ;;  %vm831_vm6 = vcmp.eq.s32.totalorder %v5497_v16, %v7525_v2  ;;  %7561 = vst [vmem:[#allocation70_spill] sm:$0xff] %v5696_v23  ;;  %v7611_v23 = vld [vmem:[#allocation109_spill] sm:$0xff] }
 0x2ec   : > { %7511 = vst [vmem:[#allocation101_spill] sm:$0xff] %v5533_v42  ;;  %v2104_v8 = vadd.f32 %v2072_v21, %v1720_v29  ;;  %v2074_v11 = vsel %vm1882_vm9, %v1929_v19, 0.0  ;;  %vm1177_vm1 = vcmp.eq.s32.totalorder %v5497_v16, %v7521_v49  ;;  %v7526_v29 = vld [vmem:[#allocation122_spill] sm:$0xff]  ;;  %v1722_v19 = vsel %vm1530_vm2, %v5235_v45, 0.0  ;;  %v7529_v49 = vld [vmem:[#allocation105_spill] sm:$0xff] }
 0x2ed   : > { %v1369_v21 = vsel %vm1177_vm1, %v7526_v29, 0.0  ;;  %vm1176_vm9 = vcmp.eq.s32.totalorder %v5497_v16, %v7529_v49  ;;  %v5592_v29 = vld [vmem:[%s3799_s14 + $0x80] sm:$0xff]  ;;  %v7532_v45 = vld [vmem:[#allocation57_spill] sm:$0xff]  ;;  %vm843_vm2 = vcmp.eq.s32.totalorder %v5497_v16, %v7544_v48  ;;  %vm847_vm1 = vcmp.eq.s32.totalorder %v5497_v16, %v7545_v5 }
 0x2ee   : > { %v2136_v60 = vmul.f32 %v2104_v8, %v1399_v62  ;;  %v7519_v62 = vld [vmem:[#allocation55_spill] sm:$0xff]  ;;  %7531 = vst [vmem:[#allocation117_spill] sm:$0xff] %v5592_v29  ;;  %v7535_v42 = vld [vmem:[#allocation73_spill] sm:$0xff]  ;;  %v7556_v2 = vld [vmem:[#allocation86_spill] sm:$0xff] }
 0x2ef   : > { %vm829_vm15 = vcmp.eq.s32.totalorder %v5497_v16, %v7519_v62  ;;  %v7564_v62 = vld [vmem:[#allocation39_spill] sm:$0xff]  ;;  %v7568_v48 = vld [vmem:[#allocation37_spill] sm:$0xff] }
 0x2f0   : > { %v2167_v36 = vpack.c.bf16 %v2136_v60, %v2135_v43  ;;  %v7516_v60 = vld [vmem:[#allocation52_spill] sm:$0xff] }
 0x2f1   : > { %2267 = vperm.xlu1 %3593, %v3644_v28   ;;  %v7514_v28 = vld [vmem:[#allocation45_spill] sm:$0xff]  ;;  %vm825_vm12 = vcmp.eq.s32.totalorder %v5497_v16, %v7516_v60  ;;  %v7540_v60 = vld [vmem:[#allocation68_spill] sm:$0xff] }
 0x2f2   : > { %2292 = vperm.xlu0 %3592, %v5537_v14   ;;  %2272 = vperm.xlu2 %3591, %v5541_v27   ;;  %v5544_v39 = vpop.permute.xlu1 %1933  ;;  %vm827_vm10 = vcmp.eq.s32.totalorder %v5497_v16, %v7514_v28  ;;  %v2106_v27 = vadd.f32 %v2074_v11, %v1722_v19  ;;  %v7534_v14 = vld [vmem:[#allocation65_spill] sm:$0xff]  ;;  %v1017_v49 = vsel %vm825_vm12, %v7535_v42, 0.0  ;;  %v1368_v11 = vsel %vm1176_vm9, %v7536_v26, 0.0 }
 0x2f3   : > { %v5548_v7 = vpop.permute.xlu0 %1943  ;;  %3093 = vmatmul.bf16.vlgmr.msra.gmra.mxu1 %v2167_v36  ;;  %v1984_v8 = vpop.permute.xlu2 %1983  ;;  %v2073_v36 = vsel %vm1881_vm3, %v5453_v59, 0.0  ;;  %v7533_v59 = vld [vmem:[#allocation60_spill] sm:$0xff]  ;;  %vm837_vm3 = vcmp.eq.s32.totalorder %v5497_v16, %v7534_v14  ;;  %v1721_v19 = vsel %vm1529_vm4, %v5258_v35, 0.0  ;;  %vm840_vm12 = vcmp.eq.s32.totalorder %v5497_v16, %v7540_v60  ;;  %v5711_v60 = vld [vmem:[%s3799_s14 + $0x98] sm:$0xff] }
 0x2f4   : > { %v5550_v43 = vsel %vm1893_vm8, %v1984_v8, 0.0  ;;  %v7527_v8 = vld [vmem:[#allocation54_spill] sm:$0xff]  ;;  %v1401_v42 = vadd.f32 %v1369_v21, %v1017_v49  ;;  %v2105_v26 = vadd.f32 %v2073_v36, %v1721_v19  ;;  %v1016_v21 = vsel %vm824_vm11, %v7546_v32, 0.0  ;;  %v7548_v49 = vld [vmem:[#allocation75_spill] sm:$0xff]  ;;  %7566 = vst [vmem:[#allocation45_spill] sm:$0xff] %v5711_v60 }
 0x2f5   : > { %vm839_vm7 = vcmp.eq.s32.totalorder %v5497_v16, %v7527_v8  ;;  %v7547_v36 = vld [vmem:[#allocation74_spill] sm:$0xff]  ;;  %v1400_v19 = vadd.f32 %v1368_v11, %v1016_v21  ;;  %vm849_vm9 = vcmp.eq.s32.totalorder %v5497_v16, %v7549_v34  ;;  %vm853_vm11 = vcmp.eq.s32.totalorder %v5497_v16, %v7551_v40  ;;  %v7552_v32 = vld [vmem:[#allocation79_spill] sm:$0xff]  ;;  %v7554_v11 = vld [vmem:[#allocation84_spill] sm:$0xff] }
 0x2f6   : > { %vm846_vm8 = vcmp.eq.s32.totalorder %v5497_v16, %v7547_v36  ;;  %v5654_v38 = vsel %vm831_vm6, %v7552_v32, 0.0  ;;  %v5668_v15 = vsel %vm837_vm3, %v7555_v41, 0.0  ;;  %v1018_v32 = vsel %vm826_vm13, %v7556_v2, 0.0  ;;  %v7559_v41 = vld [vmem:[#allocation88_spill] sm:$0xff]  ;;  %v5739_v36 = vld [vmem:[%s3799_s14 + $0xc0] sm:$0xff] }
 0x2f7   : > { %v2137_v21 = vmul.f32 %v2105_v26, %v1400_v19  ;;  %v5678_v28 = vsel %vm830_vm14, %v7557_v1, 0.0  ;;  %v5690_v26 = vsel %vm840_vm12, %v7559_v41, 0.0  ;;  %v7562_v1 = vld [vmem:[#allocation28_spill] sm:$0xff]  ;;  %v5718_v41 = vsel %vm846_vm8, %v7567_v13, 0.0  ;;  %7572 = vst [vmem:[#allocation49_spill] sm:$0xff] %v5739_v36  ;;  %v7575_v13 = vld [vmem:[#allocation43_spill] sm:$0xff] }
 0x2f8   : > { %v5702_v19 = vsel %vm843_vm2, %v7562_v1, 0.0  ;;  %v5724_v55 = vsel %vm839_vm7, %v7568_v48, 0.0  ;;  %vm7570_vm13 = vcmp.eq.s32.totalorder %v5497_v16, %v7528_v63  ;;  %vm7576_vm14 = vcmp.eq.s32.totalorder %v5497_v16, %v7532_v45  ;;  %v7578_v48 = vld [vmem:[#allocation94_spill] sm:$0xff] }
 0x2f9   : > { %2282 = vperm.xlu1 %3593, %v5592_v29   ;;  %v3649_v29 = vld [vmem:[%s3799_s14 + $0x88] sm:$0xff]  ;;  %7563 = vst [vmem:[#allocation83_spill] sm:$0xff] %v5702_v19  ;;  %v5752_v63 = vsel %vm7576_vm14, %v7575_v13, 0.0  ;;  %vm7583_vm0 = vcmp.eq.s32.totalorder %v5497_v16, %v7533_v59  ;;  %vm7589_vm6 = vcmp.eq.s32.totalorder %v5497_v16, %v7538_v50  ;;  %v7590_v59 = vld [vmem:[#allocation98_spill] sm:$0xff]  ;;  %vm7596_vm2 = vcmp.eq.s32.totalorder %v5497_v16, %v7548_v49 }
 0x2fa   : > { %2307 = vperm.xlu0 %3592, %v5608_v31   ;;  %2287 = vperm.xlu2 %3591, %v3649_v29   ;;  %v5612_v44 = vpop.permute.xlu1 %1948  ;;  %v7542_v31 = vld [vmem:[#allocation66_spill] sm:$0xff]  ;;  %v7543_v29 = vld [vmem:[#allocation69_spill] sm:$0xff]  ;;  %7577 = vst [vmem:[#allocation47_spill] sm:$0xff] %v5752_v63  ;;  %vm1884_vm14 = vcmp.eq.s32.totalorder %v5492_v24, %v5359_v4 }
 0x2fb   : > { %v5620_v35 = vpop.permute.xlu0 %1958  ;;  %v5622_v57 = vpop.permute.xlu2 %1998  ;;  %vm7587_vm5 = vcmp.eq.s32.totalorder %v5497_v16, %v7543_v29  ;;  %vm7593_vm8 = vcmp.eq.s32.totalorder %v5497_v16, %v7542_v31  ;;  %v7601_v31 = vld [vmem:[#allocation111_spill] sm:$0xff]  ;;  %v7604_v40 = vld [vmem:[#allocation106_spill] sm:$0xff]  ;;  %v7613_v4 = vld [vmem:[#allocation141_spill] sm:$0xff] }
 0x2fc   : > { %7541 = vst [vmem:[#allocation146_spill] sm:$0xff] %v5620_v35  ;;  %v2138_v35 = vmul.f32 %v2106_v27, %v1401_v42  ;;  %v7553_v27 = vld [vmem:[#allocation80_spill] sm:$0xff]  ;;  %v5662_v42 = vsel %vm827_vm10, %v7554_v11, 0.0  ;;  %v7558_v11 = vld [vmem:[#allocation89_spill] sm:$0xff]  ;;  %vm7565_vm10 = vcmp.eq.s32.totalorder %v5497_v16, %v7523_v10  ;;  %vm1182_vm12 = vcmp.eq.s32.totalorder %v5497_v16, %v7601_v31  ;;  %v7614_v63 = vld [vmem:[#allocation150_spill] sm:$0xff] }
 0x2fd   : > { %vm852_vm4 = vcmp.eq.s32.totalorder %v5497_v16, %v7553_v27  ;;  %v5684_v14 = vsel %vm829_vm15, %v7558_v11, 0.0  ;;  %v5708_v2 = vsel %vm7565_vm10, %v7564_v62, 0.0  ;;  %v7569_v10 = vld [vmem:[#allocation92_spill] sm:$0xff]  ;;  %v7571_v62 = vld [vmem:[#allocation91_spill] sm:$0xff]  ;;  %vm7579_vm15 = vcmp.eq.s32.totalorder %v5497_v16, %v7539_v47  ;;  %v7630_v31 = vld [vmem:[#allocation22_spill] sm:$0xff] }
 0x2fe   : > { %v2168_v11 = vpack.c.bf16 %v2138_v35, %v2137_v21  ;;  %v5730_v1 = vsel %vm7570_vm13, %v7569_v10, 0.0  ;;  %v5736_v35 = vsel %vm849_vm9, %v7571_v62, 0.0  ;;  %v5743_v21 = vld [vmem:[%s3799_s14 + $0xa0] sm:$0xff]  ;;  %v5758_v34 = vsel %vm7579_vm15, %v7578_v48, 0.0  ;;  %v7580_v10 = vld [vmem:[#allocation93_spill] sm:$0xff]  ;;  %v7586_v47 = vld [vmem:[#allocation95_spill] sm:$0xff] }
 0x2ff   : > { %7573 = vst [vmem:[#allocation52_spill] sm:$0xff] %v5743_v21  ;;  %v5764_v62 = vsel %vm852_vm4, %v7580_v10, 0.0  ;;  %v5780_v48 = vsel %vm7587_vm5, %v7586_v47, 0.0  ;;  %v7588_v27 = vld [vmem:[#allocation96_spill] sm:$0xff]  ;;  %vm1183_vm5 = vcmp.eq.s32.totalorder %v5497_v16, %v7611_v23 }
 0x300   : > { %7581 = vst [vmem:[#allocation55_spill] sm:$0xff] %v5764_v62  ;;  %v5786_v10 = vsel %vm7589_vm6, %v7588_v27, 0.0  ;;  %v7595_v47 = vld [vmem:[#allocation100_spill] sm:$0xff]  ;;  %v7598_v27 = vld [vmem:[#allocation103_spill] sm:$0xff]  ;;  %vm1532_vm6 = vcmp.eq.s32.totalorder %v5492_v24, %v7613_v4  ;;  %v7622_v4 = vld [vmem:[#allocation13_spill] sm:$0xff] }
 0x301   : > { %2297 = vperm.xlu1 %3593, %v5711_v60   ;;  %v7592_v60 = vld [vmem:[#allocation41_spill] sm:$0xff]  ;;  %v5806_v50 = vsel %vm7596_vm2, %v7595_v47, 0.0  ;;  %v5812_v5 = vsel %vm853_vm11, %v7598_v27, 0.0  ;;  %vm1180_vm11 = vcmp.eq.s32.totalorder %v5497_v16, %v7604_v40  ;;  %v7610_v62 = vld [vmem:[#allocation19_spill] sm:$0xff]  ;;  %v1724_v19 = vsel %vm1532_vm6, %v5267_v56, 0.0 }
 0x302   : > { %2322 = vperm.xlu0 %3592, %v5739_v36   ;;  %2302 = vperm.xlu2 %3591, %v5743_v21   ;;  %v5746_v8 = vpop.permute.xlu1 %1963  ;;  %v7582_v21 = vld [vmem:[#allocation10_spill] sm:$0xff]  ;;  %v5800_v29 = vsel %vm7593_vm8, %v7592_v60, 0.0  ;;  %7597 = vst [vmem:[#allocation51_spill] sm:$0xff] %v5806_v50  ;;  %v7605_v47 = vld [vmem:[#allocation5_spill] sm:$0xff] }
 0x303   : > { %7574 = vst [vmem:[#allocation44_spill] sm:$0xff] %v5746_v8  ;;  %v5770_v36 = vsel %vm7583_vm0, %v7582_v21, 0.0  ;;  %v5772_v45 = vpop.permute.xlu0 %1973  ;;  %3098 = vmatmul.bf16.gmra.mxu1 %v2168_v11  ;;  %v5774_v13 = vpop.permute.xlu2 %2013  ;;  %v5792_v21 = vsel %vm847_vm1, %v7590_v59, 0.0  ;;  %v7591_v11 = vld [vmem:[#allocation97_spill] sm:$0xff]  ;;  %vm1883_vm1 = vcmp.eq.s32.totalorder %v5492_v24, %v5334_v3  ;;  %v7600_v59 = vld [vmem:[#allocation108_spill] sm:$0xff]  ;;  %v7602_v60 = vld [vmem:[#allocation2_spill] sm:$0xff]  ;;  %vm1188_vm10 = vcmp.eq.s32.totalorder %v5497_v16, %v7605_v47 }
 0x304   : > { %7584 = vst [vmem:[#allocation56_spill] sm:$0xff] %v5772_v45  ;;  %vm1178_vm7 = vcmp.eq.s32.totalorder %v5497_v16, %v7591_v11  ;;  %vm1179_vm3 = vcmp.eq.s32.totalorder %v5497_v16, %v7600_v59  ;;  %vm1189_vm4 = vcmp.eq.s32.totalorder %v5497_v16, %v7602_v60  ;;  %v2075_v49 = vsel %vm1883_vm1, %v5544_v39, 0.0  ;;  %v7603_v11 = vld [vmem:[#allocation99_spill] sm:$0xff]  ;;  %v7606_v3 = vld [vmem:[#allocation120_spill] sm:$0xff] }
 0x305   : > { %7585 = vst [vmem:[#allocation46_spill] sm:$0xff] %v5774_v13  ;;  %vm1181_vm9 = vcmp.eq.s32.totalorder %v5497_v16, %v7603_v11  ;;  %v1370_v27 = vsel %vm1178_vm7, %v7606_v3, 0.0  ;;  %v7607_v59 = vld [vmem:[#allocation148_spill] sm:$0xff]  ;;  %v7608_v45 = vld [vmem:[#allocation107_spill] sm:$0xff]  ;;  %v2076_v3 = vsel %vm1884_vm14, %v5471_v58, 0.0  ;;  %vm1541_vm7 = vcmp.eq.s32.totalorder %v5492_v24, %v7614_v63  ;;  %v5859_v13 = vld [vmem:[%s3799_s14 + $0xd8] sm:$0xff] }
 0x306   : > { %7594 = vst [vmem:[#allocation138_spill] sm:$0xff] %v5800_v29  ;;  %vm1531_vm13 = vcmp.eq.s32.totalorder %v5492_v24, %v7607_v59  ;;  %vm1190_vm15 = vcmp.eq.s32.totalorder %v5497_v16, %v7608_v45  ;;  %v7609_v39 = vld [vmem:[#allocation8_spill] sm:$0xff]  ;;  %v7612_v59 = vld [vmem:[#allocation121_spill] sm:$0xff]  ;;  %v2108_v60 = vadd.f32 %v2076_v3, %v1724_v19  ;;  %vm1894_vm1 = vcmp.eq.s32.totalorder %v5492_v24, %v5401_v46 }
 0x307   : > { %7599 = vst [vmem:[#allocation58_spill] sm:$0xff] %v5812_v5  ;;  %vm1191_vm0 = vcmp.eq.s32.totalorder %v5497_v16, %v7609_v39  ;;  %v1371_v5 = vsel %vm1179_vm3, %v7610_v62, 0.0  ;;  %v1723_v47 = vsel %vm1531_vm13, %v5260_v52, 0.0  ;;  %v1380_v8 = vsel %vm1188_vm10, %v7612_v59, 0.0  ;;  %v5849_v29 = vld [vmem:[%s3799_s14 + $0xb0] sm:$0xff]  ;;  %v5863_v63 = vld [vmem:[%s3799_s14 + $0xb8] sm:$0xff] }
 0x308   : > { %v2107_v50 = vadd.f32 %v2075_v49, %v1723_v47  ;;  %7615 = vst [vmem:[#allocation59_spill] sm:$0xff] %v5849_v29  ;;  %v1402_v62 = vadd.f32 %v1370_v27, %v1018_v32  ;;  %v7616_v52 = vld [vmem:[#allocation128_spill] sm:$0xff]  ;;  %v1733_v59 = vsel %vm1541_vm7, %v5294_v9, 0.0  ;;  %v7621_v27 = vld [vmem:[#allocation158_spill] sm:$0xff]  ;;  %vm1194_vm3 = vcmp.eq.s32.totalorder %v5497_v16, %v7622_v4  ;;  %v7634_v11 = vld [vmem:[#allocation17_spill] sm:$0xff] }
 0x309   : > { %2312 = vperm.xlu1 %3593, %v5849_v29   ;;  %v1381_v58 = vsel %vm1189_vm4, %v7616_v52, 0.0  ;;  %7617 = vst [vmem:[#allocation122_spill] sm:$0xff] %v5859_v13  ;;  %v7620_v32 = vld [vmem:[#allocation112_spill] sm:$0xff]  ;;  %vm1542_vm2 = vcmp.eq.s32.totalorder %v5492_v24, %v7621_v27  ;;  %v2117_v56 = vadd.f32 %v5550_v43, %v1733_v59  ;;  %v1403_v52 = vadd.f32 %v1371_v5, %v5662_v42  ;;  %v7623_v59 = vld [vmem:[#allocation110_spill] sm:$0xff]  ;;  %v7625_v27 = vld [vmem:[#allocation113_spill] sm:$0xff] }
 0x30a   : > { %2337 = vperm.xlu0 %3592, %v5859_v13   ;;  %7618 = vst [vmem:[#allocation54_spill] sm:$0xff] %v5863_v63  ;;  %2317 = vperm.xlu2 %3591, %v5863_v63   ;;  %v5866_v49 = vpop.permute.xlu1 %1978  ;;  %vm1185_vm8 = vcmp.eq.s32.totalorder %v5497_v16, %v7620_v32  ;;  %v1734_v13 = vsel %vm1542_vm2, %v5271_v18, 0.0  ;;  %v1412_v63 = vadd.f32 %v1380_v8, %v5708_v2  ;;  %v7624_v46 = vld [vmem:[#allocation16_spill] sm:$0xff]  ;;  %v7642_v32 = vld [vmem:[#allocation29_spill] sm:$0xff] }
 0x30b   : > { %7619 = vst [vmem:[#allocation64_spill] sm:$0xff] %v5866_v49  ;;  %v1989_v9 = vpop.permute.xlu0 %1988  ;;  %v5875_v47 = vpop.permute.xlu2 %2028  ;;  %v1413_v19 = vadd.f32 %v1381_v58, %v5668_v15  ;;  %v2139_v43 = vmul.f32 %v2107_v50, %v1402_v62  ;;  %vm1193_vm4 = vcmp.eq.s32.totalorder %v5497_v16, %v7623_v59  ;;  %vm1197_vm10 = vcmp.eq.s32.totalorder %v5497_v16, %v7624_v46  ;;  %v7626_v49 = vld [vmem:[#allocation115_spill] sm:$0xff]  ;;  %v7632_v58 = vld [vmem:[#allocation153_spill] sm:$0xff]  ;;  %v5942_v45 = vld [vmem:[%s3799_s14 + $0xf0] sm:$0xff] }
 0x30c   : > { %v2086_v29 = vsel %vm1894_vm1, %v1989_v9, 0.0  ;;  %vm1200_vm13 = vcmp.eq.s32.totalorder %v5497_v16, %v7625_v27  ;;  %v1374_v18 = vsel %vm1182_vm12, %v7626_v49, 0.0  ;;  %vm1896_vm14 = vcmp.eq.s32.totalorder %v5492_v24, %v5404_v17  ;;  %v7629_v50 = vld [vmem:[#allocation23_spill] sm:$0xff]  ;;  %v7635_v49 = vld [vmem:[#allocation42_spill] sm:$0xff]  ;;  %v7645_v46 = vld [vmem:[#allocation149_spill] sm:$0xff] }
 0x30d   : > { %v2118_v3 = vadd.f32 %v2086_v29, %v1734_v13  ;;  %v2088_v42 = vsel %vm1896_vm14, %v5622_v57, 0.0  ;;  %v2140_v15 = vmul.f32 %v2108_v60, %v1403_v52  ;;  %v5896_v2 = vmul.f32 %v2117_v56, %v1412_v63  ;;  %v7627_v13 = vld [vmem:[#allocation6_spill] sm:$0xff]  ;;  %v7628_v29 = vld [vmem:[#allocation9_spill] sm:$0xff]  ;;  %v7631_v17 = vld [vmem:[#allocation27_spill] sm:$0xff] }
 0x30e   : > { %vm1196_vm6 = vcmp.eq.s32.totalorder %v5497_v16, %v7627_v13  ;;  %vm1192_vm7 = vcmp.eq.s32.totalorder %v5497_v16, %v7628_v29  ;;  %v1373_v5 = vsel %vm1181_vm9, %v7629_v50, 0.0  ;;  %v1372_v57 = vsel %vm1180_vm11, %v7630_v31, 0.0  ;;  %v7633_v63 = vld [vmem:[#allocation11_spill] sm:$0xff]  ;;  %v7636_v52 = vld [vmem:[#allocation24_spill] sm:$0xff]  ;;  %v7648_v59 = vld [vmem:[#allocation133_spill] sm:$0xff] }
 0x30f   : > { %v5898_v8 = vmul.f32 %v2118_v3, %v1413_v19  ;;  %v1383_v62 = vsel %vm1191_vm0, %v7631_v17, 0.0  ;;  %vm1544_vm12 = vcmp.eq.s32.totalorder %v5492_v24, %v7632_v58  ;;  %vm1199_vm2 = vcmp.eq.s32.totalorder %v5497_v16, %v7633_v63  ;;  %v5928_v56 = vld [vmem:[%s3799_s14 + $0xc8] sm:$0xff]  ;;  %v7638_v50 = vld [vmem:[#allocation116_spill] sm:$0xff]  ;;  %v7639_v58 = vld [vmem:[#allocation14_spill] sm:$0xff] }
 0x310   : > { %vm1198_vm9 = vcmp.eq.s32.totalorder %v5497_v16, %v7634_v11  ;;  %v1382_v40 = vsel %vm1190_vm15, %v7635_v49, 0.0  ;;  %v1736_v60 = vsel %vm1544_vm12, %v5303_v12, 0.0  ;;  %v2169_v39 = vpack.c.bf16 %v2140_v15, %v2139_v43  ;;  %v7637_v19 = vld [vmem:[#allocation123_spill] sm:$0xff]  ;;  %v5946_v43 = vld [vmem:[%s3799_s14 + $0xd0] sm:$0xff]  ;;  %v7640_v49 = vld [vmem:[#allocation118_spill] sm:$0xff] }
 0x311   : > { %2327 = vperm.xlu1 %3593, %v5928_v56   ;;  %vm1201_vm11 = vcmp.eq.s32.totalorder %v5497_v16, %v7636_v52  ;;  %v1375_v3 = vsel %vm1183_vm5, %v7637_v19, 0.0  ;;  %vm1543_vm15 = vcmp.eq.s32.totalorder %v5492_v24, %v5204_v37  ;;  %v2120_v12 = vadd.f32 %v2088_v42, %v1736_v60  ;;  %v7647_v27 = vld [vmem:[#allocation132_spill] sm:$0xff] }
 0x312   : > { %2352 = vperm.xlu0 %3592, %v5942_v45   ;;  %2332 = vperm.xlu2 %3591, %v5946_v43   ;;  %v1994_v15 = vpop.permute.xlu1 %1993  ;;  %vm1895_vm0 = vcmp.eq.s32.totalorder %v5492_v24, %v5370_v33  ;;  %vm1203_vm1 = vcmp.eq.s32.totalorder %v5497_v16, %v7638_v50  ;;  %v5954_v23 = vadd.f32 %v1374_v18, %v5678_v28  ;;  %v1735_v37 = vsel %vm1543_vm15, %v5296_v53, 0.0 }
 0x313   : > { %v2087_v42 = vsel %vm1895_vm0, %v1994_v15, 0.0  ;;  %v5957_v31 = vpop.permute.xlu0 %2003  ;;  %3103 = vmatmul.bf16.gmra.mxu1 %v2169_v39  ;;  %v5959_v17 = vpop.permute.xlu2 %2043  ;;  %vm1195_vm5 = vcmp.eq.s32.totalorder %v5497_v16, %v7639_v58  ;;  %v5967_v33 = vsel %vm1185_vm8, %v7640_v49, 0.0  ;;  %v1415_v28 = vadd.f32 %v1383_v62, %v5724_v55  ;;  %v7641_v15 = vld [vmem:[#allocation25_spill] sm:$0xff]  ;;  %v7646_v62 = vld [vmem:[#allocation151_spill] sm:$0xff]  ;;  %v7655_v58 = vld [vmem:[#allocation188_spill] sm:$0xff] }
 0x314   : > { %v1414_v18 = vadd.f32 %v1382_v40, %v5730_v1  ;;  %v2119_v53 = vadd.f32 %v2087_v42, %v1735_v37  ;;  %v1405_v60 = vadd.f32 %v1373_v5, %v5684_v14  ;;  %v1404_v39 = vadd.f32 %v1372_v57, %v5646_v20  ;;  %v7643_v1 = vld [vmem:[#allocation34_spill] sm:$0xff]  ;;  %v7649_v42 = vld [vmem:[#allocation136_spill] sm:$0xff]  ;;  %v7650_v49 = vld [vmem:[#allocation137_spill] sm:$0xff] }
 0x315   : > { %v5974_v19 = vadd.f32 %v1375_v3, %v5654_v38  ;;  %v5980_v9 = vsel %vm1194_vm3, %v7641_v15, 0.0  ;;  %v1389_v55 = vsel %vm1197_vm10, %v7642_v32, 0.0  ;;  %vm1886_vm8 = vcmp.eq.s32.totalorder %v5492_v24, %v5343_v25  ;;  %v7644_v5 = vld [vmem:[#allocation130_spill] sm:$0xff]  ;;  %v7653_v15 = vld [vmem:[#allocation140_spill] sm:$0xff] }
 0x316   : > { %v2151_v14 = vmul.f32 %v2119_v53, %v1414_v18  ;;  %v2152_v20 = vmul.f32 %v2120_v12, %v1415_v28  ;;  %v1392_v38 = vsel %vm1200_vm13, %v7643_v1, 0.0  ;;  %v1385_v4 = vsel %vm1193_vm4, %v7644_v5, 0.0  ;;  %v6014_v37 = vld [vmem:[%s3799_s14 + $0xe0] sm:$0xff]  ;;  %v7651_v18 = vld [vmem:[#allocation15_spill] sm:$0xff] }
 0x317   : > { %v2078_v57 = vsel %vm1886_vm8, %v5612_v44, 0.0  ;;  %vm1533_vm3 = vcmp.eq.s32.totalorder %v5492_v24, %v7645_v46  ;;  %vm1534_vm10 = vcmp.eq.s32.totalorder %v5492_v24, %v7646_v62  ;;  %vm1885_vm14 = vcmp.eq.s32.totalorder %v5492_v24, %v5366_v61  ;;  %v7652_v53 = vld [vmem:[#allocation131_spill] sm:$0xff]  ;;  %v7658_v62 = vld [vmem:[#allocation160_spill] sm:$0xff] }
 0x318   : > { %v2175_v25 = vpack.c.bf16 %v2152_v20, %v2151_v14  ;;  %v1384_v40 = vsel %vm1192_vm7, %v7647_v27, 0.0  ;;  %v1388_v44 = vsel %vm1196_vm6, %v7648_v59, 0.0  ;;  %v1726_v3 = vsel %vm1534_vm10, %v5269_v0, 0.0  ;;  %v7661_v27 = vld [vmem:[#allocation175_spill] sm:$0xff]  ;;  %v7662_v59 = vld [vmem:[#allocation186_spill] sm:$0xff] }
 0x319   : > { %v2077_v12 = vsel %vm1885_vm14, %v5548_v7, 0.0  ;;  %2342 = vperm.xlu1 %3593, %v6014_v37   ;;  %v6018_v61 = vadd.f32 %v1389_v55, %v5770_v36  ;;  %v1391_v29 = vsel %vm1199_vm2, %v7649_v42, 0.0  ;;  %v1390_v13 = vsel %vm1198_vm9, %v7650_v49, 0.0  ;;  %v6030_v7 = vld [vmem:[%s3799_s14 + $0xe8] sm:$0xff]  ;;  %v7664_v42 = vld [vmem:[#allocation40_spill] sm:$0xff] }
 0x31a   : > { %v2110_v0 = vadd.f32 %v2078_v57, %v1726_v3  ;;  %v3716_v28 = vmov 4   ;;  %2347 = vperm.xlu2 %3591, %v6030_v7   ;;  %v2009_v36 = vpop.permute.xlu1 %2008  ;;  %vm1202_vm4 = vcmp.eq.s32.totalorder %v5497_v16, %v7651_v18  ;;  %v6036_v63 = vadd.f32 %v1392_v38, %v5786_v10  ;;  %3133 = vmatmul.bf16.vlgmr.msra.gmra.mxu2 %v2175_v25  ;;  %v7654_v38 = vld [vmem:[#allocation134_spill] sm:$0xff]  ;;  %v6094_v25 = vld [vmem:[%s3799_s14 + $0xf8] sm:$0xff]  ;;  %v7671_v18 = vld [vmem:[#allocation167_spill] sm:$0xff] }
 0x31b   : > { %3596 = vset.pattern.permute.xlu0 %v3716_v28  ;;  %v6042_v11 = vsel %vm1203_vm1, %v7652_v53, 0.0  ;;  %v1393_v32 = vsel %vm1201_vm11, %v7653_v15, 0.0  ;;  %v1725_v55 = vsel %vm1533_vm3, %v5244_v30, 0.0  ;;  %v6053_v10 = vpop.permute.xlu0 %2018  ;;  %v6055_v14 = vpop.permute.xlu2 %2058  ;;  %v1417_v50 = vadd.f32 %v1385_v4, %v5758_v34  ;;  %v7666_v15 = vld [vmem:[#allocation152_spill] sm:$0xff] }
 0x31c   : > { %2587 = vperm.xlu0 %3596, %v5426_v51   ;;  %v1416_v20 = vadd.f32 %v1384_v40, %v5690_v26  ;;  %v1420_v1 = vadd.f32 %v1388_v44, %v5780_v48  ;;  %v2109_v52 = vadd.f32 %v2077_v12, %v1725_v55  ;;  %v6064_v5 = vsel %vm1195_vm5, %v7654_v38, 0.0  ;;  %v7663_v12 = vld [vmem:[#allocation144_spill] sm:$0xff] }
 0x31d   : > { %v6067_v30 = vadd.f32 %v1391_v29, %v5792_v21  ;;  %v6070_v57 = vadd.f32 %v1390_v13, %v5718_v41  ;;  %vm1898_vm13 = vcmp.eq.s32.totalorder %v5492_v24, %v5379_v6  ;;  %v6075_v26 = vadd.f32 %v1393_v32, %v5736_v35  ;;  %v7656_v41 = vld [vmem:[#allocation159_spill] sm:$0xff]  ;;  %v7667_v32 = vld [vmem:[#allocation161_spill] sm:$0xff] }
 0x31e   : > { %vm1902_vm6 = vcmp.eq.s32.totalorder %v5492_v24, %v5432_v54  ;;  %v2090_v34 = vsel %vm1898_vm13, %v2009_v36, 0.0  ;;  %v2142_v48 = vmul.f32 %v2110_v0, %v1405_v60  ;;  %vm1546_vm7 = vcmp.eq.s32.totalorder %v5492_v24, %v5213_v22  ;;  %v7657_v6 = vld [vmem:[#allocation127_spill] sm:$0xff]  ;;  %v7659_v54 = vld [vmem:[#allocation164_spill] sm:$0xff] }
 0x31f   : > { %v2094_v21 = vsel %vm1902_vm6, %v5875_v47, 0.0  ;;  %vm1897_vm12 = vcmp.eq.s32.totalorder %v5492_v24, %v7655_v58  ;;  %vm1550_vm2 = vcmp.eq.s32.totalorder %v5492_v24, %v7656_v41  ;;  %v1738_v4 = vsel %vm1546_vm7, %v7657_v6, 0.0  ;;  %v7660_v22 = vld [vmem:[#allocation3_spill] sm:$0xff] }
 0x320   : > { %v2089_v35 = vsel %vm1897_vm12, %v5957_v31, 0.0  ;;  %v2141_v46 = vmul.f32 %v2109_v52, %v1404_v39  ;;  %vm1545_vm9 = vcmp.eq.s32.totalorder %v5492_v24, %v7658_v62  ;;  %vm1549_vm11 = vcmp.eq.s32.totalorder %v5492_v24, %v7659_v54  ;;  %v7665_v36 = vld [vmem:[#allocation139_spill] sm:$0xff] }
 0x321   : > { %v1742_v60 = vsel %vm1550_vm2, %v7660_v22, 0.0  ;;  %v2122_v47 = vadd.f32 %v2090_v34, %v1738_v4  ;;  %2357 = vperm.xlu1 %3593, %v6094_v25   ;;  %v1737_v40 = vsel %vm1545_vm9, %v7661_v27, 0.0  ;;  %vm1901_vm15 = vcmp.eq.s32.totalorder %v5492_v24, %v7662_v59  ;;  %v7668_v52 = vld [vmem:[#allocation191_spill] sm:$0xff]  ;;  %v7669_v34 = vld [vmem:[#allocation165_spill] sm:$0xff]  ;;  %v7674_v4 = vld [vmem:[#allocation162_spill] sm:$0xff] }
 0x322   : > { %v2126_v31 = vadd.f32 %v2094_v21, %v1742_v60  ;;  %v7098_v39 = vmov 3   ;;  %v2024_v44 = vpop.permute.xlu1 %2023  ;;  %v2170_v3 = vpack.c.bf16 %v2142_v48, %v2141_v46  ;;  %vm1535_vm0 = vcmp.eq.s32.totalorder %v5492_v24, %v7663_v12  ;;  %v7672_v21 = vld [vmem:[#allocation197_spill] sm:$0xff]  ;;  %v7673_v58 = vld [vmem:[#allocation183_spill] sm:$0xff]  ;;  %v7676_v46 = vld [vmem:[#allocation146_spill] sm:$0xff] }
 0x323   : > { %3594 = vset.pattern.permute.xlu2 %v7098_v39  ;;  %v1741_v29 = vsel %vm1549_vm11, %v7664_v42, 0.0  ;;  %v2121_v49 = vadd.f32 %v2089_v35, %v1737_v40  ;;  %v2093_v13 = vsel %vm1901_vm15, %v2024_v44, 0.0  ;;  %v2034_v0 = vpop.permute.xlu0 %2033  ;;  %v6110_v53 = vsel %vm1202_vm4, %v7665_v36, 0.0  ;;  %v7675_v35 = vld [vmem:[#allocation198_spill] sm:$0xff]  ;;  %v7677_v22 = vld [vmem:[#allocation171_spill] sm:$0xff]  ;;  %v7679_v27 = vld [vmem:[#allocation156_spill] sm:$0xff] }
 0x324   : > { %3597 = vset.pattern.permute.xlu0 %v7098_v39  ;;  %2394 = vperm.xlu2 %3594, %v5426_v51   ;;  %vm1536_vm1 = vcmp.eq.s32.totalorder %v5492_v24, %v7666_v15  ;;  %vm1553_vm5 = vcmp.eq.s32.totalorder %v5492_v24, %v7667_v32  ;;  %v2125_v55 = vadd.f32 %v2093_v13, %v1741_v29  ;;  %v6117_v38 = vpop.permute.xlu2 %2202  ;;  %v7670_v51 = vld [vmem:[#allocation166_spill] sm:$0xff]  ;;  %v7680_v40 = vld [vmem:[#allocation173_spill] sm:$0xff]  ;;  %v7682_v44 = vld [vmem:[#allocation208_spill] sm:$0xff] }
 0x325   : > { %3108 = vmatmul.bf16.gmra.mxu1 %v2170_v3  ;;  %2398 = vperm.xlu0 %3597, %v7668_v52   ;;  %vm1551_vm8 = vcmp.eq.s32.totalorder %v5492_v24, %v7669_v34  ;;  %vm1552_vm3 = vcmp.eq.s32.totalorder %v5492_v24, %v7670_v51  ;;  %vm1554_vm10 = vcmp.eq.s32.totalorder %v5492_v24, %v7671_v18  ;;  %v1728_v60 = vsel %vm1536_vm1, %v7677_v22, 0.0  ;;  %v7681_v59 = vld [vmem:[#allocation30_spill] sm:$0xff]  ;;  %v7683_v42 = vld [vmem:[#allocation177_spill] sm:$0xff] }
 0x326   : > { %v2154_v48 = vmul.f32 %v2122_v47, %v1417_v50  ;;  %vm1903_vm14 = vcmp.eq.s32.totalorder %v5492_v24, %v7672_v21  ;;  %vm1888_vm4 = vcmp.eq.s32.totalorder %v5492_v24, %v7673_v58  ;;  %v6129_v41 = vmul.f32 %v2125_v55, %v1420_v1  ;;  %v7678_v1 = vld [vmem:[#allocation20_spill] sm:$0xff]  ;;  %v7686_v15 = vld [vmem:[#allocation102_spill] sm:$0xff] }
 0x327   : > { %v6132_v6 = vmul.f32 %v2126_v31, %v6018_v61  ;;  %vm1548_vm13 = vcmp.eq.s32.totalorder %v5492_v24, %v7674_v4  ;;  %vm1905_vm6 = vcmp.eq.s32.totalorder %v5492_v24, %v7675_v35  ;;  %v2080_v62 = vsel %vm1888_vm4, %v7676_v46, 0.0  ;;  %v7687_v55 = vld [vmem:[#allocation176_spill] sm:$0xff]  ;;  %v7690_v46 = vld [vmem:[#allocation18_spill] sm:$0xff] }
 0x328   : > { %v2095_v50 = vsel %vm1903_vm14, %v2034_v0, 0.0  ;;  %v2153_v54 = vmul.f32 %v2121_v49, %v1416_v20  ;;  %vm1887_vm7 = vcmp.eq.s32.totalorder %v5492_v24, %v7678_v1  ;;  %v2097_v61 = vsel %vm1905_vm6, %v5959_v17, 0.0  ;;  %v7684_v49 = vld [vmem:[#allocation187_spill] sm:$0xff]  ;;  %v7685_v0 = vld [vmem:[#allocation194_spill] sm:$0xff]  ;;  %v7689_v35 = vld [vmem:[#allocation196_spill] sm:$0xff] }
 0x329   : > { %v2178_v47 = vpack.c.bf16 %v6132_v6, %v6129_v41  ;;  %vm1547_vm12 = vcmp.eq.s32.totalorder %v5492_v24, %v7679_v27  ;;  %v1727_v20 = vsel %vm1535_vm0, %v7680_v40, 0.0  ;;  %v1743_v31 = vsel %vm1551_vm8, %v7681_v59, 0.0  ;;  %3595 = vset.pattern.permute.xlu1 %v7098_v39  ;;  %v7693_v1 = vld [vmem:[#allocation195_spill] sm:$0xff] }
 0x32a   : > { %v2079_v3 = vsel %vm1887_vm7, %v7682_v44, 0.0  ;;  %v2176_v17 = vpack.c.bf16 %v2154_v48, %v2153_v54  ;;  %v1745_v29 = vsel %vm1553_vm5, %v7683_v42, 0.0  ;;  %vm1904_vm2 = vcmp.eq.s32.totalorder %v5492_v24, %v7684_v49  ;;  %2402 = vperm.xlu1 %3595, %v7685_v0   ;;  %v2039_v36 = vpop.permute.xlu1 %2038  ;;  %v7688_v48 = vld [vmem:[#allocation202_spill] sm:$0xff]  ;;  %v7694_v40 = vld [vmem:[#allocation163_spill] sm:$0xff]  ;;  %v7697_v42 = vld [vmem:[#allocation189_spill] sm:$0xff] }
 0x32b   : > { %v2112_v12 = vadd.f32 %v2080_v62, %v1728_v60  ;;  %v2127_v13 = vadd.f32 %v2095_v50, %v1743_v31  ;;  %vm1184_vm9 = vcmp.eq.s32.totalorder %v5497_v16, %v7686_v15  ;;  %v1744_v34 = vsel %vm1552_vm3, %v7687_v55, 0.0  ;;  %v2049_v58 = vpop.permute.xlu0 %2048  ;;  %v7691_v62 = vld [vmem:[#allocation114_spill] sm:$0xff]  ;;  %v7692_v50 = vld [vmem:[#allocation35_spill] sm:$0xff]  ;;  %v7696_v31 = vld [vmem:[#allocation192_spill] sm:$0xff] }
 0x32c   : > { %vm1906_vm11 = vcmp.eq.s32.totalorder %v5492_v24, %v7688_v48  ;;  %v2129_v32 = vadd.f32 %v2097_v61, %v1745_v29  ;;  %v2096_v21 = vsel %vm1904_vm2, %v2039_v36, 0.0  ;;  %2406 = vperm.xlu2 %3594, %v7689_v35   ;;  %3138 = vmatmul.bf16.gmra.mxu2 %v2176_v17  ;;  %vm1205_vm15 = vcmp.eq.s32.totalorder %v5497_v16, %v7690_v46  ;;  %v6185_v61 = vpop.permute.xlu2 %2217  ;;  %v7695_v59 = vld [vmem:[#allocation203_spill] sm:$0xff]  ;;  %v7700_v55 = vld [vmem:[#allocation168_spill] sm:$0xff]  ;;  %v7703_v48 = vld [vmem:[#allocation190_spill] sm:$0xff] }
 0x32d   : > { %vm1204_vm0 = vcmp.eq.s32.totalorder %v5497_v16, %v7691_v62  ;;  %v1746_v51 = vsel %vm1554_vm10, %v7692_v50, 0.0  ;;  %v2111_v54 = vadd.f32 %v2079_v3, %v1727_v20  ;;  %v2128_v22 = vadd.f32 %v2096_v21, %v1744_v34  ;;  %2418 = vperm.xlu0 %3597, %v7693_v1   ;;  %v7702_v34 = vld [vmem:[#allocation129_spill] sm:$0xff]  ;;  %v7704_v21 = vld [vmem:[#allocation199_spill] sm:$0xff]  ;;  %v7719_v46 = vld [vmem:[#allocation44_spill] sm:$0xff] }
 0x32e   : > { %v2098_v60 = vsel %vm1906_vm11, %v2049_v58, 0.0  ;;  %vm1556_vm1 = vcmp.eq.s32.totalorder %v5492_v24, %v7694_v40  ;;  %vm1908_vm5 = vcmp.eq.s32.totalorder %v5492_v24, %v7695_v59  ;;  %vm1900_vm8 = vcmp.eq.s32.totalorder %v5492_v24, %v7696_v31  ;;  %v7707_v31 = vld [vmem:[#allocation201_spill] sm:$0xff]  ;;  %v7709_v27 = vld [vmem:[#allocation31_spill] sm:$0xff]  ;;  %v7720_v62 = vld [vmem:[#allocation154_spill] sm:$0xff] }
 0x32f   : > { %v2130_v44 = vadd.f32 %v2098_v60, %v1746_v51  ;;  %v2092_v18 = vsel %vm1900_vm8, %v6053_v10, 0.0  ;;  %v2144_v20 = vmul.f32 %v2112_v12, %v5974_v19  ;;  %v6196_v3 = vmul.f32 %v2127_v13, %v6070_v57  ;;  %v7698_v10 = vld [vmem:[#allocation124_spill] sm:$0xff]  ;;  %v7699_v57 = vld [vmem:[#allocation46_spill] sm:$0xff]  ;;  %v7705_v51 = vld [vmem:[#allocation83_spill] sm:$0xff] }
 0x330   : > { %v6199_v17 = vmul.f32 %v2128_v22, %v6067_v30  ;;  %vm1899_vm3 = vcmp.eq.s32.totalorder %v5492_v24, %v7697_v42  ;;  %v2100_v29 = vsel %vm1908_vm5, %v6055_v14, 0.0  ;;  %v6205_v49 = vmul.f32 %v2129_v32, %v6036_v63  ;;  %v7701_v63 = vld [vmem:[#allocation179_spill] sm:$0xff]  ;;  %v7706_v22 = vld [vmem:[#allocation178_spill] sm:$0xff] }
 0x331   : > { %v6208_v36 = vmul.f32 %v2130_v44, %v6075_v26  ;;  %v1740_v19 = vsel %vm1548_vm13, %v7698_v10, 0.0  ;;  %v2091_v12 = vsel %vm1899_vm3, %v7699_v57, 0.0  ;;  %v2143_v30 = vmul.f32 %v2111_v54, %v5954_v23  ;;  %v7708_v44 = vld [vmem:[#allocation48_spill] sm:$0xff]  ;;  %v7710_v42 = vld [vmem:[#allocation138_spill] sm:$0xff] }
 0x332   : > { %v2179_v13 = vpack.c.bf16 %v6199_v17, %v6196_v3  ;;  %vm1555_vm10 = vcmp.eq.s32.totalorder %v5492_v24, %v7700_v55  ;;  %v1748_v14 = vsel %vm1556_vm1, %v7701_v63, 0.0  ;;  %v2124_v26 = vadd.f32 %v2092_v18, %v1740_v19  ;;  %2410 = vperm.xlu1 %3595, %v7704_v21   ;;  %v2054_v58 = vpop.permute.xlu1 %2053  ;;  %v7712_v57 = vld [vmem:[#allocation200_spill] sm:$0xff]  ;;  %v7714_v63 = vld [vmem:[#allocation142_spill] sm:$0xff] }
 0x333   : > { %v2180_v4 = vpack.c.bf16 %v6208_v36, %v6205_v49  ;;  %v1739_v23 = vsel %vm1547_vm12, %v7702_v34, 0.0  ;;  %vm1907_vm14 = vcmp.eq.s32.totalorder %v5492_v24, %v7703_v48  ;;  %v2132_v32 = vadd.f32 %v2100_v29, %v1748_v14  ;;  %v7711_v29 = vld [vmem:[#allocation51_spill] sm:$0xff]  ;;  %v2064_v19 = vpop.permute.xlu0 %2063 }
 0x334   : > { %v2171_v50 = vpack.c.bf16 %v2144_v20, %v2143_v30  ;;  %v1419_v54 = vadd.f32 %v6064_v5, %v7705_v51  ;;  %v1747_v60 = vsel %vm1555_vm10, %v7706_v22, 0.0  ;;  %v2123_v40 = vadd.f32 %v2091_v12, %v1739_v23  ;;  %2414 = vperm.xlu2 %3594, %v7707_v31   ;;  %v6248_v12 = vpop.permute.xlu2 %2227  ;;  %v7713_v30 = vld [vmem:[#allocation47_spill] sm:$0xff]  ;;  %v7717_v23 = vld [vmem:[#allocation181_spill] sm:$0xff] }
 0x335   : > { %v2099_v59 = vsel %vm1907_vm14, %v2054_v58, 0.0  ;;  %vm833_vm4 = vcmp.eq.s32.totalorder %v5497_v16, %v7708_v44  ;;  %v1376_v18 = vsel %vm1184_vm9, %v7709_v27, 0.0  ;;  %v1427_v20 = vadd.f32 %v6042_v11, %v7710_v42  ;;  %2430 = vperm.xlu0 %3597, %v7712_v57   ;;  %v7715_v14 = vld [vmem:[#allocation143_spill] sm:$0xff]  ;;  %v7724_v27 = vld [vmem:[#allocation4_spill] sm:$0xff] }
 0x336   : > { %v1426_v5 = vadd.f32 %v6110_v53, %v7711_v29  ;;  %v2131_v10 = vadd.f32 %v2099_v59, %v1747_v60  ;;  %3113 = vmatmul.bf16.gmra.mxu1 %v2171_v50  ;;  %v1418_v55 = vadd.f32 %v5980_v9, %v7713_v30  ;;  %v1397_v15 = vsel %vm1205_vm15, %v7714_v63, 0.0  ;;  %v7716_v34 = vld [vmem:[#allocation207_spill] sm:$0xff]  ;;  %v7723_v60 = vld [vmem:[#allocation174_spill] sm:$0xff]  ;;  %v7728_v30 = vld [vmem:[#allocation204_spill] sm:$0xff] }
 0x337   : > { %v1396_v11 = vsel %vm1204_vm0, %v7715_v14, 0.0  ;;  %v2156_v53 = vmul.f32 %v2124_v26, %v1419_v54  ;;  %vm1909_vm13 = vcmp.eq.s32.totalorder %v5492_v24, %v7716_v34  ;;  %vm1889_vm6 = vcmp.eq.s32.totalorder %v5492_v24, %v7717_v23  ;;  %v7718_v58 = vld [vmem:[#allocation147_spill] sm:$0xff]  ;;  %v7721_v26 = vld [vmem:[#allocation169_spill] sm:$0xff]  ;;  %v7722_v54 = vld [vmem:[#allocation184_spill] sm:$0xff] }
 0x338   : > { %v6264_v48 = vmul.f32 %v2131_v10, %v1426_v5  ;;  %v6266_v9 = vmul.f32 %v2132_v32, %v1427_v20  ;;  %vm1538_vm7 = vcmp.eq.s32.totalorder %v5492_v24, %v7718_v58  ;;  %v2081_v50 = vsel %vm1889_vm6, %v7719_v46, 0.0  ;;  %v7725_v20 = vld [vmem:[#allocation101_spill] sm:$0xff]  ;;  %v7729_v63 = vld [vmem:[#allocation70_spill] sm:$0xff]  ;;  %v7731_v46 = vld [vmem:[#allocation180_spill] sm:$0xff] }
 0x339   : > { %v2101_v51 = vsel %vm1909_vm13, %v2064_v19, 0.0  ;;  %v2155_v22 = vmul.f32 %v2123_v40, %v1418_v55  ;;  %vm1537_vm12 = vcmp.eq.s32.totalorder %v5492_v24, %v7720_v62  ;;  %vm1557_vm2 = vcmp.eq.s32.totalorder %v5492_v24, %v7721_v26  ;;  %v7726_v40 = vld [vmem:[#allocation170_spill] sm:$0xff]  ;;  %v7727_v10 = vld [vmem:[#allocation193_spill] sm:$0xff] }
 0x33a   : > { %vm1890_vm9 = vcmp.eq.s32.totalorder %v5492_v24, %v7722_v54  ;;  %v2181_v32 = vpack.c.bf16 %v6266_v9, %v6264_v48  ;;  %v1729_v59 = vsel %vm1537_vm12, %v7723_v60, 0.0  ;;  %v1749_v42 = vsel %vm1557_vm2, %v7724_v27, 0.0  ;;  %2422 = vperm.xlu1 %3595, %v7728_v30   ;;  %v2069_v55 = vpop.permute.xlu1 %2068  ;;  %v7730_v34 = vld [vmem:[#allocation26_spill] sm:$0xff]  ;;  %v7735_v27 = vld [vmem:[#allocation135_spill] sm:$0xff]  ;;  %v7736_v58 = vld [vmem:[#allocation33_spill] sm:$0xff] }
 0x33b   : > { %v2082_v29 = vsel %vm1890_vm9, %v7725_v20, 0.0  ;;  %v2177_v5 = vpack.c.bf16 %v2156_v53, %v2155_v22  ;;  %vm1558_vm11 = vcmp.eq.s32.totalorder %v5492_v24, %v7726_v40  ;;  %vm1910_vm15 = vcmp.eq.s32.totalorder %v5492_v24, %v7727_v10  ;;  %v7732_v62 = vld [vmem:[#allocation206_spill] sm:$0xff] }
 0x33c   : > { %v2113_v19 = vadd.f32 %v2081_v50, %v1729_v59  ;;  %v2133_v57 = vadd.f32 %v2101_v51, %v1749_v42  ;;  %v1408_v14 = vadd.f32 %v1376_v18, %v7729_v63  ;;  %v1730_v23 = vsel %vm1538_vm7, %v7730_v34, 0.0  ;;  %2426 = vperm.xlu2 %3594, %v7732_v62   ;;  %v7733_v26 = vld [vmem:[#allocation58_spill] sm:$0xff]  ;;  %v7734_v50 = vld [vmem:[#allocation55_spill] sm:$0xff]  ;;  %v6297_v18 = vpop.permute.xlu2 %2242  ;;  %v6299_v42 = vpop.permute.xlu0 %2207  ;;  %v7738_v63 = vld [vmem:[#allocation12_spill] sm:$0xff] }
 0x33d   : > { %v1750_v53 = vsel %vm1558_vm11, %v7731_v46, 0.0  ;;  %v2102_v22 = vsel %vm1910_vm15, %v2069_v55, 0.0  ;;  %3143 = vmatmul.bf16.gmra.mxu2 %v2177_v5  ;;  %v1429_v54 = vadd.f32 %v1397_v15, %v7733_v26  ;;  %v1428_v51 = vadd.f32 %v1396_v11, %v7734_v50  ;;  %2466 = vperm.xlu0 %3597, %v7735_v27   ;;  %v7737_v30 = vld [vmem:[#allocation50_spill] sm:$0xff]  ;;  %v7742_v46 = vld [vmem:[#allocation157_spill] sm:$0xff]  ;;  %v7746_v50 = vld [vmem:[#allocation56_spill] sm:$0xff] }
 0x33e   : > { %v2114_v60 = vadd.f32 %v2082_v29, %v1730_v23  ;;  %v2134_v59 = vadd.f32 %v2102_v22, %v1750_v53  ;;  %v1025_v20 = vsel %vm833_vm4, %v7736_v58, 0.0  ;;  %v2145_v5 = vmul.f32 %v2113_v19, %v1408_v14  ;;  %v7739_v19 = vld [vmem:[#allocation182_spill] sm:$0xff]  ;;  %v7741_v23 = vld [vmem:[#allocation104_spill] sm:$0xff]  ;;  %v7743_v53 = vld [vmem:[#allocation185_spill] sm:$0xff] }
 0x33f   : > { %v1409_v40 = vadd.f32 %v5967_v33, %v1025_v20  ;;  %v6306_v10 = vmul.f32 %v2133_v57, %v1428_v51  ;;  %vm1892_vm0 = vcmp.eq.s32.totalorder %v5492_v24, %v7739_v19  ;;  %v7740_v57 = vld [vmem:[#allocation64_spill] sm:$0xff]  ;;  %vm1187_vm1 = vcmp.eq.s32.totalorder %v5497_v16, %v7741_v23  ;;  %v7745_v26 = vld [vmem:[#allocation125_spill] sm:$0xff] }
 0x340   : > { %v6308_v15 = vmul.f32 %v2134_v59, %v1429_v54  ;;  %v2084_v14 = vsel %vm1892_vm0, %v7740_v57, 0.0  ;;  %vm1540_vm5 = vcmp.eq.s32.totalorder %v5492_v24, %v7742_v46  ;;  %vm1891_vm8 = vcmp.eq.s32.totalorder %v5492_v24, %v7743_v53  ;;  %v7744_v22 = vld [vmem:[#allocation36_spill] sm:$0xff]  ;;  %v7747_v51 = vld [vmem:[#allocation61_spill] sm:$0xff]  ;;  %v7749_v59 = vld [vmem:[#allocation155_spill] sm:$0xff] }
 0x341   : > { %v2146_v11 = vmul.f32 %v2114_v60, %v1409_v40  ;;  %v1379_v62 = vsel %vm1187_vm1, %v7744_v22, 0.0  ;;  %v1732_v54 = vsel %vm1540_vm5, %v7745_v26, 0.0  ;;  %vm835_vm3 = vcmp.eq.s32.totalorder %v5497_v16, %v7747_v51  ;;  %v7748_v60 = vld [vmem:[#allocation7_spill] sm:$0xff]  ;;  %v7750_v20 = vld [vmem:[#allocation32_spill] sm:$0xff]  ;;  %v7754_v57 = vld [vmem:[#allocation62_spill] sm:$0xff] }
 0x342   : > { %v2182_v29 = vpack.c.bf16 %v6308_v15, %v6306_v10  ;;  %2434 = vperm.xlu1 %3595, %v7737_v30   ;;  %vm1186_vm10 = vcmp.eq.s32.totalorder %v5497_v16, %v7748_v60  ;;  %vm1539_vm14 = vcmp.eq.s32.totalorder %v5492_v24, %v7749_v59  ;;  %v2116_v58 = vadd.f32 %v2084_v14, %v1732_v54  ;;  %v7752_v30 = vld [vmem:[#allocation172_spill] sm:$0xff]  ;;  %v7755_v53 = vld [vmem:[#allocation82_spill] sm:$0xff] }
 0x343   : > { %v2172_v55 = vpack.c.bf16 %v2146_v11, %v2145_v5  ;;  %v6314_v34 = vpop.permute.xlu1 %2212  ;;  %v1027_v40 = vsel %vm835_vm3, %v7750_v20, 0.0  ;;  %v7751_v5 = vld [vmem:[#allocation126_spill] sm:$0xff]  ;;  %vm834_vm4 = vcmp.eq.s32.totalorder %v5497_v16, %v7754_v57  ;;  %v7759_v3 = vpack.c.bf16 %v5898_v8, %v5896_v2  ;;  %v7761_v60 = vld [vmem:[#allocation52_spill] sm:$0xff] }
 0x344   : > { %2438 = vperm.xlu2 %3594, %v7738_v63   ;;  %v6317_v33 = vpop.permute.xlu2 %2257  ;;  %v6319_v44 = vpop.permute.xlu0 %2232  ;;  %v1378_v11 = vsel %vm1186_vm10, %v7751_v5, 0.0  ;;  %v7753_v63 = vld [vmem:[#allocation205_spill] sm:$0xff]  ;;  %v1411_v24 = vadd.f32 %v1379_v62, %v1027_v40  ;;  %v1026_v22 = vsel %vm834_vm4, %v7755_v53, 0.0  ;;  %v7762_v5 = vld [vmem:[#allocation59_spill] sm:$0xff]  ;;  %vm2899_vm13 = vcmask 523264  }
 0x345   : > { %3602 = vset.pattern.permute.xlu0 %v3716_v28  ;;  %v1410_v26 = vadd.f32 %v1378_v11, %v1026_v22  ;;  %v3663_v11 = vld [vmem:[%s3799_s14 + $0x38] sm:$0xff]  ;;  %v3665_v53 = vld [vmem:[%s3799_s14 + $0x48] sm:$0xff]  ;;  %vm3174_vm6 = vcmask 261120  }
 0x346   : > { %3118 = vmatmul.bf16.gmra.mxu1 %v2172_v55  ;;  %2607 = vperm.xlu0 %3602, %v7707_v31   ;;  %v2083_v31 = vsel %vm1891_vm8, %v7746_v50, 0.0  ;;  %v1731_v55 = vsel %vm1539_vm14, %v7752_v30, 0.0  ;;  %v2148_v41 = vmul.f32 %v2116_v58, %v1411_v24  ;;  %v2199_v24 = vld [vmem:[%s6864_s3] sm:$0x7] }
 0x347   : > { %v2115_v14 = vadd.f32 %v2083_v31, %v1731_v55  ;;  %v7757_v31 = vld [vmem:[#allocation45_spill] sm:$0xff]  ;;  %v6461_v22 = vperm.slane %v2199_v24, 0  ;;  %v6466_v15 = vperm.slane %v2199_v24, 1 }
 0x348   : > { %v7763_v55 = vld [vmem:[#allocation53_spill] sm:$0xff] }
 0x349   : > { %v2147_v6 = vmul.f32 %v2115_v14, %v1410_v26  ;;  %v3664_v14 = vld [vmem:[%s3799_s14 + $0x40] sm:$0xff]  ;;  %v2369_v26 = vmul.f32 %v6461_v22, %v6297_v18 }
 0x34a   : > { %3598 = vset.pattern.permute.xlu1 %v3716_v28 }
 0x34b   : > { %v6348_v19 = vpop.permute.xlu1 %2222  ;;  %2591 = vperm.xlu1 %3598, %v7668_v52  }
 0x34c   : > { %2442 = vperm.xlu2 %3594, %v7753_v63   ;;  %v6353_v23 = vpop.permute.xlu2 %2272  ;;  %v6355_v46 = vpop.permute.xlu0 %2247 }
 0x34d   : > { %3148 = vmatmul.bf16.gmra.mxu2 %v2178_v47  ;;  %v2173_v47 = vpack.c.bf16 %v2148_v41, %v2147_v6 }
 0x34e   : > { %2611 = vperm.xlu0 %3602, %v7693_v1   ;;  %v7756_v1 = vld [vmem:[#allocation54_spill] sm:$0xff] }
 0x353   : > { %v6360_v54 = vpop.permute.xlu1 %2237  ;;  %2595 = vperm.xlu1 %3598, %v7685_v0  }
 0x354   : > { %3599 = vset.pattern.permute.xlu2 %v3716_v28  ;;  %v6363_v16 = vpop.permute.xlu2 %2287  ;;  %v6365_v52 = vpop.permute.xlu0 %2262 }
 0x355   : > { %2599 = vperm.xlu2 %3599, %v7689_v35   ;;  %v7758_v35 = vld [vmem:[#allocation49_spill] sm:$0xff] }
 0x356   : > { %3123 = vmatmul.bf16.gmra.mxu1 %v2173_v47  ;;  %3608 = vset.pattern.permute.xlu0 %v7098_v39 }
 0x357   : > { %2486 = vperm.xlu0 %3608, %v7756_v1  }
 0x35b   : > { %v6373_v62 = vpop.permute.xlu1 %2252  ;;  %3600 = vset.pattern.permute.xlu1 %v7098_v39 }
 0x35c   : > { %v6376_v50 = vpop.permute.xlu2 %2302  ;;  %v6378_v0 = vpop.permute.xlu0 %2277  ;;  %2470 = vperm.xlu1 %3600, %v7757_v31  }
 0x35d   : > { %3153 = vmatmul.bf16.gmra.mxu2 %v2179_v13  ;;  %2659 = vperm.xlu2 %3599, %v7735_v27  }
 0x35f   : > { %2490 = vperm.xlu0 %3608, %v7758_v35  }
 0x363   : > { %v6383_v51 = vpop.permute.xlu1 %2267 }
 0x364   : > { %v6388_v17 = vpop.permute.xlu2 %2317  ;;  %v6390_v13 = vpop.permute.xlu0 %2292  ;;  %3601 = vset.pattern.permute.xlu1 %v3716_v28 }
 0x365   : > { %2603 = vperm.xlu2 %3599, %v7704_v21   ;;  %2663 = vperm.xlu1 %3601, %v7757_v31   ;;  %v7760_v21 = vld [vmem:[#allocation119_spill] sm:$0xff]  ;;  %v7764_v31 = vld [vmem:[#allocation117_spill] sm:$0xff] }
 0x366   : > { %3128 = vmatmul.bf16.gmra.mxu1 %v7759_v3 }
 0x367   : > { %3611 = vset.pattern.permute.xlu0 %v3716_v28 }
 0x368   : > { %2687 = vperm.xlu0 %3611, %v5928_v56  }
 0x36b   : > { %v6400_v2 = vpop.permute.xlu1 %2282 }
 0x36c   : > { %v6402_v8 = vpop.permute.xlu2 %2332  ;;  %v6404_v27 = vpop.permute.xlu0 %2307 }
 0x36d   : > { %3158 = vmatmul.bf16.gmra.mxu2 %v2180_v4  ;;  %3604 = vset.pattern.permute.xlu2 %v7098_v39  ;;  %v3662_v4 = vld [vmem:[%s3799_s14 + $0x60] sm:$0xff] }
 0x36e   : > { %2478 = vperm.xlu2 %3604, %v7760_v21   ;;  %3603 = vset.pattern.permute.xlu1 %v7098_v39 }
 0x36f   : > { %2474 = vperm.xlu1 %3603, %v7761_v60  }
 0x370   : > { %2691 = vperm.xlu0 %3611, %v5946_v43  }
 0x373   : > { %v6411_v59 = vpop.permute.xlu1 %2297 }
 0x374   : > { %v6413_v49 = vpop.permute.xlu2 %2347  ;;  %v6415_v36 = vpop.permute.xlu0 %2322 }
 0x376   : > { %3606 = vset.pattern.permute.xlu2 %v3716_v28 }
 0x377   : > { %2671 = vperm.xlu2 %3606, %v7760_v21   ;;  %3605 = vset.pattern.permute.xlu1 %v3716_v28  ;;  %v3397_v21 = vld [vmem:[%s6866_s5 + $0x10] sm:$0xff] }
 0x378   : > { %2635 = vperm.xlu0 %3611, %v3662_v4   ;;  %2667 = vperm.xlu1 %3605, %v7761_v60  }
 0x37b   : > { %v6425_v58 = vpop.permute.xlu1 %2312 }
 0x37c   : > { %v6427_v20 = vpop.permute.xlu0 %2337 }
 0x37d   : > { %3163 = vmatmul.bf16.gmra.mxu2 %v2181_v32 }
 0x37e   : > { %v6429_v40 = vpop.permute.xlu2 %2394 }
 0x37f   : > { %3607 = vset.pattern.permute.xlu2 %v7098_v39 }
 0x380   : > { %3616 = vset.pattern.permute.xlu0 %v7098_v39  ;;  %2482 = vperm.xlu2 %3607, %v7762_v5  }
 0x381   : > { %2615 = vperm.xlu1 %3605, %v3663_v11   ;;  %2510 = vperm.xlu0 %3616, %v6030_v7   ;;  %v3396_v11 = vld [vmem:[%s6866_s5 + $0x8] sm:$0xff] }
 0x383   : > { %v6436_v48 = vpop.permute.xlu1 %2327 }
 0x384   : > { %v6438_v9 = vpop.permute.xlu0 %2352 }
 0x386   : > { %v6440_v32 = vpop.permute.xlu2 %2406 }
 0x388   : > { %3609 = vset.pattern.permute.xlu2 %v3716_v28 }
 0x389   : > { %2675 = vperm.xlu1 %3605, %v7762_v5   ;;  %2679 = vperm.xlu2 %3609, %v7756_v1   ;;  %v3398_v1 = vld [vmem:[%s6866_s5 + $0x18] sm:$0xff] }
 0x38a   : > { %3620 = vset.pattern.permute.xlu0 %v3716_v28  ;;  %2952 = vmatpush.bf16.msra.mxu0 %v3398_v1  ;;  %v3666_v5 = vld [vmem:[%s3799_s14 + $0x58] sm:$0xff] }
 0x38b   : > { %v6449_v30 = vpop.permute.xlu1 %2342  ;;  %2643 = vperm.xlu0 %3620, %v7763_v55   ;;  %3399 = vmatpush.bf16.msra.mxu3 %v3398_v1  ;;  %v3667_v55 = vld [vmem:[%s3799_s14 + $0x50] sm:$0xff] }
 0x38d   : > { %3168 = vmatmul.bf16.gmra.mxu2 %v2182_v29 }
 0x38e   : > { %v6452_v63 = vpop.permute.xlu0 %2587  ;;  %v6454_v57 = vpop.permute.xlu2 %2414  ;;  %2953 = vmatpush.bf16.msra.mxu0 %v3397_v21 }
 0x38f   : > { %3400 = vmatpush.bf16.msra.mxu3 %v3397_v21 }
 0x391   : > { %2619 = vperm.xlu1 %3605, %v3664_v14   ;;  %2623 = vperm.xlu2 %3609, %v3665_v53   ;;  %v3395_v53 = vld [vmem:[%s6866_s5] sm:$0xff] }
 0x392   : > { %2954 = vmatpush.bf16.msra.mxu0 %v3396_v11 }
 0x393   : > { %v6463_v10 = vpop.permute.xlu1 %2357  ;;  %2711 = vperm.xlu0 %3620, %v6094_v25   ;;  %3401 = vmatpush.bf16.msra.mxu3 %v3396_v11  ;;  %v3668_v11 = vld [vmem:[%s3799_s14 + $0x68] sm:$0xff] }
 0x396   : > { %v2427_v29 = vpop.permute.xlu2 %2426  ;;  %2955 = vmatpush.bf16.msra.mxu0 %v3395_v53 }
 0x397   : > { %v2530_v41 = vmul.f32 %v6466_v15, %v2427_v29  ;;  %v6471_v6 = vpop.permute.xlu0 %2398  ;;  %v2373_v29 = vmul.f32 %v6461_v22, %v6365_v52  ;;  %3402 = vmatpush.bf16.msra.mxu3 %v3395_v53  ;;  %v2368_v52 = vmul.f32 %v6461_v22, %v6360_v54  ;;  %v2522_v53 = vmul.f32 %v6466_v15, %v6429_v40 }
 0x399   : > { %v6473_v47 = vadd.f32 %v2530_v41, %v2369_v26  ;;  %3610 = vset.pattern.permute.xlu1 %v7098_v39  ;;  %2683 = vperm.xlu2 %3609, %v7758_v35   ;;  %v2372_v35 = vmul.f32 %v6461_v22, %v6317_v33 }
 0x39a   : > { %2494 = vperm.xlu1 %3610, %v5928_v56  }
 0x39b   : > { %2651 = vperm.xlu0 %3620, %v7764_v31   ;;  %v7765_v31 = vld [vmem:[#allocation122_spill] sm:$0xff] }
 0x39c   : > { %v6481_v18 = vpop.permute.xlu1 %2402 }
 0x39e   : > { %v2439_v3 = vpop.permute.xlu2 %2438 }
 0x39f   : > { %v2533_v60 = vmul.f32 %v6466_v15, %v2439_v3  ;;  %v6490_v4 = vpop.permute.xlu0 %2418 }
 0x3a1   : > { %v6492_v56 = vadd.f32 %v2533_v60, %v2372_v35  ;;  %2631 = vperm.xlu2 %3609, %v3666_v5  }
 0x3a2   : > { %3612 = vset.pattern.permute.xlu1 %v3716_v28 }
 0x3a3   : > { %2627 = vperm.xlu1 %3612, %v3667_v55  }
 0x3a4   : > { %v2411_v33 = vpop.permute.xlu1 %2410 }
 0x3a6   : > { %v2443_v14 = vpop.permute.xlu2 %2442 }
 0x3a7   : > { %v2534_v26 = vmul.f32 %v6466_v15, %v2443_v14  ;;  %v6506_v41 = vpop.permute.xlu0 %2430  ;;  %v2371_v14 = vmul.f32 %v6461_v22, %v6373_v62  ;;  %v2361_v62 = vmul.f32 %v6461_v22, %v6117_v38  ;;  %v2362_v38 = vmul.f32 %v6461_v22, %v6299_v42 }
 0x3a9   : > { %v6508_v1 = vadd.f32 %v2534_v26, %v2373_v29  ;;  %3614 = vset.pattern.permute.xlu2 %v7098_v39  ;;  %v2554_v40 = vadd.f32 %v2522_v53, %v2361_v62 }
 0x3aa   : > { %2502 = vperm.xlu2 %3614, %v7765_v31  }
 0x3ab   : > { %3613 = vset.pattern.permute.xlu1 %v7098_v39  ;;  %v2364_v39 = vmul.f32 %v6461_v22, %v6185_v61 }
 0x3ac   : > { %2498 = vperm.xlu1 %3613, %v5946_v43   ;;  %v2423_v3 = vpop.permute.xlu1 %2422  ;;  %v6525_v43 = vperm.slane %v2199_v24, 2 }
 0x3ad   : > { %v2529_v21 = vmul.f32 %v6466_v15, %v2423_v3 }
 0x3ae   : > { %v2715_v24 = vmul.f32 %v6525_v43, %v6452_v63  ;;  %v6553_v63 = vld [vmem:[%s6865_s4] ss:$0 sm:$0xff] }
 0x3af   : > { %v6517_v35 = vpop.permute.xlu0 %2466  ;;  %v6519_v60 = vadd.f32 %v2529_v21, %v2368_v52  ;;  %v2600_v5 = vpop.permute.xlu2 %2599  ;;  %v2527_v52 = vmul.f32 %v6466_v15, %v6454_v57  ;;  %v2526_v57 = vmul.f32 %v6466_v15, %v2411_v33 }
 0x3b2   : > { %2446 = vperm.xlu2 %3614, %v3668_v11  }
 0x3b4   : > { %3615 = vset.pattern.permute.xlu1 %v3716_v28  ;;  %v2435_v55 = vpop.permute.xlu1 %2434 }
 0x3b5   : > { %2695 = vperm.xlu1 %3615, %v7765_v31   ;;  %v2532_v54 = vmul.f32 %v6466_v15, %v2435_v55  ;;  %v2366_v31 = vmul.f32 %v6461_v22, %v6248_v12  ;;  %v2523_v55 = vmul.f32 %v6466_v15, %v6471_v6  ;;  %v2747_v12 = vadd.f32 %v2715_v24, %v2554_v40 }
 0x3b6   : > { %v2525_v6 = vmul.f32 %v6466_v15, %v6440_v32  ;;  %v2718_v24 = vmul.f32 %v6525_v43, %v2600_v5 }
 0x3b7   : > { %v6531_v29 = vadd.f32 %v2532_v54, %v2371_v14  ;;  %v6533_v26 = vpop.permute.xlu2 %2659  ;;  %v2559_v14 = vadd.f32 %v2527_v52, %v2366_v31  ;;  %v2365_v54 = vmul.f32 %v6461_v22, %v6348_v19  ;;  %v2555_v52 = vadd.f32 %v2523_v55, %v2362_v38 }
 0x3b8   : > { %v2608_v3 = vpop.permute.xlu0 %2607  ;;  %v2557_v32 = vadd.f32 %v2525_v6, %v2364_v39  ;;  %v2524_v55 = vmul.f32 %v6466_v15, %v6481_v18 }
 0x3b9   : > { %v2720_v21 = vmul.f32 %v6525_v43, %v2608_v3  ;;  %v2558_v42 = vadd.f32 %v2526_v57, %v2365_v54  ;;  %v2363_v57 = vmul.f32 %v6461_v22, %v6314_v34 }
 0x3ba   : > { %2506 = vperm.xlu2 %3614, %v6014_v37   ;;  %v2750_v38 = vadd.f32 %v2718_v24, %v2557_v32  ;;  %v3670_v24 = vld [vmem:[%s3799_s14 + $0x70] sm:$0xff]  ;;  %v2379_v32 = vmul.f32 %v6461_v22, %v6390_v13 }
 0x3bb   : > { %v2752_v53 = vadd.f32 %v2720_v21, %v2559_v14  ;;  %v2556_v18 = vadd.f32 %v2524_v55, %v2363_v57  ;;  %v2733_v55 = vmul.f32 %v6525_v43, %v6533_v26 }
 0x3bd   : > { %2639 = vperm.xlu1 %3615, %v3668_v11   ;;  %v2592_v3 = vpop.permute.xlu1 %2591  ;;  %v2783_v11 = vadd.f32 %v6553_v63, %v2747_v12  ;;  %v2788_v21 = vadd.f32 %v6553_v63, %v2752_v53 }
 0x3be   : > { %v2716_v33 = vmul.f32 %v6525_v43, %v2592_v3 }
 0x3bf   : > { %v2604_v62 = vpop.permute.xlu2 %2603  ;;  %v2815_v5 = vmax.f32 %v2783_v11, 0.0  ;;  %v2820_v54 = vmax.f32 %v2788_v21, 0.0 }
 0x3c0   : > { %v2719_v31 = vmul.f32 %v6525_v43, %v2604_v62  ;;  %v2748_v19 = vadd.f32 %v2716_v33, %v2555_v52  ;;  %v2786_v52 = vadd.f32 %v6553_v63, %v2750_v38 }
 0x3c2   : > { %v2751_v40 = vadd.f32 %v2719_v31, %v2558_v42  ;;  %3617 = vset.pattern.permute.xlu2 %v3716_v28  ;;  %v2784_v14 = vadd.f32 %v6553_v63, %v2748_v19  ;;  %v7766_v42 = vmov 3   ;;  %v2818_v31 = vmax.f32 %v2786_v52, 0.0 }
 0x3c3   : > { %2703 = vperm.xlu2 %3617, %v6030_v7  }
 0x3c4   : > { %v2787_v61 = vadd.f32 %v6553_v63, %v2751_v40  ;;  %v2816_v12 = vmax.f32 %v2784_v14, 0.0  ;;  %v2540_v40 = vmul.f32 %v6466_v15, %v6517_v35 }
 0x3c5   : > { %2699 = vperm.xlu1 %3615, %v6014_v37   ;;  %v2596_v53 = vpop.permute.xlu1 %2595  ;;  %v3669_v37 = vld [vmem:[%s3799_s14 + $0x78] sm:$0xff] }
 0x3c6   : > { %v2819_v39 = vmax.f32 %v2787_v61, 0.0  ;;  %v2717_v3 = vmul.f32 %v6525_v43, %v2596_v53  ;;  %v2847_v7 = vpack.c.bf16 %v2816_v12, %v2815_v5  ;;  %v2572_v61 = vadd.f32 %v2540_v40, %v2379_v32 }
 0x3c7   : > { %v2380_v5 = vmul.f32 %v6461_v22, %v6411_v59 }
 0x3c8   : > { %v2849_v6 = vpack.c.bf16 %v2820_v54, %v2819_v39  ;;  %v2749_v33 = vadd.f32 %v2717_v3, %v2556_v18  ;;  %3336 = vmatmul.msk.bf16.vlgmr.msra.gmra.mxu0 %vm2899_vm13, %v2847_v7  ;;  %v2479_v34 = vpop.permute.xlu2 %2478  ;;  %v2765_v38 = vadd.f32 %v2733_v55, %v2572_v61 }
 0x3c9   : > { %v2543_v52 = vmul.f32 %v6466_v15, %v2479_v34  ;;  %v2381_v34 = vmul.f32 %v6461_v22, %v6376_v50 }
 0x3ca   : > { %v2785_v62 = vadd.f32 %v6553_v63, %v2749_v33  ;;  %v2801_v26 = vadd.f32 %v6553_v63, %v2765_v38  ;;  %v2382_v33 = vmul.f32 %v6461_v22, %v6404_v27 }
 0x3cb   : > { %3619 = vset.pattern.permute.xlu2 %v7766_v42 }
 0x3cc   : > { %2454 = vperm.xlu2 %3619, %v3669_v37   ;;  %v2817_v11 = vmax.f32 %v2785_v62, 0.0  ;;  %v2833_v59 = vmax.f32 %v2801_v26, 0.0 }
 0x3cd   : > { %3618 = vset.pattern.permute.xlu1 %v7766_v42 }
 0x3ce   : > { %2450 = vperm.xlu1 %3618, %v3670_v24   ;;  %v2471_v19 = vpop.permute.xlu1 %2470  ;;  %v2848_v21 = vpack.c.bf16 %v2818_v31, %v2817_v11  ;;  %v2575_v31 = vadd.f32 %v2543_v52, %v2382_v33  ;;  %v3672_v24 = vld [vmem:[%s3799_s14 + $0x80] sm:$0xff]  ;;  %v2383_v52 = vmul.f32 %v6461_v22, %v6425_v58 }
 0x3cf   : > { %v2541_v57 = vmul.f32 %v6466_v15, %v2471_v19 }
 0x3d1   : > { %v2672_v14 = vpop.permute.xlu2 %2671  ;;  %v2573_v12 = vadd.f32 %v2541_v57, %v2380_v5 }
 0x3d2   : > { %v2736_v62 = vmul.f32 %v6525_v43, %v2672_v14  ;;  %v2367_v14 = vmul.f32 %v6461_v22, %v6319_v44  ;;  %v2384_v44 = vmul.f32 %v6461_v22, %v6388_v17  ;;  %v2531_v17 = vmul.f32 %v6466_v15, %v6506_v41 }
 0x3d4   : > { %2514 = vperm.xlu2 %3619, %v5942_v45   ;;  %v2768_v19 = vadd.f32 %v2736_v62, %v2575_v31 }
 0x3d6   : > { %3621 = vset.pattern.permute.xlu1 %v3716_v28  ;;  %v2804_v32 = vadd.f32 %v6553_v63, %v2768_v19 }
 0x3d7   : > { %2647 = vperm.xlu1 %3621, %v3669_v37   ;;  %v2664_v35 = vpop.permute.xlu1 %2663  ;;  %v2612_v37 = vpop.permute.xlu0 %2611 }
 0x3d8   : > { %v2734_v13 = vmul.f32 %v6525_v43, %v2664_v35  ;;  %3337 = vmatmul.msk.bf16.gmra.mxu0 %vm2899_vm13, %v2848_v21  ;;  %v2721_v61 = vmul.f32 %v6525_v43, %v2612_v37  ;;  %v2836_v5 = vmax.f32 %v2804_v32, 0.0 }
 0x3da   : > { %v2766_v54 = vadd.f32 %v2734_v13, %v2573_v12  ;;  %v2483_v53 = vpop.permute.xlu2 %2482 }
 0x3dc   : > { %3623 = vset.pattern.permute.xlu2 %v3716_v28  ;;  %v2802_v39 = vadd.f32 %v6553_v63, %v2766_v54 }
 0x3dd   : > { %2707 = vperm.xlu2 %3623, %v5942_v45   ;;  %v3671_v45 = vld [vmem:[%s3799_s14 + $0x88] sm:$0xff] }
 0x3de   : > { %v2834_v18 = vmax.f32 %v2802_v39, 0.0 }
 0x3df   : > { %3622 = vset.pattern.permute.xlu1 %v7766_v42 }
 0x3e0   : > { %2518 = vperm.xlu1 %3622, %v6094_v25   ;;  %v2856_v7 = vpack.c.bf16 %v2834_v18, %v2833_v59 }
 0x3e1   : > { %v2475_v3 = vpop.permute.xlu1 %2474 }
 0x3e2   : > { %3345 = vmatmul.msk.bf16.vlgmr.msra.gmra.mxu3 %vm2899_vm13, %v2856_v7  ;;  %v2542_v11 = vmul.f32 %v6466_v15, %v2475_v3  ;;  %v2544_v3 = vmul.f32 %v6466_v15, %v2483_v53  ;;  %v2370_v53 = vmul.f32 %v6461_v22, %v6355_v46 }
 0x3e3   : > { %v2680_v25 = vpop.permute.xlu2 %2679 }
 0x3e4   : > { %v2574_v21 = vadd.f32 %v2542_v11, %v2381_v34  ;;  %v2576_v31 = vadd.f32 %v2544_v3, %v2383_v52  ;;  %v2563_v19 = vadd.f32 %v2531_v17, %v2370_v53 }
 0x3e5   : > { %3624 = vset.pattern.permute.xlu2 %v7766_v42  ;;  %v2528_v42 = vmul.f32 %v6466_v15, %v6490_v4 }
 0x3e6   : > { %2462 = vperm.xlu2 %3624, %v3671_v45  }
 0x3e7   : > { %v2560_v57 = vadd.f32 %v2528_v42, %v2367_v14 }
 0x3e8   : > { %2458 = vperm.xlu1 %3622, %v3672_v24   ;;  %3338 = vmatmul.msk.bf16.gmra.mxu0 %vm2899_vm13, %v2849_v6  ;;  %v2487_v6 = vpop.permute.xlu0 %2486 }
 0x3e9   : > { %v2753_v35 = vadd.f32 %v2721_v61, %v2560_v57  ;;  %v2545_v26 = vmul.f32 %v6466_v15, %v2487_v6 }
 0x3ea   : > { %v2668_v27 = vpop.permute.xlu1 %2667 }
 0x3eb   : > { %v2735_v40 = vmul.f32 %v6525_v43, %v2668_v27  ;;  %v2624_v12 = vpop.permute.xlu2 %2623  ;;  %v2789_v39 = vadd.f32 %v6553_v63, %v2753_v35  ;;  %v2577_v18 = vadd.f32 %v2545_v26, %v2384_v44 }
 0x3ec   : > { %v2724_v34 = vmul.f32 %v6525_v43, %v2624_v12 }
 0x3ed   : > { %v2767_v55 = vadd.f32 %v2735_v40, %v2574_v21  ;;  %v2821_v33 = vmax.f32 %v2789_v39, 0.0 }
 0x3ee   : > { %v2756_v40 = vadd.f32 %v2724_v34, %v2563_v19 }
 0x3ef   : > { %v2803_v50 = vadd.f32 %v6553_v63, %v2767_v55 }
 0x3f0   : > { %3625 = vset.pattern.permute.xlu1 %v3716_v28  ;;  %v2738_v28 = vmul.f32 %v6525_v43, %v2680_v25  ;;  %v2491_v21 = vpop.permute.xlu0 %2490  ;;  %v2792_v46 = vadd.f32 %v6553_v63, %v2756_v40 }
 0x3f1   : > { %v2835_v38 = vmax.f32 %v2803_v50, 0.0  ;;  %2655 = vperm.xlu1 %3625, %v3671_v45   ;;  %v2546_v57 = vmul.f32 %v6466_v15, %v2491_v21 }
 0x3f2   : > { %v2770_v62 = vadd.f32 %v2738_v28, %v2577_v18  ;;  %v2824_v35 = vmax.f32 %v2792_v46, 0.0 }
 0x3f3   : > { %v2616_v4 = vpop.permute.xlu1 %2615  ;;  %v2857_v13 = vpack.c.bf16 %v2836_v5, %v2835_v38  ;;  %v2684_v11 = vpop.permute.xlu2 %2683  ;;  %v2385_v5 = vmul.f32 %v6461_v22, %v6415_v36 }
 0x3f4   : > { %v2722_v54 = vmul.f32 %v6525_v43, %v2616_v4  ;;  %v2806_v24 = vadd.f32 %v6553_v63, %v2770_v62  ;;  %v2739_v38 = vmul.f32 %v6525_v43, %v2684_v11 }
 0x3f5   : > { %3346 = vmatmul.msk.bf16.gmra.mxu3 %vm2899_vm13, %v2857_v13  ;;  %v2578_v4 = vadd.f32 %v2546_v57, %v2385_v5 }
 0x3f6   : > { %v2754_v59 = vadd.f32 %v2722_v54, %v6519_v60  ;;  %v2838_v41 = vmax.f32 %v2806_v24, 0.0 }
 0x3f7   : > { %v2771_v39 = vadd.f32 %v2739_v38, %v2578_v4 }
 0x3f8   : > { %v2790_v7 = vadd.f32 %v6553_v63, %v2754_v59  ;;  %v2688_v13 = vpop.permute.xlu0 %2687 }
 0x3f9   : > { %v2740_v44 = vmul.f32 %v6525_v43, %v2688_v13  ;;  %v2807_v3 = vadd.f32 %v6553_v63, %v2771_v39 }
 0x3fa   : > { %v2822_v45 = vmax.f32 %v2790_v7, 0.0 }
 0x3fb   : > { %v2676_v37 = vpop.permute.xlu1 %2675  ;;  %v2632_v61 = vpop.permute.xlu2 %2631  ;;  %v2839_v62 = vmax.f32 %v2807_v3, 0.0 }
 0x3fc   : > { %v2737_v25 = vmul.f32 %v6525_v43, %v2676_v37  ;;  %v2850_v60 = vpack.c.bf16 %v2822_v45, %v2821_v33  ;;  %v2726_v36 = vmul.f32 %v6525_v43, %v2632_v61 }
 0x3fe   : > { %v2769_v58 = vadd.f32 %v2737_v25, %v2576_v31  ;;  %3339 = vmatmul.msk.bf16.gmra.mxu0 %vm2899_vm13, %v2850_v60  ;;  %v2758_v33 = vadd.f32 %v2726_v36, %v6492_v56 }
 0x400   : > { %v2805_v27 = vadd.f32 %v6553_v63, %v2769_v58  ;;  %v2794_v31 = vadd.f32 %v6553_v63, %v2758_v33  ;;  %v2692_v25 = vpop.permute.xlu0 %2691 }
 0x401   : > { %v2741_v21 = vmul.f32 %v6525_v43, %v2692_v25 }
 0x402   : > { %v2837_v42 = vmax.f32 %v2805_v27, 0.0  ;;  %v2826_v24 = vmax.f32 %v2794_v31, 0.0  ;;  %v2387_v27 = vmul.f32 %v6461_v22, %v6402_v8  ;;  %v3094_v31 = vpop.f32.mrf.mxu1 }
 0x403   : > { %v2620_v32 = vpop.permute.xlu1 %2619 }
 0x404   : > { %v2723_v55 = vmul.f32 %v6525_v43, %v2620_v32  ;;  %v2858_v14 = vpack.c.bf16 %v2838_v41, %v2837_v42  ;;  %v2503_v18 = vpop.permute.xlu2 %2502  ;;  %v2388_v32 = vmul.f32 %v6461_v22, %v6427_v20 }
 0x405   : > { %v2549_v40 = vmul.f32 %v6466_v15, %v2503_v18 }
 0x406   : > { %v2755_v50 = vadd.f32 %v2723_v55, %v6473_v47  ;;  %3347 = vmatmul.msk.bf16.gmra.mxu3 %vm2899_vm13, %v2858_v14  ;;  %v2386_v47 = vmul.f32 %v6461_v22, %v6436_v48 }
 0x407   : > { %v2581_v46 = vadd.f32 %v2549_v40, %v2388_v32 }
 0x408   : > { %v2791_v6 = vadd.f32 %v6553_v63, %v2755_v50  ;;  %v2636_v41 = vpop.permute.xlu0 %2635 }
 0x409   : > { %v2727_v50 = vmul.f32 %v6525_v43, %v2636_v41 }
 0x40a   : > { %v2823_v12 = vmax.f32 %v2791_v6, 0.0 }
 0x40b   : > { %v2759_v20 = vadd.f32 %v2727_v50, %v6508_v1 }
 0x40c   : > { %v2495_v26 = vpop.permute.xlu1 %2494  ;;  %v2851_v54 = vpack.c.bf16 %v2824_v35, %v2823_v12  ;;  %v2447_v60 = vpop.permute.xlu2 %2446  ;;  %v2374_v35 = vmul.f32 %v6461_v22, %v6383_v51 }
 0x40d   : > { %v2547_v28 = vmul.f32 %v6466_v15, %v2495_v26  ;;  %v2535_v6 = vmul.f32 %v6466_v15, %v2447_v60 }
 0x40e   : > { %3340 = vmatmul.msk.bf16.gmra.mxu0 %vm2899_vm13, %v2851_v54 }
 0x40f   : > { %v2579_v59 = vadd.f32 %v2547_v28, %v2386_v47  ;;  %v2567_v47 = vadd.f32 %v2535_v6, %v2374_v35  ;;  %v2390_v28 = vmul.f32 %v6461_v22, %v6413_v49 }
 0x410   : > { %v2511_v38 = vpop.permute.xlu0 %2510 }
 0x411   : > { %v2772_v7 = vadd.f32 %v2740_v44, %v2579_v59  ;;  %v2551_v54 = vmul.f32 %v6466_v15, %v2511_v38  ;;  %v2795_v59 = vadd.f32 %v6553_v63, %v2759_v20 }
 0x413   : > { %v2808_v52 = vadd.f32 %v6553_v63, %v2772_v7  ;;  %v2583_v1 = vadd.f32 %v2551_v54, %v2390_v28  ;;  %v2389_v7 = vmul.f32 %v6461_v22, %v6449_v30 }
 0x414   : > { %v2507_v42 = vpop.permute.xlu2 %2506 }
 0x415   : > { %v2628_v48 = vpop.permute.xlu1 %2627  ;;  %v2840_v45 = vmax.f32 %v2808_v52, 0.0  ;;  %v2550_v18 = vmul.f32 %v6466_v15, %v2507_v42  ;;  %v2827_v52 = vmax.f32 %v2795_v59, 0.0 }
 0x416   : > { %v2725_v37 = vmul.f32 %v6525_v43, %v2628_v48 }
 0x417   : > { %v2859_v17 = vpack.c.bf16 %v2840_v45, %v2839_v62  ;;  %v2582_v49 = vadd.f32 %v2550_v18, %v2389_v7 }
 0x418   : > { %v2757_v11 = vadd.f32 %v2725_v37, %v6531_v29 }
 0x419   : > { %3348 = vmatmul.msk.bf16.gmra.mxu3 %vm2899_vm13, %v2859_v17 }
 0x41a   : > { %v2793_v53 = vadd.f32 %v6553_v63, %v2757_v11 }
 0x41c   : > { %v2825_v34 = vmax.f32 %v2793_v53, 0.0 }
 0x41d   : > { %v2704_v12 = vpop.permute.xlu2 %2703 }
 0x41e   : > { %v2499_v58 = vpop.permute.xlu1 %2498  ;;  %v2852_v56 = vpack.c.bf16 %v2826_v24, %v2825_v34  ;;  %v2744_v36 = vmul.f32 %v6525_v43, %v2704_v12 }
 0x41f   : > { %v2548_v19 = vmul.f32 %v6466_v15, %v2499_v58 }
 0x420   : > { %3341 = vmatmul.msk.bf16.gmra.mxu0 %vm2899_vm13, %v2852_v56  ;;  %v2776_v33 = vadd.f32 %v2744_v36, %v2583_v1  ;;  %v2644_v56 = vpop.permute.xlu0 %2643 }
 0x421   : > { %v2580_v29 = vadd.f32 %v2548_v19, %v2387_v27  ;;  %v2375_v19 = vmul.f32 %v6461_v22, %v6353_v23  ;;  %v2729_v40 = vmul.f32 %v6525_v43, %v2644_v56  ;;  %v2376_v23 = vmul.f32 %v6461_v22, %v6378_v0 }
 0x422   : > { %v2812_v11 = vadd.f32 %v6553_v63, %v2776_v33 }
 0x423   : > { %v2773_v55 = vadd.f32 %v2741_v21, %v2580_v29  ;;  %v3096_v21 = vpop.f32.mrf.mxu1  ;;  %v6705_v29 = vld [vmem:[%s6867_s6] ss:$0 sm:$0xff] }
 0x424   : > { %v2844_v53 = vmax.f32 %v2812_v11, 0.0 }
 0x425   : > { %v2809_v57 = vadd.f32 %v6553_v63, %v2773_v55 }
 0x426   : > { %v2455_v45 = vpop.permute.xlu2 %2454 }
 0x427   : > { %v2696_v14 = vpop.permute.xlu1 %2695  ;;  %v2841_v13 = vmax.f32 %v2809_v57, 0.0  ;;  %v2537_v42 = vmul.f32 %v6466_v15, %v2455_v45  ;;  %v6722_v57 = vpop.f32.mrf.mxu2 }
 0x428   : > { %v2742_v61 = vmul.f32 %v6525_v43, %v2696_v14  ;;  %v2712_v28 = vpop.permute.xlu0 %2711 }
 0x429   : > { %v2569_v50 = vadd.f32 %v2537_v42, %v2376_v23  ;;  %v2746_v18 = vmul.f32 %v6525_v43, %v2712_v28 }
 0x42a   : > { %v2774_v8 = vadd.f32 %v2742_v61, %v2581_v46 }
 0x42b   : > { %v3099_v38 = vpop.f32.mrf.mxu1 }
 0x42c   : > { %v2810_v5 = vadd.f32 %v6553_v63, %v2774_v8 }
 0x42e   : > { %v2842_v4 = vmax.f32 %v2810_v5, 0.0  ;;  %v2515_v27 = vpop.permute.xlu2 %2514 }
 0x42f   : > { %v2640_v26 = vpop.permute.xlu1 %2639  ;;  %v2552_v35 = vmul.f32 %v6466_v15, %v2515_v27  ;;  %v6738_v7 = vpop.f32.mrf.mxu2 }
 0x430   : > { %v2728_v44 = vmul.f32 %v6525_v43, %v2640_v26  ;;  %v2860_v39 = vpack.c.bf16 %v2842_v4, %v2841_v13  ;;  %v2391_v4 = vmul.f32 %v6461_v22, %v6438_v9 }
 0x432   : > { %v2760_v51 = vadd.f32 %v2728_v44, %v2567_v47  ;;  %3349 = vmatmul.msk.bf16.gmra.mxu3 %vm2899_vm13, %v2860_v39  ;;  %v2584_v44 = vadd.f32 %v2552_v35, %v2391_v4 }
 0x433   : > { %v3101_v33 = vpop.f32.mrf.mxu1 }
 0x434   : > { %v2796_v3 = vadd.f32 %v6553_v63, %v2760_v51  ;;  %v2392_v51 = vmul.f32 %v6461_v22, %v6463_v10 }
 0x436   : > { %v2828_v62 = vmax.f32 %v2796_v3, 0.0 }
 0x437   : > { %v2700_v48 = vpop.permute.xlu1 %2699  ;;  %v2708_v6 = vpop.permute.xlu2 %2707 }
 0x438   : > { %v2743_v37 = vmul.f32 %v6525_v43, %v2700_v48  ;;  %v2853_v17 = vpack.c.bf16 %v2828_v62, %v2827_v52  ;;  %v2745_v13 = vmul.f32 %v6525_v43, %v2708_v6  ;;  %v3139_v56 = vpop.f32.mrf.mxu2 }
 0x43a   : > { %v2775_v25 = vadd.f32 %v2743_v37, %v2582_v49  ;;  %3342 = vmatmul.msk.bf16.gmra.mxu0 %vm2899_vm13, %v2853_v17  ;;  %v2777_v1 = vadd.f32 %v2745_v13, %v2584_v44 }
 0x43c   : > { %v2811_v60 = vadd.f32 %v6553_v63, %v2775_v25  ;;  %v2813_v62 = vadd.f32 %v6553_v63, %v2777_v1  ;;  %v2377_v25 = vmul.f32 %v6461_v22, %v6400_v2 }
 0x43e   : > { %v2843_v24 = vmax.f32 %v2811_v60, 0.0  ;;  %v2845_v17 = vmax.f32 %v2813_v62, 0.0 }
 0x440   : > { %v2451_v30 = vpop.permute.xlu1 %2450  ;;  %v2861_v34 = vpack.c.bf16 %v2844_v53, %v2843_v24  ;;  %v2463_v60 = vpop.permute.xlu2 %2462 }
 0x441   : > { %v2536_v58 = vmul.f32 %v6466_v15, %v2451_v30  ;;  %v2652_v53 = vpop.permute.xlu0 %2651  ;;  %v3141_v6 = vpop.f32.mrf.mxu2 }
 0x442   : > { %3350 = vmatmul.msk.bf16.gmra.mxu3 %vm2899_vm13, %v2861_v34  ;;  %v2731_v27 = vmul.f32 %v6525_v43, %v2652_v53 }
 0x443   : > { %v2568_v41 = vadd.f32 %v2536_v58, %v2375_v19  ;;  %v2539_v19 = vmul.f32 %v6466_v15, %v2463_v60 }
 0x445   : > { %v2957_v32 = vpop.f32.mrf.mxu0  ;;  %v2761_v14 = vadd.f32 %v2729_v40, %v2568_v41  ;;  %v2378_v40 = vmul.f32 %v6461_v22, %v6363_v16 }
 0x446   : > { %v2958_v55 = vadd.f32 %v6705_v29, %v2957_v32 }
 0x447   : > { %v2797_v0 = vadd.f32 %v6553_v63, %v2761_v14  ;;  %v2571_v32 = vadd.f32 %v2539_v19, %v2378_v40 }
 0x448   : > { %v3095_v46 = vadd.f32 %v3094_v31, %v2958_v55 }
 0x449   : > { %v2648_v61 = vpop.permute.xlu1 %2647  ;;  %v2829_v54 = vmax.f32 %v2797_v0, 0.0 }
 0x44a   : > { %v2730_v8 = vmul.f32 %v6525_v43, %v2648_v61  ;;  %3175 = vst.msk [vmem:[%s6717_s23] sm:$0xff] %vm3174_vm6, %v3095_v46 }
 0x44c   : > { %v2762_v5 = vadd.f32 %v2730_v8, %v2569_v50 }
 0x44d   : > { %v2959_v12 = vpop.f32.mrf.mxu0 }
 0x44e   : > { %v2798_v20 = vadd.f32 %v6553_v63, %v2762_v5  ;;  %v2960_v26 = vadd.f32 %v6705_v29, %v2959_v12 }
 0x450   : > { %v2830_v47 = vmax.f32 %v2798_v20, 0.0  ;;  %v3097_v39 = vadd.f32 %v3096_v21, %v2960_v26  ;;  %v3104_v21 = vpop.f32.mrf.mxu1  ;;  %v3144_v26 = vpop.f32.mrf.mxu2 }
 0x452   : > { %v2519_v59 = vpop.permute.xlu1 %2518  ;;  %v2854_v36 = vpack.c.bf16 %v2830_v47, %v2829_v54  ;;  %3176 = vst.msk [vmem:[%s6717_s23 + $0x8] sm:$0xff] %vm3174_vm6, %v3097_v39 }
 0x453   : > { %v2553_v9 = vmul.f32 %v6466_v15, %v2519_v59 }
 0x454   : > { %3343 = vmatmul.msk.bf16.gmra.mxu0 %vm2899_vm13, %v2854_v36 }
 0x455   : > { %v2585_v3 = vadd.f32 %v2553_v9, %v2392_v51  ;;  %v2962_v52 = vpop.f32.mrf.mxu0 }
 0x456   : > { %v2963_v10 = vadd.f32 %v6705_v29, %v2962_v52 }
 0x457   : > { %v2778_v48 = vadd.f32 %v2746_v18, %v2585_v3 }
 0x458   : > { %v3100_v49 = vadd.f32 %v3099_v38, %v2963_v10  ;;  %v3106_v38 = vpop.f32.mrf.mxu1  ;;  %v3146_v36 = vpop.f32.mrf.mxu2 }
 0x459   : > { %v2814_v45 = vadd.f32 %v6553_v63, %v2778_v48 }
 0x45a   : > { %v2459_v37 = vpop.permute.xlu1 %2458  ;;  %3177 = vst.msk [vmem:[%s6717_s23 + $0x10] sm:$0xff] %vm3174_vm6, %v3100_v49 }
 0x45b   : > { %v2538_v31 = vmul.f32 %v6466_v15, %v2459_v37  ;;  %v2846_v11 = vmax.f32 %v2814_v45, 0.0 }
 0x45d   : > { %v2862_v24 = vpack.c.bf16 %v2846_v11, %v2845_v17  ;;  %v2570_v30 = vadd.f32 %v2538_v31, %v2377_v25  ;;  %v2964_v34 = vpop.f32.mrf.mxu0 }
 0x45e   : > { %v2965_v58 = vadd.f32 %v6705_v29, %v2964_v34 }
 0x45f   : > { %3351 = vmatmul.msk.bf16.gmra.mxu3 %vm2899_vm13, %v2862_v24  ;;  %v2763_v2 = vadd.f32 %v2731_v27, %v2570_v30 }
 0x460   : > { %v3102_v41 = vadd.f32 %v3101_v33, %v2965_v58  ;;  %v3109_v54 = vpop.f32.mrf.mxu1  ;;  %v3149_v48 = vpop.f32.mrf.mxu2 }
 0x461   : > { %v2799_v15 = vadd.f32 %v6553_v63, %v2763_v2 }
 0x462   : > { %3178 = vst.msk [vmem:[%s6717_s23 + $0x18] sm:$0xff] %vm3174_vm6, %v3102_v41 }
 0x463   : > { %v2656_v42 = vpop.permute.xlu1 %2655  ;;  %v2831_v5 = vmax.f32 %v2799_v15, 0.0 }
 0x464   : > { %v2732_v55 = vmul.f32 %v6525_v43, %v2656_v42 }
 0x465   : > { %v2967_v14 = vpop.f32.mrf.mxu0  ;;  %v3002_v46 = vpop.f32.mrf.mxu3 }
 0x466   : > { %v2764_v23 = vadd.f32 %v2732_v55, %v2571_v32  ;;  %v2968_v61 = vadd.f32 %v6705_v29, %v2967_v14  ;;  %v3003_v50 = vadd.f32 %v6705_v29, %v3002_v46 }
 0x468   : > { %v2800_v16 = vadd.f32 %v6553_v63, %v2764_v23  ;;  %v3105_v22 = vadd.f32 %v3104_v21, %v2968_v61  ;;  %v3140_v8 = vadd.f32 %v3139_v56, %v3003_v50  ;;  %v3111_v1 = vpop.f32.mrf.mxu1  ;;  %v3151_v60 = vpop.f32.mrf.mxu2 }
 0x46a   : > { %v2832_v0 = vmax.f32 %v2800_v16, 0.0  ;;  %3179 = vst.msk [vmem:[%s6717_s23 + $0x20] sm:$0xff] %vm3174_vm6, %v3105_v22 }
 0x46b   : > { %3193 = vst.msk [vmem:[%s6717_s23 + $0x90] sm:$0xff] %vm3174_vm6, %v3140_v8 }
 0x46c   : > { %v2855_v43 = vpack.c.bf16 %v2832_v0, %v2831_v5 }
 0x46d   : > { %v2969_v35 = vpop.f32.mrf.mxu0  ;;  %v3004_v20 = vpop.f32.mrf.mxu3 }
 0x46e   : > { %3344 = vmatmul.msk.bf16.gmra.mxu0 %vm2899_vm13, %v2855_v43  ;;  %v2970_v63 = vadd.f32 %v6705_v29, %v2969_v35  ;;  %v3005_v12 = vadd.f32 %v6705_v29, %v3004_v20 }
 0x470   : > { %v3107_v4 = vadd.f32 %v3106_v38, %v2970_v63  ;;  %v3142_v13 = vadd.f32 %v3141_v6, %v3005_v12  ;;  %v3114_v10 = vpop.f32.mrf.mxu1  ;;  %v3154_v19 = vpop.f32.mrf.mxu2 }
 0x472   : > { %3180 = vst.msk [vmem:[%s6717_s23 + $0x28] sm:$0xff] %vm3174_vm6, %v3107_v4 }
 0x473   : > { %3194 = vst.msk [vmem:[%s6717_s23 + $0x98] sm:$0xff] %vm3174_vm6, %v3142_v13 }
 0x478   : > { %v3007_v47 = vpop.f32.mrf.mxu3  ;;  %v3116_v24 = vpop.f32.mrf.mxu1 }
 0x479   : > { %v3008_v44 = vadd.f32 %v6705_v29, %v3007_v47  ;;  %v3156_v46 = vpop.f32.mrf.mxu2 }
 0x47b   : > { %v3145_v39 = vadd.f32 %v3144_v26, %v3008_v44  ;;  %v2972_v28 = vpop.f32.mrf.mxu0 }
 0x47c   : > { %v2973_v59 = vadd.f32 %v6705_v29, %v2972_v28 }
 0x47d   : > { %3195 = vst.msk [vmem:[%s6717_s23 + $0xa0] sm:$0xff] %vm3174_vm6, %v3145_v39 }
 0x47e   : > { %v3110_v51 = vadd.f32 %v3109_v54, %v2973_v59 }
 0x480   : > { %3181 = vst.msk [vmem:[%s6717_s23 + $0x30] sm:$0xff] %vm3174_vm6, %v3110_v51  ;;  %v3009_v18 = vpop.f32.mrf.mxu3  ;;  %v3119_v21 = vpop.f32.mrf.mxu1 }
 0x481   : > { %v3010_v9 = vadd.f32 %v6705_v29, %v3009_v18  ;;  %v3159_v22 = vpop.f32.mrf.mxu2 }
 0x483   : > { %v3147_v3 = vadd.f32 %v3146_v36, %v3010_v9  ;;  %v2974_v52 = vpop.f32.mrf.mxu0 }
 0x484   : > { %v2975_v33 = vadd.f32 %v6705_v29, %v2974_v52 }
 0x485   : > { %3196 = vst.msk [vmem:[%s6717_s23 + $0xa8] sm:$0xff] %vm3174_vm6, %v3147_v3 }
 0x486   : > { %v3112_v62 = vadd.f32 %v3111_v1, %v2975_v33 }
 0x488   : > { %3182 = vst.msk [vmem:[%s6717_s23 + $0x38] sm:$0xff] %vm3174_vm6, %v3112_v62  ;;  %v3121_v61 = vpop.f32.mrf.mxu1 }
 0x489   : > { %v3012_v49 = vpop.f32.mrf.mxu3  ;;  %v3161_v20 = vpop.f32.mrf.mxu2 }
 0x48a   : > { %v3013_v45 = vadd.f32 %v6705_v29, %v3012_v49 }
 0x48b   : > { %v2977_v37 = vpop.f32.mrf.mxu0 }
 0x48c   : > { %v3150_v17 = vadd.f32 %v3149_v48, %v3013_v45  ;;  %v2978_v31 = vadd.f32 %v6705_v29, %v2977_v37 }
 0x48e   : > { %3197 = vst.msk [vmem:[%s6717_s23 + $0xb0] sm:$0xff] %vm3174_vm6, %v3150_v17  ;;  %v3115_v11 = vadd.f32 %v3114_v10, %v2978_v31 }
 0x490   : > { %3183 = vst.msk [vmem:[%s6717_s23 + $0x40] sm:$0xff] %vm3174_vm6, %v3115_v11  ;;  %v3124_v0 = vpop.f32.mrf.mxu1 }
 0x491   : > { %v3014_v25 = vpop.f32.mrf.mxu3  ;;  %v3164_v44 = vpop.f32.mrf.mxu2 }
 0x492   : > { %v3015_v53 = vadd.f32 %v6705_v29, %v3014_v25 }
 0x493   : > { %v2979_v30 = vpop.f32.mrf.mxu0 }
 0x494   : > { %v3152_v34 = vadd.f32 %v3151_v60, %v3015_v53  ;;  %v2980_v58 = vadd.f32 %v6705_v29, %v2979_v30 }
 0x496   : > { %3198 = vst.msk [vmem:[%s6717_s23 + $0xb8] sm:$0xff] %vm3174_vm6, %v3152_v34  ;;  %v3117_v56 = vadd.f32 %v3116_v24, %v2980_v58 }
 0x498   : > { %3184 = vst.msk [vmem:[%s6717_s23 + $0x48] sm:$0xff] %vm3174_vm6, %v3117_v56  ;;  %v3126_v54 = vpop.f32.mrf.mxu1 }
 0x499   : > { %v3166_v1 = vpop.f32.mrf.mxu2 }
 0x49c   : > { %v3017_v27 = vpop.f32.mrf.mxu3 }
 0x49d   : > { %v3018_v41 = vadd.f32 %v6705_v29, %v3017_v27  ;;  %v2982_v40 = vpop.f32.mrf.mxu0 }
 0x49e   : > { %v2983_v2 = vadd.f32 %v6705_v29, %v2982_v40 }
 0x49f   : > { %v3155_v42 = vadd.f32 %v3154_v19, %v3018_v41 }
 0x4a0   : > { %v3120_v32 = vadd.f32 %v3119_v21, %v2983_v2  ;;  %v3129_v9 = vpop.f32.mrf.mxu1 }
 0x4a1   : > { %3199 = vst.msk [vmem:[%s6717_s23 + $0xc0] sm:$0xff] %vm3174_vm6, %v3155_v42  ;;  %v3169_v45 = vpop.f32.mrf.mxu2 }
 0x4a2   : > { %3185 = vst.msk [vmem:[%s6717_s23 + $0x50] sm:$0xff] %vm3174_vm6, %v3120_v32 }
 0x4a4   : > { %v3019_v55 = vpop.f32.mrf.mxu3 }
 0x4a5   : > { %v3020_v23 = vadd.f32 %v6705_v29, %v3019_v55  ;;  %v2984_v14 = vpop.f32.mrf.mxu0 }
 0x4a6   : > { %v2985_v15 = vadd.f32 %v6705_v29, %v2984_v14 }
 0x4a7   : > { %v3157_v50 = vadd.f32 %v3156_v46, %v3020_v23 }
 0x4a8   : > { %v3122_v16 = vadd.f32 %v3121_v61, %v2985_v15  ;;  %v3131_v10 = vpop.f32.mrf.mxu1 }
 0x4a9   : > { %3200 = vst.msk [vmem:[%s6717_s23 + $0xc8] sm:$0xff] %vm3174_vm6, %v3157_v50  ;;  %v3171_v53 = vpop.f32.mrf.mxu2 }
 0x4aa   : > { %3186 = vst.msk [vmem:[%s6717_s23 + $0x58] sm:$0xff] %vm3174_vm6, %v3122_v16 }
 0x4b5   : > { %v3022_v8 = vpop.f32.mrf.mxu3 }
 0x4b6   : > { %v3023_v6 = vadd.f32 %v6705_v29, %v3022_v8 }
 0x4b7   : > { %v2987_v5 = vpop.f32.mrf.mxu0 }
 0x4b8   : > { %v3160_v38 = vadd.f32 %v3159_v22, %v3023_v6  ;;  %v2988_v43 = vadd.f32 %v6705_v29, %v2987_v5 }
 0x4ba   : > { %3201 = vst.msk [vmem:[%s6717_s23 + $0xd0] sm:$0xff] %vm3174_vm6, %v3160_v38  ;;  %v3125_v35 = vadd.f32 %v3124_v0, %v2988_v43 }
 0x4bc   : > { %3187 = vst.msk [vmem:[%s6717_s23 + $0x60] sm:$0xff] %vm3174_vm6, %v3125_v35 }
 0x4bd   : > { %v3024_v63 = vpop.f32.mrf.mxu3 }
 0x4be   : > { %v3025_v12 = vadd.f32 %v6705_v29, %v3024_v63 }
 0x4bf   : > { %v2989_v4 = vpop.f32.mrf.mxu0 }
 0x4c0   : > { %v3162_v13 = vadd.f32 %v3161_v20, %v3025_v12  ;;  %v2990_v26 = vadd.f32 %v6705_v29, %v2989_v4 }
 0x4c2   : > { %3202 = vst.msk [vmem:[%s6717_s23 + $0xd8] sm:$0xff] %vm3174_vm6, %v3162_v13  ;;  %v3127_v47 = vadd.f32 %v3126_v54, %v2990_v26 }
 0x4c4   : > { %3188 = vst.msk [vmem:[%s6717_s23 + $0x68] sm:$0xff] %vm3174_vm6, %v3127_v47 }
 0x4c5   : > { %v3027_v39 = vpop.f32.mrf.mxu3 }
 0x4c6   : > { %v3028_v28 = vadd.f32 %v6705_v29, %v3027_v39 }
 0x4c8   : > { %v3165_v59 = vadd.f32 %v3164_v44, %v3028_v28 }
 0x4ca   : > { %3203 = vst.msk [vmem:[%s6717_s23 + $0xe0] sm:$0xff] %vm3174_vm6, %v3165_v59 }
 0x4cd   : > { %v3029_v36 = vpop.f32.mrf.mxu3 }
 0x4ce   : > { %v3030_v51 = vadd.f32 %v6705_v29, %v3029_v36 }
 0x4d0   : > { %v3167_v18 = vadd.f32 %v3166_v1, %v3030_v51 }
 0x4d1   : > { %v2992_v3 = vpop.f32.mrf.mxu0 }
 0x4d2   : > { %3204 = vst.msk [vmem:[%s6717_s23 + $0xe8] sm:$0xff] %vm3174_vm6, %v3167_v18  ;;  %v2993_v52 = vadd.f32 %v6705_v29, %v2992_v3 }
 0x4d4   : > { %v3130_v33 = vadd.f32 %v3129_v9, %v2993_v52 }
 0x4d6   : > { %3189 = vst.msk [vmem:[%s6717_s23 + $0x70] sm:$0xff] %vm3174_vm6, %v3130_v33 }
 0x4d9   : > { %v2994_v62 = vpop.f32.mrf.mxu0 }
 0x4da   : > { %v2995_v48 = vadd.f32 %v6705_v29, %v2994_v62 }
 0x4dc   : > { %v3132_v49 = vadd.f32 %v3131_v10, %v2995_v48 }
 0x4de   : > { %3190 = vst.msk [vmem:[%s6717_s23 + $0x78] sm:$0xff] %vm3174_vm6, %v3132_v49 }
 0x4e2   : > { %v3032_v37 = vpop.f32.mrf.mxu3 }
 0x4e3   : > { %v3033_v17 = vadd.f32 %v6705_v29, %v3032_v37 }
 0x4e5   : > { %v3170_v31 = vadd.f32 %v3169_v45, %v3033_v17 }
 0x4e7   : > { %3205 = vst.msk [vmem:[%s6717_s23 + $0xf0] sm:$0xff] %vm3174_vm6, %v3170_v31 }
 0x4ea   : > { %v3034_v11 = vpop.f32.mrf.mxu3 }
 0x4eb   : > { %v3035_v25 = vadd.f32 %v6705_v29, %v3034_v11  ;;  %v2997_v60 = vpop.f32.mrf.mxu0 }
 0x4ec   : > { %v2998_v24 = vadd.f32 %v6705_v29, %v2997_v60 }
 0x4ed   : > { %v3172_v30 = vadd.f32 %v3171_v53, %v3035_v25 }
 0x4ee   : > { %v3135_v34 = vadd.f32 %v6722_v57, %v2998_v24 }
 0x4ef   : > { %3206 = vst.msk [vmem:[%s6717_s23 + $0xf8] sm:$0xff] %vm3174_vm6, %v3172_v30 }
 0x4f0   : > { %3191 = vst.msk [vmem:[%s6717_s23 + $0x80] sm:$0xff] %vm3174_vm6, %v3135_v34 }
 0x4f3   : > { %v2999_v58 = vpop.f32.mrf.mxu0 }
 0x4f4   : > { %v3000_v56 = vadd.f32 %v6705_v29, %v2999_v58 }
 0x4f6   : > { %v3137_v19 = vadd.f32 %v6738_v7, %v3000_v56 }
 0x4f8   : > { %3192 = vst.msk [vmem:[%s6717_s23 + $0x88] sm:$0xff] %vm3174_vm6, %v3137_v19 }
 0x4f9 PF: > { %s17_s28 = sadd.s32 1, %s3711_s28   ;;  %s7767_s24 = smov %s3703_s26 }
 0x4fa   : > { %p14_p7 = scmp.ge.s32.totalorder %s17_s28, 12   ;;  %s7768_s25 = smov %s3707_s27 }
 0x4fb   : > { %s7769_s26 = smov %s7772_s29  ;;  %s7770_s27 = smov %s7776_s30 }
 0x4fc   :  { %16 = sbr.rel (!%p14_p7) target bundleno = 3 (0x3), region = 81 }

</bundles_post_ra>
